<compile_context>
chip_gen: v6e
topology: v6e:2x2x1
jax: 0.10.0
libtpu: 0.0.40
codegen_flags: <defaults>
</compile_context>

<pallas_src>
import functools
import math

import jax
import jax.numpy as jnp
from jax.experimental import pallas as pl
from jax.experimental.pallas import tpu as pltpu

# Keep f32 matmuls at full f32 accuracy both in the kernel and in the XLA
# reference: w0=30 amplifies any low-precision rounding of the first layer.
jax.config.update("jax_default_matmul_precision", "highest")

_TILE_N_MAX = 2048   # pixel (lane) tile: 128-multiple; activations (dh x tile)
                     # stay a few hundred KiB of VMEM, per-step overhead hidden.


# ---------------------------------------------------------------------------
# Fused SirenNet kernel: per pixel-tile, per batch element
#   x = coords; for each layer: x = sin(w0 * (W @ x + b)) * mod; out = Wl @ x + bl
# ---------------------------------------------------------------------------


def _small_matmul(w, x):
    """w: (d_out, d_in) @ x: (d_in, n) -> (d_out, n), f32.

    d_in < 8 (the coords layer, d_in=2) is done as rank-1 VPU updates (too
    small for the MXU); larger contractions go to the MXU.
    """
    d_out, d_in = w.shape
    if d_in < 8:
        acc = w[:, 0:1] * x[0:1, :]
        for k in range(1, d_in):
            acc = acc + w[:, k:k + 1] * x[k:k + 1, :]
        return acc
    return jnp.dot(w, x, preferred_element_type=jnp.float32)


def _fused_siren_net_kernel(*refs, num_layers, w0s, modulate):
    """One pixel-tile of the whole SirenNet forward (transposed layout).

    refs = [coords(d_in, tn),
            (W_i(dh, d_in_i), b_i(dh, 1)) * num_layers,
            W_last(do_pad, dh), b_last(do_pad, 1),
            mod_i(dh, 1) * num_layers   (only if modulate),
            out(dim_out, tn)]
    """
    out_ref = refs[-1]
    coords_ref = refs[0]
    p = 1
    layers = []
    for _ in range(num_layers):
        layers.append((refs[p], refs[p + 1]))
        p += 2
    w_last_ref, b_last_ref = refs[p], refs[p + 1]
    p += 2
    mod_refs = refs[p:p + num_layers] if modulate else (None,) * num_layers

    x = coords_ref[...].astype(jnp.float32)                     # (d_in, tn)
    for (w_ref, b_ref), mod_ref, w0 in zip(layers, mod_refs, w0s):
        h = _small_matmul(w_ref[...].astype(jnp.float32), x)
        h = h + b_ref[...].astype(jnp.float32)                  # lane broadcast
        x = jnp.sin(jnp.float32(w0) * h)                        # Sine activation
        if mod_ref is not None:
            x = x * mod_ref[...].astype(jnp.float32)            # per-batch FiLM scale
    out = _small_matmul(w_last_ref[...].astype(jnp.float32), x)
    out = out + b_last_ref[...].astype(jnp.float32)
    # Last-layer rows were zero-padded to a multiple of 8 for MXU legality;
    # store only the real output rows (no pad/unpad HBM traffic).
    out_ref[...] = out[:out_ref.shape[0], :].astype(out_ref.dtype)


def siren_net_fused(coords_t, net_params, w0s, last_params, mods, batch,
                    *, tile_n_max=_TILE_N_MAX):
    """Fused SirenNet forward on TPU.

    coords_t: (d_in0, N) f32 transposed coordinate grid (shared by all batches).
    net_params: list of (W[dh, d_in_i], b[dh]) per hidden layer.
    w0s: static tuple of per-layer w0 floats.
    last_params: (W_last[dim_out, dh], b_last[dim_out]).
    mods: tuple of (batch, dh) modulation arrays, or None.
    Returns (batch, dim_out, N).
    """
    d_in0, n_pix = coords_t.shape
    num_layers = len(net_params)
    dh = net_params[0][0].shape[0]
    if dh % 8:
        raise ValueError("dim_hidden must be a multiple of 8 for the fused TPU kernel")

    w_last, b_last = last_params
    dim_out = w_last.shape[0]
    do_pad = ((dim_out + 7) // 8) * 8
    if do_pad != dim_out:
        # Exact: zero rows produce zero outputs that are never stored.
        w_last = jnp.pad(w_last, ((0, do_pad - dim_out), (0, 0)))
        b_last = jnp.pad(b_last, (0, do_pad - dim_out))

    # Pixel-tile choice: full extent when it fits one tile, else 128-multiples.
    tile_n = n_pix if n_pix <= tile_n_max else tile_n_max
    n_tiles = pl.cdiv(n_pix, tile_n)
    # Guarantee >=2 grid steps when there is enough work so the "parallel"
    # axes can shard across v7x's two TensorCores and the DMA pipeline overlaps.
    if batch * n_tiles < 2 and n_pix >= 256:
        tile_n = ((n_pix + 1) // 2 + 127) // 128 * 128
        n_tiles = pl.cdiv(n_pix, tile_n)

    modulate = mods is not None
    out_dtype = coords_t.dtype

    in_specs = [pl.BlockSpec((d_in0, tile_n), lambda b, j: (0, j))]
    inputs = [coords_t]
    for w, bvec in net_params:                      # weights resident in VMEM
        in_specs.append(pl.BlockSpec(w.shape, lambda b, j: (0, 0)))
        inputs.append(w)
        in_specs.append(pl.BlockSpec((w.shape[0], 1), lambda b, j: (0, 0)))
        inputs.append(bvec.reshape(w.shape[0], 1))
    in_specs.append(pl.BlockSpec((do_pad, dh), lambda b, j: (0, 0)))
    inputs.append(w_last)
    in_specs.append(pl.BlockSpec((do_pad, 1), lambda b, j: (0, 0)))
    inputs.append(b_last.reshape(do_pad, 1))
    if modulate:
        for m in mods:                              # per-batch (dh, 1) scale
            in_specs.append(pl.BlockSpec((None, dh, 1), lambda b, j: (b, 0, 0)))
            inputs.append(m.reshape(batch, dh, 1).astype(jnp.float32))
    out_spec = pl.BlockSpec((None, dim_out, tile_n), lambda b, j: (b, 0, j))

    # Advisory cost estimate so XLA can schedule around the custom call.
    rows = batch * n_pix
    flops = 0
    d_prev = d_in0
    for w, _ in net_params:
        flops += rows * (2 * d_prev * w.shape[0] + 4 * w.shape[0])
        d_prev = w.shape[0]
    flops += rows * (2 * d_prev * do_pad + do_pad)
    transcendentals = rows * dh * num_layers
    bytes_accessed = 4 * (coords_t.size + batch * dim_out * n_pix
                          + sum(w.size + b.size for w, b in net_params)
                          + w_last.size + b_last.size
                          + (sum(int(m.size) for m in mods) if modulate else 0))

    kernel = functools.partial(
        _fused_siren_net_kernel,
        num_layers=num_layers,
        w0s=tuple(float(v) for v in w0s),
        modulate=modulate)

    return pl.pallas_call(
        kernel,
        out_shape=jax.ShapeDtypeStruct((batch, dim_out, n_pix), out_dtype),
        grid_spec=pltpu.PrefetchScalarGridSpec(
            num_scalar_prefetch=0,
            grid=(batch, n_tiles),
            in_specs=in_specs,
            out_specs=out_spec,
        ),
        compiler_params=pltpu.CompilerParams(
            dimension_semantics=("parallel", "parallel")),
        cost_estimate=pl.CostEstimate(
            flops=int(flops),
            transcendentals=int(transcendentals),
            bytes_accessed=int(bytes_accessed)),
    )(*inputs)


# ---------------------------------------------------------------------------
# ModulatedSiren forward (Modulator in XLA, SirenNet fused in Pallas).
# ---------------------------------------------------------------------------


def _make_coord_grid(image_height, image_width):
    ys = jnp.linspace(-1.0, 1.0, image_height)
    xs = jnp.linspace(-1.0, 1.0, image_width)
    gy, gx = jnp.meshgrid(ys, xs, indexing="ij")
    return jnp.stack([gy, gx], axis=-1).reshape(image_height * image_width, 2)


def modulator_forward(z, mod_params):
    # Tiny per-batch MLP on [B, latent]; left to XLA's fused matmuls.
    x = z
    hiddens = []
    for w, b in mod_params:
        x = jax.nn.relu(x @ w.T + b)
        hiddens.append(x)
        x = jnp.concatenate([x, z], axis=1)
    return tuple(hiddens)


def modulated_siren_forward(params, latent, image_height, image_width,
                            modulate=True):
    # TODO(synk): the pretrained torchvision ResNet-18 Encoder (conv/BN stack,
    # pretrained weights) has no clean in-script Pallas equivalent; `latent`
    # stands in for Encoder(img).
    batch = latent.shape[0] if latent is not None else 1
    coords_t = _make_coord_grid(image_height, image_width).T   # (2, H*W)

    mods = (modulator_forward(latent, params["mod"])
            if (modulate and latent is not None) else None)

    out = siren_net_fused(coords_t, params["net"], params["w0s"],
                          params["last"], mods, batch)          # (b, c, h*w)
    out = out.reshape(batch, -1, image_height, image_width)     # b c h w
    if out.shape[1] == 1:                                       # squeeze(1) iff c==1
        out = out[:, 0]
    return out


# ---------------------------------------------------------------------------
# Init (mirrors the PyTorch module's init) and a pure-XLA reference forward.
# ---------------------------------------------------------------------------


def _uniform(key, shape, bound):
    return jax.random.uniform(key, shape, jnp.float32, minval=-bound, maxval=bound)


def _init_siren_linear(key, dim_in, dim_out, w0, c=6.0, is_first=False):
    w_std = (1.0 / dim_in) if is_first else (math.sqrt(c / dim_in) / w0)
    kw, kb = jax.random.split(key)
    return _uniform(kw, (dim_out, dim_in), w_std), _uniform(kb, (dim_out,), w_std)


def _init_linear(key, dim_in, dim_out):
    bound = 1.0 / math.sqrt(dim_in)
    kw, kb = jax.random.split(key)
    return _uniform(kw, (dim_out, dim_in), bound), _uniform(kb, (dim_out,), bound)


def init_modulated_siren(key, dim_hidden, dim_out, num_layers, latent_dim,
                         w0=1.0, w0_initial=30.0):
    keys = jax.random.split(key, 2 * num_layers + 1)
    net, w0s = [], []
    for ind in range(num_layers):
        is_first = ind == 0
        layer_w0 = w0_initial if is_first else w0
        layer_dim_in = 2 if is_first else dim_hidden
        net.append(_init_siren_linear(keys[ind], layer_dim_in, dim_hidden,
                                      layer_w0, is_first=is_first))
        w0s.append(layer_w0)
    last = _init_siren_linear(keys[num_layers], dim_hidden, dim_out, w0)
    mod = []
    for ind in range(num_layers):
        d_in = latent_dim if ind == 0 else dim_hidden + latent_dim
        mod.append(_init_linear(keys[num_layers + 1 + ind], d_in, dim_hidden))
    return {"net": net, "w0s": tuple(w0s), "last": last, "mod": mod}


def reference_forward(params, latent, image_height, image_width, modulate=True):
    """Pure-jnp mirror of the PyTorch forward (no Pallas)."""
    batch = latent.shape[0] if latent is not None else 1
    grid = _make_coord_grid(image_height, image_width)          # (h*w, 2)
    coords = jnp.broadcast_to(grid, (batch,) + grid.shape)
    if modulate and latent is not None:
        mods = modulator_forward(latent, params["mod"])
    else:
        mods = (None,) * len(params["net"])
    x = coords
    for (w, b), w0, mod in zip(params["net"], params["w0s"], mods):
        x = jnp.sin(w0 * (x @ w.T + b))         # Siren layer (dropout p=0)
        if mod is not None:
            x = x * mod[:, None, :]             # 'b d -> b () d'
    wl, bl = params["last"]
    out = x @ wl.T + bl                         # final activation = Identity
    out = out.reshape(batch, image_height, image_width, -1)
    out = jnp.transpose(out, (0, 3, 1, 2))
    if out.shape[1] == 1:
        out = out[:, 0]
    return out


if __name__ == "__main__":
    key = jax.random.PRNGKey(0)
    k_params, k_latent = jax.random.split(key)

    batch, height, width = 2, 16, 16
    dim_hidden, dim_out, num_layers, latent_dim = 32, 1, 3, 32
    params = init_modulated_siren(k_params, dim_hidden, dim_out, num_layers,
                                  latent_dim, w0=1.0, w0_initial=30.0)
    latent = jax.random.normal(k_latent, (batch, latent_dim), dtype=jnp.float32)

    # 1) Full fused ModulatedSiren forward vs. pure-XLA reference.
    out = jax.block_until_ready(
        modulated_siren_forward(params, latent, height, width))
    ref = reference_forward(params, latent, height, width)
    assert out.shape == (batch, height, width), out.shape
    err = float(jnp.max(jnp.abs(out - ref)))
    assert err < 5e-3, f"max abs err {err}"

    # 2) Multi-tile path with a partial last pixel tile (N=2304 -> 2048 + 256).
    h2, w2 = 48, 48
    out2 = jax.block_until_ready(
        modulated_siren_forward(params, latent, h2, w2))
    ref2 = reference_forward(params, latent, h2, w2)
    assert out2.shape == (batch, h2, w2), out2.shape
    err2 = float(jnp.max(jnp.abs(out2 - ref2)))
    assert err2 < 5e-3, f"max abs err {err2}"

    print("KERNEL_OK")
</pallas_src>

<mosaic_0001>
module attributes {stable_mosaic.version = 11 : i64} {
  func.func @_fused_siren_net_kernel(%arg0: i32, %arg1: i32, %arg2: memref<2x256xf32, #tpu.memory_space<vmem>>, %arg3: memref<32x2xf32, #tpu.memory_space<vmem>>, %arg4: memref<32x1xf32, #tpu.memory_space<vmem>>, %arg5: memref<32x32xf32, #tpu.memory_space<vmem>>, %arg6: memref<32x1xf32, #tpu.memory_space<vmem>>, %arg7: memref<32x32xf32, #tpu.memory_space<vmem>>, %arg8: memref<32x1xf32, #tpu.memory_space<vmem>>, %arg9: memref<8x32xf32, #tpu.memory_space<vmem>>, %arg10: memref<8x1xf32, #tpu.memory_space<vmem>>, %arg11: memref<1x32x1xf32, #tpu.memory_space<vmem>>, %arg12: memref<1x32x1xf32, #tpu.memory_space<vmem>>, %arg13: memref<1x32x1xf32, #tpu.memory_space<vmem>>, %arg14: memref<1x1x256xf32, #tpu.memory_space<vmem>>) attributes {dimension_semantics = [#tpu.dimension_semantics<parallel>, #tpu.dimension_semantics<parallel>], iteration_bounds = array<i64: 2, 1>, scalar_prefetch = 0 : i64, scratch_operands = 0 : i64, tpu.core_type = #tpu.core_type<tc>, window_params = [{transform_indices = @transform_0, window_bounds = array<i64: 2, 256>}, {pipeline_mode = #tpu.pipeline_mode<synchronous>, transform_indices = @transform_1, window_bounds = array<i64: 32, 2>}, {pipeline_mode = #tpu.pipeline_mode<synchronous>, transform_indices = @transform_2, window_bounds = array<i64: 32, 1>}, {pipeline_mode = #tpu.pipeline_mode<synchronous>, transform_indices = @transform_3, window_bounds = array<i64: 32, 32>}, {pipeline_mode = #tpu.pipeline_mode<synchronous>, transform_indices = @transform_4, window_bounds = array<i64: 32, 1>}, {pipeline_mode = #tpu.pipeline_mode<synchronous>, transform_indices = @transform_5, window_bounds = array<i64: 32, 32>}, {pipeline_mode = #tpu.pipeline_mode<synchronous>, transform_indices = @transform_6, window_bounds = array<i64: 32, 1>}, {pipeline_mode = #tpu.pipeline_mode<synchronous>, transform_indices = @transform_7, window_bounds = array<i64: 8, 32>}, {pipeline_mode = #tpu.pipeline_mode<synchronous>, transform_indices = @transform_8, window_bounds = array<i64: 8, 1>}, {transform_indices = @transform_9, window_bounds = array<i64: 1, 32, 1>}, {transform_indices = @transform_10, window_bounds = array<i64: 1, 32, 1>}, {transform_indices = @transform_11, window_bounds = array<i64: 1, 32, 1>}, {transform_indices = @transform_12, window_bounds = array<i64: 1, 1, 256>}]} {
    %c0 = arith.constant 0 : index
    %c0_0 = arith.constant 0 : index
    %0 = vector.load %arg2[%c0, %c0_0] : memref<2x256xf32, #tpu.memory_space<vmem>>, vector<2x256xf32>
    %c0_1 = arith.constant 0 : index
    %c0_2 = arith.constant 0 : index
    %1 = vector.load %arg3[%c0_1, %c0_2] : memref<32x2xf32, #tpu.memory_space<vmem>>, vector<32x2xf32>
    %2 = vector.extract_strided_slice %1 {offsets = [0, 0], sizes = [32, 1], strides = [1, 1]} : vector<32x2xf32> to vector<32x1xf32>
    %3 = vector.extract_strided_slice %0 {offsets = [0, 0], sizes = [1, 256], strides = [1, 1]} : vector<2x256xf32> to vector<1x256xf32>
    %4 = vector.broadcast %2 : vector<32x1xf32> to vector<32x256xf32>
    %5 = vector.broadcast %3 : vector<1x256xf32> to vector<32x256xf32>
    %6 = arith.mulf %4, %5 : vector<32x256xf32>
    %7 = vector.extract_strided_slice %1 {offsets = [0, 1], sizes = [32, 1], strides = [1, 1]} : vector<32x2xf32> to vector<32x1xf32>
    %8 = vector.extract_strided_slice %0 {offsets = [1, 0], sizes = [1, 256], strides = [1, 1]} : vector<2x256xf32> to vector<1x256xf32>
    %9 = vector.broadcast %7 : vector<32x1xf32> to vector<32x256xf32>
    %10 = vector.broadcast %8 : vector<1x256xf32> to vector<32x256xf32>
    %11 = arith.mulf %9, %10 : vector<32x256xf32>
    %12 = arith.addf %6, %11 : vector<32x256xf32>
    %c0_3 = arith.constant 0 : index
    %c0_4 = arith.constant 0 : index
    %13 = vector.load %arg4[%c0_3, %c0_4] : memref<32x1xf32, #tpu.memory_space<vmem>>, vector<32x1xf32>
    %14 = vector.broadcast %13 : vector<32x1xf32> to vector<32x256xf32>
    %15 = arith.addf %12, %14 : vector<32x256xf32>
    %cst = arith.constant 3.000000e+01 : f32
    %16 = vector.broadcast %cst : f32 to vector<32x256xf32>
    %17 = arith.mulf %16, %15 : vector<32x256xf32>
    %18 = math.sin %17 : vector<32x256xf32>
    %c0_5 = arith.constant 0 : index
    %c0_6 = arith.constant 0 : index
    %c0_7 = arith.constant 0 : index
    %19 = vector.load %arg11[%c0_5, %c0_6, %c0_7] : memref<1x32x1xf32, #tpu.memory_space<vmem>>, vector<1x32x1xf32>
    %20 = vector.shape_cast %19 : vector<1x32x1xf32> to vector<32x1xf32>
    %21 = vector.broadcast %20 : vector<32x1xf32> to vector<32x256xf32>
    %22 = arith.mulf %18, %21 : vector<32x256xf32>
    %c0_8 = arith.constant 0 : index
    %c0_9 = arith.constant 0 : index
    %23 = vector.load %arg5[%c0_8, %c0_9] : memref<32x32xf32, #tpu.memory_space<vmem>>, vector<32x32xf32>
    %cst_10 = arith.constant dense<0.000000e+00> : vector<32x256xf32>
    %24 = tpu.matmul %23, %22, %cst_10 {dimension_numbers = #tpu.dot_dimension_numbers<[1], [0], [0], [1], [0, 0, 1, 1], [], []>, precision = #tpu.contract_precision<fp32>} : vector<32x32xf32>, vector<32x256xf32>, vector<32x256xf32> -> vector<32x256xf32>
    %c0_11 = arith.constant 0 : index
    %c0_12 = arith.constant 0 : index
    %25 = vector.load %arg6[%c0_11, %c0_12] : memref<32x1xf32, #tpu.memory_space<vmem>>, vector<32x1xf32>
    %26 = vector.broadcast %25 : vector<32x1xf32> to vector<32x256xf32>
    %27 = arith.addf %24, %26 : vector<32x256xf32>
    %cst_13 = arith.constant 1.000000e+00 : f32
    %28 = vector.broadcast %cst_13 : f32 to vector<32x256xf32>
    %29 = arith.mulf %28, %27 : vector<32x256xf32>
    %30 = math.sin %29 : vector<32x256xf32>
    %c0_14 = arith.constant 0 : index
    %c0_15 = arith.constant 0 : index
    %c0_16 = arith.constant 0 : index
    %31 = vector.load %arg12[%c0_14, %c0_15, %c0_16] : memref<1x32x1xf32, #tpu.memory_space<vmem>>, vector<1x32x1xf32>
    %32 = vector.shape_cast %31 : vector<1x32x1xf32> to vector<32x1xf32>
    %33 = vector.broadcast %32 : vector<32x1xf32> to vector<32x256xf32>
    %34 = arith.mulf %30, %33 : vector<32x256xf32>
    %c0_17 = arith.constant 0 : index
    %c0_18 = arith.constant 0 : index
    %35 = vector.load %arg7[%c0_17, %c0_18] : memref<32x32xf32, #tpu.memory_space<vmem>>, vector<32x32xf32>
    %cst_19 = arith.constant dense<0.000000e+00> : vector<32x256xf32>
    %36 = tpu.matmul %35, %34, %cst_19 {dimension_numbers = #tpu.dot_dimension_numbers<[1], [0], [0], [1], [0, 0, 1, 1], [], []>, precision = #tpu.contract_precision<fp32>} : vector<32x32xf32>, vector<32x256xf32>, vector<32x256xf32> -> vector<32x256xf32>
    %c0_20 = arith.constant 0 : index
    %c0_21 = arith.constant 0 : index
    %37 = vector.load %arg8[%c0_20, %c0_21] : memref<32x1xf32, #tpu.memory_space<vmem>>, vector<32x1xf32>
    %38 = vector.broadcast %37 : vector<32x1xf32> to vector<32x256xf32>
    %39 = arith.addf %36, %38 : vector<32x256xf32>
    %cst_22 = arith.constant 1.000000e+00 : f32
    %40 = vector.broadcast %cst_22 : f32 to vector<32x256xf32>
    %41 = arith.mulf %40, %39 : vector<32x256xf32>
    %42 = math.sin %41 : vector<32x256xf32>
    %c0_23 = arith.constant 0 : index
    %c0_24 = arith.constant 0 : index
    %c0_25 = arith.constant 0 : index
    %43 = vector.load %arg13[%c0_23, %c0_24, %c0_25] : memref<1x32x1xf32, #tpu.memory_space<vmem>>, vector<1x32x1xf32>
    %44 = vector.shape_cast %43 : vector<1x32x1xf32> to vector<32x1xf32>
    %45 = vector.broadcast %44 : vector<32x1xf32> to vector<32x256xf32>
    %46 = arith.mulf %42, %45 : vector<32x256xf32>
    %c0_26 = arith.constant 0 : index
    %c0_27 = arith.constant 0 : index
    %47 = vector.load %arg9[%c0_26, %c0_27] : memref<8x32xf32, #tpu.memory_space<vmem>>, vector<8x32xf32>
    %cst_28 = arith.constant dense<0.000000e+00> : vector<8x256xf32>
    %48 = tpu.matmul %47, %46, %cst_28 {dimension_numbers = #tpu.dot_dimension_numbers<[1], [0], [0], [1], [0, 0, 1, 1], [], []>, precision = #tpu.contract_precision<fp32>} : vector<8x32xf32>, vector<32x256xf32>, vector<8x256xf32> -> vector<8x256xf32>
    %c0_29 = arith.constant 0 : index
    %c0_30 = arith.constant 0 : index
    %49 = vector.load %arg10[%c0_29, %c0_30] : memref<8x1xf32, #tpu.memory_space<vmem>>, vector<8x1xf32>
    %50 = vector.broadcast %49 : vector<8x1xf32> to vector<8x256xf32>
    %51 = arith.addf %48, %50 : vector<8x256xf32>
    %52 = vector.extract_strided_slice %51 {offsets = [0, 0], sizes = [1, 256], strides = [1, 1]} : vector<8x256xf32> to vector<1x256xf32>
    %c0_31 = arith.constant 0 : index
    %c0_32 = arith.constant 0 : index
    %c0_33 = arith.constant 0 : index
    %53 = vector.load %arg14[%c0_31, %c0_32, %c0_33] : memref<1x1x256xf32, #tpu.memory_space<vmem>>, vector<1x1x256xf32>
    %54 = vector.shape_cast %53 : vector<1x1x256xf32> to vector<1x256xf32>
    %55 = vector.shape_cast %52 : vector<1x256xf32> to vector<1x1x256xf32>
    tpu.vector_store %arg14[%c0_31, %c0_32, %c0_33], %55 {strides = array<i32>} : memref<1x1x256xf32, #tpu.memory_space<vmem>>, vector<1x1x256xf32>,
    return
  }
  func.func @transform_0(%arg0: i32, %arg1: i32) -> (i32, i32) {
    %c0_i32 = arith.constant 0 : i32
    %c0_i32_0 = arith.constant 0 : i32
    return %c0_i32, %arg1 : i32, i32
  }
  func.func @transform_1(%arg0: i32, %arg1: i32) -> (i32, i32) {
    %c0_i32 = arith.constant 0 : i32
    %c0_i32_0 = arith.constant 0 : i32
    %c0_i32_1 = arith.constant 0 : i32
    return %c0_i32, %c0_i32_0 : i32, i32
  }
  func.func @transform_2(%arg0: i32, %arg1: i32) -> (i32, i32) {
    %c0_i32 = arith.constant 0 : i32
    %c0_i32_0 = arith.constant 0 : i32
    %c0_i32_1 = arith.constant 0 : i32
    return %c0_i32, %c0_i32_0 : i32, i32
  }
  func.func @transform_3(%arg0: i32, %arg1: i32) -> (i32, i32) {
    %c0_i32 = arith.constant 0 : i32
    %c0_i32_0 = arith.constant 0 : i32
    %c0_i32_1 = arith.constant 0 : i32
    return %c0_i32, %c0_i32_0 : i32, i32
  }
  func.func @transform_4(%arg0: i32, %arg1: i32) -> (i32, i32) {
    %c0_i32 = arith.constant 0 : i32
    %c0_i32_0 = arith.constant 0 : i32
    %c0_i32_1 = arith.constant 0 : i32
    return %c0_i32, %c0_i32_0 : i32, i32
  }
  func.func @transform_5(%arg0: i32, %arg1: i32) -> (i32, i32) {
    %c0_i32 = arith.constant 0 : i32
    %c0_i32_0 = arith.constant 0 : i32
    %c0_i32_1 = arith.constant 0 : i32
    return %c0_i32, %c0_i32_0 : i32, i32
  }
  func.func @transform_6(%arg0: i32, %arg1: i32) -> (i32, i32) {
    %c0_i32 = arith.constant 0 : i32
    %c0_i32_0 = arith.constant 0 : i32
    %c0_i32_1 = arith.constant 0 : i32
    return %c0_i32, %c0_i32_0 : i32, i32
  }
  func.func @transform_7(%arg0: i32, %arg1: i32) -> (i32, i32) {
    %c0_i32 = arith.constant 0 : i32
    %c0_i32_0 = arith.constant 0 : i32
    %c0_i32_1 = arith.constant 0 : i32
    return %c0_i32, %c0_i32_0 : i32, i32
  }
  func.func @transform_8(%arg0: i32, %arg1: i32) -> (i32, i32) {
    %c0_i32 = arith.constant 0 : i32
    %c0_i32_0 = arith.constant 0 : i32
    %c0_i32_1 = arith.constant 0 : i32
    return %c0_i32, %c0_i32_0 : i32, i32
  }
  func.func @transform_9(%arg0: i32, %arg1: i32) -> (i32, i32, i32) {
    %c0_i32 = arith.constant 0 : i32
    %c0_i32_0 = arith.constant 0 : i32
    %c0_i32_1 = arith.constant 0 : i32
    return %arg0, %c0_i32, %c0_i32_0 : i32, i32, i32
  }
  func.func @transform_10(%arg0: i32, %arg1: i32) -> (i32, i32, i32) {
    %c0_i32 = arith.constant 0 : i32
    %c0_i32_0 = arith.constant 0 : i32
    %c0_i32_1 = arith.constant 0 : i32
    return %arg0, %c0_i32, %c0_i32_0 : i32, i32, i32
  }
  func.func @transform_11(%arg0: i32, %arg1: i32) -> (i32, i32, i32) {
    %c0_i32 = arith.constant 0 : i32
    %c0_i32_0 = arith.constant 0 : i32
    %c0_i32_1 = arith.constant 0 : i32
    return %arg0, %c0_i32, %c0_i32_0 : i32, i32, i32
  }
  func.func @transform_12(%arg0: i32, %arg1: i32) -> (i32, i32, i32) {
    %c0_i32 = arith.constant 0 : i32
    %c0_i32_0 = arith.constant 0 : i32
    return %arg0, %c0_i32, %arg1 : i32, i32, i32
  }
}

</mosaic_0001>

<bundles_post_ra>
// kernel: tpu_custom_call.1
= control target key start
LH: loop header
LB: loop body
LE: loop exit
PB: predicated region body
PF: predicated region fallthrough
CT: control target
= control target key end

     0   :  { %s9310_s0 = inlined_call_operand.vmem [shape: f32[2,256], index: 0, kind: input, shape index: {}]   ;;  %s9311_s1 = inlined_call_operand.vmem [shape: f32[32,2], index: 1, kind: input, shape index: {}]   ;;  %s9312_s2 = inlined_call_operand.vmem [shape: f32[32,1], index: 2, kind: input, shape index: {}]   ;;  %s9313_s3 = inlined_call_operand.vmem [shape: f32[32,32], index: 3, kind: input, shape index: {}]   ;;  %s9314_s4 = inlined_call_operand.vmem [shape: f32[32,1], index: 4, kind: input, shape index: {}]   ;;  %s9315_s5 = inlined_call_operand.vmem [shape: f32[32,32], index: 5, kind: input, shape index: {}]   ;;  %s9316_s6 = inlined_call_operand.vmem [shape: f32[32,1], index: 6, kind: input, shape index: {}]   ;;  %s9317_s7 = inlined_call_operand.vmem [shape: f32[8,32], index: 7, kind: input, shape index: {}]   ;;  %s9318_s8 = inlined_call_operand.vmem [shape: f32[8,1], index: 8, kind: input, shape index: {}]   ;;  %s9319_s9 = inlined_call_operand.vmem [shape: f32[2,32,1], index: 9, kind: input, shape index: {}]   ;;  %s9320_s10 = inlined_call_operand.vmem [shape: f32[2,32,1], index: 10, kind: input, shape index: {}]   ;;  %s9321_s11 = inlined_call_operand.vmem [shape: f32[2,32,1], index: 11, kind: input, shape index: {}]   ;;  %s9322_s12 = inlined_call_operand.hbm [shape: f32[2,1,256], index: 12, kind: output, shape index: {}]  }
   0x1   :  { %9370 = sst [smem:[#allocation12_spill]] %s9310_s0 }
   0x2   :  { %17 = vsyncpa [#allocation3], 0 }
   0x3   :  { %19 = vsyncpa [#allocation3 + $0x1], 0  ;;  %s5922_s21 = smov 0   ;;  %s5924_s22 = smov 0  }
   0x4   :  { %s5926_s23 = smov 0   ;;  %s5928_s24 = smov 0  }
   0x5   :  { %s5930_s25 = smov 0   ;;  %s5932_s26 = smov 0  }
   0x6 LB: > { %9371 = sst [smem:[#allocation5_spill]] %s5840_s25  ;;  %s5386_s27 = sadd.s32 4294967295, %s5844_s26   ;;  %s5844_s26 = sphi %s5932_s26, %s25_s26   ;;  %s5840_s25 = sphi %s5930_s25, %s9487_s25   ;;  %s5836_s24 = sphi %s5928_s24, %s9486_s24   ;;  %s5832_s23 = sphi %s5926_s23, %s9490_s23   ;;  %s5828_s22 = sphi %s5924_s22, %s9489_s22   ;;  %s5824_s21 = sphi %s5922_s21, %s9488_s21  }
   0x7   : > { %s5387_s28 = sadd.s32 4294967294, %s5844_s26   ;;  %s37_s29 = sadd.s32 1, %s5840_s25 }
   0x8   : > { %s318_s30 = sadd.s32 1, %s5832_s23  ;;  %p39_p0 = scmp.ge.s32.totalorder %s37_s29, 2 }
   0x9   : > { %p328_p1 = scmp.ne.s32.totalorder %s5832_s23, %s5828_s22  ;;  %p329_p2 = scmp.eq.s32.totalorder %s5386_s27, 1 }
   0xa   : > { %p334_p3 = scmp.ne.s32.totalorder %s5828_s22, %s5824_s21  ;;  %s9492_s29 = smov (%p39_p0, %s37_s29), 0 }
   0xb   : > { %9372 = sst [smem:[#allocation6_spill]] %s9492_s29  ;;  %p5962_p4 = por %p329_p2, %p328_p1 }
   0xc   : > { %p335_p5 = scmp.eq.s32.totalorder %s5387_s28, 1  ;;  %s313_s14 = ssub.s32 %s5840_s25, %s9492_s29 }
   0xd   : > { %p5391_p6 = scmp.ge.s32.totalorder %s5844_s26, 1  ;;  %p316_p7 = scmp.eq.s32.totalorder %s313_s14, 0 }
   0xe   : > { %p5969_p8 = por %p335_p5, %p334_p3  ;;  %p410_p9 = scmp.lt.s32.totalorder %s5844_s26, 3 }
   0xf   : > { %s5975_s16 = scalar_select %p316_p7, %s5832_s23, %s318_s30  }
  0x10   : > { %p411_p10 = pnand %p5391_p6, %p410_p9 }
  0x11   : > { %9375 = sst [smem:[#allocation7_spill]] %s5975_s16 }
  0x12   : > { %414 = sbr.rel (%p411_p10) target bundleno = 1585 (0x631), region = 68 }
  0x17   : > { %v493_v0 = vld [vmem:[%s9311_s1 + $0x18] sm:$0xff]  ;;  %v492_v1 = vld [vmem:[%s9311_s1 + $0x10] sm:$0xff]  ;;  %v5846_v2 = vmov 1   ;;  %v5847_v3 = vmov 0   ;;  %v491_v4 = vld [vmem:[%s9311_s1 + $0x8] sm:$0xff]  ;;  %p473_p11 = scmp.lt.s32.totalorder %s5836_s24, 1  ;;  %v9325_v31 = vlaneseq }
  0x18   : > { %5665 = vset.pattern.permute.xlu0 %v5846_v2  ;;  %5666 = vset.pattern.permute.xlu1 %v5847_v3  ;;  %v490_v5 = vld [vmem:[%s9311_s1] sm:$0xff]  ;;  %v594_v6 = vld [vmem:[%s9312_s2 + $0x18] sm:$0xff]  ;;  %v592_v7 = vld [vmem:[%s9312_s2 + $0x8] sm:$0xff]  ;;  %s9377_s0 = sld [smem:[#allocation12_spill]]  ;;  %s5856_s27 = smov [#allocation2]  }
  0x19   : > { %554 = vperm.xlu0 %5665, %v493_v0   ;;  %506 = vperm.xlu1 %5666, %v492_v1   ;;  %s474_s30 = scalar_select %p473_p11, %s5836_s24, 1  ;;  %v593_v9 = vld [vmem:[%s9312_s2 + $0x10] sm:$0xff]  ;;  %v591_v11 = vld [vmem:[%s9312_s2] sm:$0xff]  ;;  %v1502_v12 = vld [vmem:[%s9314_s4 + $0x18] sm:$0xff]  ;;  %v6045_v32 = vshrl.u32 %v9325_v31, 7 }
  0x1a   : > { %v1500_v14 = vld [vmem:[%s9314_s4 + $0x8] sm:$0xff]  ;;  %v1501_v17 = vld [vmem:[%s9314_s4 + $0x10] sm:$0xff]  ;;  %v1499_v19 = vld [vmem:[%s9314_s4] sm:$0xff] }
  0x1b   : > { %s5994_s20 = sshll.u32 %s474_s30, 5  ;;  %v3097_v20 = vld [vmem:[%s9316_s6 + $0x18] sm:$0xff]  ;;  %v3095_v22 = vld [vmem:[%s9316_s6 + $0x8] sm:$0xff]  ;;  %v3096_v25 = vld [vmem:[%s9316_s6 + $0x10] sm:$0xff]  ;;  %9376 = vst [vmem:[#allocation8_spill] sm:$0xff] %v6045_v32  ;;  %v517_v33 = vsub.s32 0, %v6045_v32 }
  0x1c   : > { %s477_s16 = scalar_lea.vmem %s9319_s9, %s5994_s20  ;;  %s482_s30 = scalar_lea.vmem %s9320_s10, %s5994_s20  ;;  %v3094_v27 = vld [vmem:[%s9316_s6] sm:$0xff]  ;;  %v521_v34 = vsub.s32 2, %v6045_v32  ;;  %v559_v38 = vsub.s32 1, %v6045_v32  ;;  %v563_v39 = vsub.s32 3, %v6045_v32 }
  0x1d   : > { %5667 = vset.pattern.permute.xlu1 %v5846_v2  ;;  %546 = vperm.xlu0 %5665, %v491_v4   ;;  %v1466_v8 = vld [vmem:[%s477_s16 + $0x18] sm:$0xff]  ;;  %v1464_v10 = vld [vmem:[%s477_s16 + $0x8] sm:$0xff]  ;;  %v1465_v13 = vld [vmem:[%s477_s16 + $0x10] sm:$0xff]  ;;  %s487_s18 = scalar_lea.vmem %s9321_s11, %s5994_s20  ;;  %s5503_s20 = sshll.u32 %s5836_s24, 5 }
  0x1e   : > { %550 = vperm.xlu1 %5667, %v492_v1   ;;  %v1463_v15 = vld [vmem:[%s477_s16] sm:$0xff]  ;;  %v3061_v16 = vld [vmem:[%s482_s30 + $0x18] sm:$0xff]  ;;  %v3059_v18 = vld [vmem:[%s482_s30 + $0x8] sm:$0xff]  ;;  %s464_s16 = sand.u32 1, %s5828_s22   ;;  %s5275_s25 = scalar_lea.hbm %s9322_s12, %s5503_s20 }
  0x1f   : > { %v3060_v21 = vld [vmem:[%s482_s30 + $0x10] sm:$0xff]  ;;  %v3058_v23 = vld [vmem:[%s482_s30] sm:$0xff]  ;;  %v4655_v24 = vld [vmem:[%s487_s18 + $0x18] sm:$0xff]  ;;  %s5392_s28 = sshll.u32 %s464_s16, 1  ;;  %s5261_s29 = scalar_lea.sflag [#allocation3], %s464_s16 }
  0x20   : > { %v4653_v26 = vld [vmem:[%s487_s18 + $0x8] sm:$0xff]  ;;  %v4685_v28 = vld [vmem:[%s9318_s8] sm:$0xff]  ;;  %v4654_v29 = vld [vmem:[%s487_s18 + $0x10] sm:$0xff]  ;;  %s466_s30 = scalar_lea.vmem [#allocation2], %s5392_s28  ;;  %s5772_s24 = sshll.u32 %s5856_s27, 4  ;;  %s5773_s24 = int_to_ptr.vmem [resolvable:$false] %s5772_s24 }
  0x21   : > { %5669 = vset.pattern.permute.xlu0 %v5847_v3  ;;  %v4652_v30 = vld [vmem:[%s487_s18] sm:$0xff]  ;;  %s5277_s14 = sshll.u32 %s466_s30, 4  ;;  %s5774_s28 = scalar_lea.vmem %s5773_s24, 64  ;;  %s5278_s14 = int_to_ptr.vmem [resolvable:$true] %s5277_s14 }
  0x22   : > { %5668 = vset.pattern.permute.xlu1 %v5847_v3  ;;  %511 = vperm.xlu0 %5669, %v493_v0   ;;  %v489_v35 = vld [vmem:[%s9377_s0] sm:$0xf]  ;;  %s5768_s19 = scalar_lea.vmem %s5278_s14, 32  ;;  %p5775_p1 = scmp.lt.s32.totalorder %s5278_s14, %s5773_s24 }
  0x23   : > { %501 = vperm.xlu1 %5668, %v491_v4   ;;  %v518_v36 = vrot.slane %v489_v35, %v517_v33  ;;  %v522_v37 = vrot.slane %v489_v35, %v521_v34  ;;  %v560_v42 = vrot.slane %v489_v35, %v559_v38  ;;  %v564_v43 = vrot.slane %v489_v35, %v563_v39  ;;  %p5769_p12 = scmp.ne.s32.totalorder %s5278_s14, %s5768_s19  ;;  %p5776_p2 = scmp.lt.s32.totalorder %s5774_s28, %s5768_s19 }
  0x25   : > { %v6054_v40 = vrot.slane %v518_v36, %v517_v33  ;;  %v6056_v41 = vrot.slane %v522_v37, %v517_v33  ;;  %v6060_v48 = vrot.slane %v560_v42, %v559_v38  ;;  %v6062_v49 = vrot.slane %v564_v43, %v559_v38  ;;  %p5770_p13 = pnand %p5769_p12, %p5962_p4  ;;  %p5777_p3 = por %p5776_p2, %p5775_p1 }
  0x26   : > { %496 = vperm.xlu0 %5669, %v490_v5  }
  0x27   : > { %612 = vperm.xlu1 %5668, %v594_v6   ;;  %p5771_p0 = pneg %p5770_p13 }
  0x29   : > { %p5778_p5 = pnand %p5777_p3, %p5771_p0 }
  0x2a   : > { %602 = vperm.xlu0 %5669, %v592_v7  }
  0x2b   : > { %5670 = vset.pattern.permute.xlu1 %v5846_v2 }
  0x2c   : > { %542 = vperm.xlu1 %5670, %v490_v5  }
  0x2e   : > { %1484 = vperm.xlu0 %5669, %v1466_v8  }
  0x30   : > { %5671 = vset.pattern.permute.xlu1 %v5847_v3 }
  0x31   : > { %607 = vperm.xlu1 %5671, %v593_v9  }
  0x32   : > { %1474 = vperm.xlu0 %5669, %v1464_v10  }
  0x35   : > { %597 = vperm.xlu1 %5671, %v591_v11  }
  0x36   : > { %1520 = vperm.xlu0 %5669, %v1502_v12  }
  0x39   : > { %1479 = vperm.xlu1 %5671, %v1465_v13  }
  0x3a   : > { %1510 = vperm.xlu0 %5669, %v1500_v14  }
  0x3d   : > { %1469 = vperm.xlu1 %5671, %v1463_v15  }
  0x3e   : > { %3079 = vperm.xlu0 %5669, %v3061_v16  }
  0x41   : > { %1515 = vperm.xlu1 %5671, %v1501_v17  }
  0x42   : > { %3069 = vperm.xlu0 %5669, %v3059_v18  }
  0x45   : > { %1505 = vperm.xlu1 %5671, %v1499_v19  }
  0x46   : > { %3115 = vperm.xlu0 %5669, %v3097_v20  }
  0x49   : > { %3074 = vperm.xlu1 %5671, %v3060_v21  }
  0x4a   : > { %3105 = vperm.xlu0 %5669, %v3095_v22  }
  0x4d   : > { %3064 = vperm.xlu1 %5671, %v3058_v23  }
  0x4e   : > { %4673 = vperm.xlu0 %5669, %v4655_v24  }
  0x51   : > { %3110 = vperm.xlu1 %5671, %v3096_v25  }
  0x52   : > { %4663 = vperm.xlu0 %5669, %v4653_v26  }
  0x55   : > { %3100 = vperm.xlu1 %5671, %v3094_v27  }
  0x56   : > { %4688 = vperm.xlu0 %5669, %v4685_v28  }
  0x59   : > { %4668 = vperm.xlu1 %5671, %v4654_v29  }
  0x5d   : > { %4658 = vperm.xlu1 %5671, %v4652_v30  }
  0x94   : > { %v507_v44 = vpop.permute.xlu1 %506  ;;  %v555_v45 = vpop.permute.xlu0 %554 }
  0x95   : > { %v537_v46 = vmul.f32 %v6054_v40, %v507_v44  ;;  %v538_v47 = vmul.f32 %v6056_v41, %v507_v44  ;;  %v581_v56 = vmul.f32 %v6060_v48, %v555_v45  ;;  %v582_v57 = vmul.f32 %v6062_v49, %v555_v45 }
  0x98   : > { %v547_v50 = vpop.permute.xlu0 %546 }
  0x99   : > { %v551_v51 = vpop.permute.xlu1 %550  ;;  %v577_v52 = vmul.f32 %v6060_v48, %v547_v50  ;;  %v578_v53 = vmul.f32 %v6062_v49, %v547_v50 }
  0x9a   : > { %v579_v54 = vmul.f32 %v6060_v48, %v551_v51  ;;  %v580_v55 = vmul.f32 %v6062_v49, %v551_v51 }
  0x9c   : > { %v6070_v58 = vadd.f32 %v579_v54, %v537_v46  ;;  %v6072_v59 = vadd.f32 %v580_v55, %v538_v47  ;;  %v9326_v47 = vmov 1326507024  }
  0x9d   : > { %v512_v60 = vpop.permute.xlu0 %511 }
  0x9e   : > { %v539_v61 = vmul.f32 %v6054_v40, %v512_v60  ;;  %v540_v62 = vmul.f32 %v6056_v41, %v512_v60  ;;  %v502_v63 = vpop.permute.xlu1 %501  ;;  %v9340_v60 = vmov 2102212464  }
  0x9f   : > { %v535_v0 = vmul.f32 %v6054_v40, %v502_v63  ;;  %v536_v1 = vmul.f32 %v6056_v41, %v502_v63 }
  0xa0   : > { %v589_v2 = vadd.f32 %v581_v56, %v539_v61  ;;  %v590_v3 = vadd.f32 %v582_v57, %v540_v62 }
  0xa1   : > { %v6078_v4 = vpop.permute.xlu0 %496  ;;  %v585_v5 = vadd.f32 %v577_v52, %v535_v0  ;;  %v586_v6 = vadd.f32 %v578_v53, %v536_v1  ;;  %v9342_v53 = vmov 920167782  }
  0xa2   : > { %v613_v7 = vpop.permute.xlu1 %612 }
  0xa3   : > { %v621_v8 = vadd.f32 %v613_v7, %v589_v2  ;;  %v622_v9 = vadd.f32 %v613_v7, %v590_v3  ;;  %v9333_v7 = vmov 683565275  }
  0xa5   : > { %v6080_v10 = vmul.f32 30.0, %v621_v8  ;;  %v6082_v11 = vmul.f32 30.0, %v622_v9  ;;  %v603_v12 = vpop.permute.xlu0 %602  ;;  %v9352_v9 = vmov 2475754826  }
  0xa6   : > { %v617_v13 = vadd.f32 %v603_v12, %v585_v5  ;;  %v618_v14 = vadd.f32 %v603_v12, %v586_v6 }
  0xa7   : > { %v1258_v15 = vand.u32 2139095040, %v6080_v10  ;;  %v1362_v16 = vand.u32 2139095040, %v6082_v11  ;;  %v1255_v28 = vand.u32 2147483647, %v6080_v10  ;;  %v1359_v30 = vand.u32 2147483647, %v6082_v11 }
  0xa8   : > { %v6086_v17 = vmul.f32 30.0, %v617_v13  ;;  %v6088_v18 = vmul.f32 30.0, %v618_v14  ;;  %vm1257_vm14 = vcmp.lt.s32.totalorder %v6080_v10, 0 }
  0xa9   : > { %v1259_v19 = vshrl.u32 %v1258_v15, 23  ;;  %v1363_v20 = vshrl.u32 %v1362_v16, 23  ;;  %v1262_v37 = vand.u32 8388607, %v1255_v28  ;;  %v1366_v42 = vand.u32 8388607, %v1359_v30 }
  0xaa   : > { %v842_v21 = vand.u32 2139095040, %v6086_v17  ;;  %v946_v24 = vand.u32 2139095040, %v6088_v18  ;;  %v9350_v16 = vmov 2131351028  }
  0xab   : > { %v5423_v22 = vadd.s32 4294967169, %v1259_v19  ;;  %v5427_v23 = vadd.s32 4294967169, %v1363_v20  ;;  %v1263_v45 = vor.u32 8388608, %v1262_v37  ;;  %v1367_v52 = vor.u32 8388608, %v1366_v42 }
  0xac   : > { %v843_v27 = vshrl.u32 %v842_v21, 23  ;;  %v947_v29 = vshrl.u32 %v946_v24, 23 }
  0xad   : > { %v1265_v25 = vadd.s32 1, %v5423_v22  ;;  %v1369_v26 = vadd.s32 1, %v5427_v23  ;;  %v6111_v62 = vshll.u32 %v1263_v45, 8  ;;  %v6114_v0 = vshll.u32 %v1367_v52, 8 }
  0xae   : > { %v5407_v36 = vadd.s32 4294967169, %v843_v27  ;;  %v5411_v39 = vadd.s32 4294967169, %v947_v29 }
  0xaf   : > { %vm1266_vm0 = vcmp.gt.s32.totalorder %v1265_v25, 0  ;;  %vm1370_vm1 = vcmp.gt.s32.totalorder %v1369_v26, 0 }
  0xb0   : > { %v1267_v33 = vsel %vm1266_vm0, %v1265_v25, 0  ;;  %v1371_v35 = vsel %vm1370_vm1, %v1369_v26, 0  ;;  %v849_v44 = vadd.s32 1, %v5407_v36  ;;  %v953_v51 = vadd.s32 1, %v5411_v39 }
  0xb1   : > { %v1269_v34 = vand.u32 31, %v1267_v33  ;;  %v6098_v43 = vand.u32 31, %v1371_v35  ;;  %v6100_v46 = vshrl.u32 %v1267_v33, 5  ;;  %v6108_v57 = vshrl.u32 %v1371_v35, 5 }
  0xb2   : > { %vm850_vm2 = vcmp.gt.s32.totalorder %v849_v44, 0  ;;  %vm954_vm4 = vcmp.gt.s32.totalorder %v953_v51, 0  ;;  %vm6309_vm1 = vcmp.le.f32.partialorder %v1255_v28, 0.7853982 }
  0xb3   : > { %v1270_v38 = vsub.s32 32, %v1269_v34  ;;  %v6105_v55 = vsub.s32 32, %v6098_v43  ;;  %v1284_v56 = vshll.u32 %v9342_v53, %v1269_v34  ;;  %v1281_v61 = vshll.u32 %v9340_v60, %v1269_v34 }
  0xb4   : > { %vm1290_vm3 = vcmp.lt.s32.totalorder %v6100_v46, 4  ;;  %v1385_v2 = vshll.u32 %v9340_v60, %v6098_v43  ;;  %v1388_v5 = vshll.u32 %v9342_v53, %v6098_v43  ;;  %vm1394_vm5 = vcmp.lt.s32.totalorder %v6108_v57, 4 }
  0xb5   : > { %v1285_v50 = vshrl.u32 %v9326_v47, %v1270_v38  ;;  %v1282_v54 = vshrl.u32 %v9342_v53, %v1270_v38  ;;  %v1386_v3 = vshrl.u32 %v9342_v53, %v6105_v55  ;;  %v1389_v6 = vshrl.u32 %v9326_v47, %v6105_v55 }
  0xb6   : > { %v1272_v8 = vshll.u32 %v9333_v7, %v1269_v34  ;;  %v1273_v12 = vshrl.u32 %v9352_v9, %v1270_v38  ;;  %v6128_v13 = vsel %vm850_vm2, %v849_v44, 0  ;;  %v6130_v14 = vsel %vm954_vm4, %v953_v51, 0 }
  0xb7   : > { %v1286_v63 = vor.u32 %v1285_v50, %v1284_v56  ;;  %v1283_v1 = vor.u32 %v1282_v54, %v1281_v61  ;;  %v1275_v15 = vshll.u32 %v9352_v9, %v1269_v34  ;;  %v1276_v19 = vshrl.u32 %v9350_v16, %v1270_v38 }
  0xb8   : > { %v1274_v21 = vor.u32 %v1273_v12, %v1272_v8  ;;  %v1278_v22 = vshll.u32 %v9350_v16, %v1269_v34  ;;  %v1279_v23 = vshrl.u32 %v9340_v60, %v1270_v38  ;;  %v1387_v25 = vor.u32 %v1386_v3, %v1385_v2 }
  0xb9   : > { %v1300_v20 = vsel %vm1290_vm3, %v1286_v63, 1326507024  ;;  %v1296_v24 = vsel %vm1290_vm3, %v1283_v1, 920167782  ;;  %v1271_v26 = vshrl.u32 %v9333_v7, %v1270_v38  ;;  %v1277_v27 = vor.u32 %v1276_v19, %v1275_v15  ;;  %v6162_v63 = vpop.permute.xlu1 %542 }
  0xba   : > { %v1390_v29 = vor.u32 %v1389_v6, %v1388_v5  ;;  %v1280_v33 = vor.u32 %v1279_v23, %v1278_v22  ;;  %vm1287_vm6 = vcmp.lt.s32.totalorder %v6100_v46, 1  ;;  %vm1289_vm7 = vcmp.lt.s32.totalorder %v6100_v46, 3 }
  0xbb   : > { %vm1288_vm8 = vcmp.lt.s32.totalorder %v6100_v46, 2  ;;  %v1291_v35 = vsel %vm1287_vm6, %v1271_v26, %v1274_v21  ;;  %v1295_v36 = vsel %vm1287_vm6, %v1274_v21, %v1277_v27  ;;  %v1301_v34 = vsel %vm1289_vm7, %v1283_v1, %v1300_v20 }
  0xbc   : > { %v1292_v37 = vsel %vm1290_vm3, %v1280_v33, 2102212464  ;;  %v1297_v39 = vsel %vm1289_vm7, %v1280_v33, %v1296_v24  ;;  %v1299_v42 = vsel %vm1287_vm6, %v1277_v27, %v1280_v33  ;;  %v1377_v38 = vshrl.u32 %v9352_v9, %v6105_v55 }
  0xbd   : > { %v1293_v44 = vsel %vm1289_vm7, %v1277_v27, %v1292_v37  ;;  %v1298_v45 = vsel %vm1288_vm8, %v1295_v36, %v1297_v39  ;;  %v1302_v50 = vsel %vm1288_vm8, %v1299_v42, %v1301_v34  ;;  %v1376_v51 = vshll.u32 %v9333_v7, %v6098_v43 }
  0xbe   : > { %v1404_v52 = vsel %vm1394_vm5, %v1390_v29, 1326507024  ;;  %v6157_v54 = vmul.u32.u64.low %v6111_v62, %v1302_v50  ;;  %v6158_v56 = vmul.u32.u64.high %v6111_v62, %v1302_v50, %v6157_v54  ;;  %v1379_v61 = vshll.u32 %v9352_v9, %v6098_v43 }
  0xbf   : > { %v6165_v1 = vmul.u32.u64.low %v6111_v62, %v1298_v45  ;;  %v6166_v2 = vmul.u32.u64.high %v6111_v62, %v1298_v45, %v6165_v1  ;;  %v1378_v3 = vor.u32 %v1377_v38, %v1376_v51  ;;  %v1380_v5 = vshrl.u32 %v9350_v16, %v6105_v55 }
  0xc0   : > { %v6172_v6 = vand.u32 31, %v6128_v13  ;;  %v1294_v8 = vsel %vm1288_vm8, %v1291_v35, %v1293_v44  ;;  %v1382_v12 = vshll.u32 %v9350_v16, %v6098_v43  ;;  %v1383_v15 = vshrl.u32 %v9340_v60, %v6105_v55 }
  0xc1   : > { %v1400_v19 = vsel %vm1394_vm5, %v1387_v25, 920167782  ;;  %v6183_v20 = vand.u32 31, %v6130_v14  ;;  %v1381_v21 = vor.u32 %v1380_v5, %v1379_v61  ;;  %vm1393_vm9 = vcmp.lt.s32.totalorder %v6108_v57, 3 }
  0xc2   : > { %vm1312_vm10 = vc.u32 %v6158_v56, %v6165_v1  ;;  %v1384_v46 = vor.u32 %v1383_v15, %v1382_v12  ;;  %vm1391_vm11 = vcmp.lt.s32.totalorder %v6108_v57, 1  ;;  %v1405_v43 = vsel %vm1393_vm9, %v1387_v25, %v1404_v52 }
  0xc3   : > { %v1310_v22 = vmul.u32 %v6111_v62, %v1294_v8  ;;  %v1313_v23 = vadd.s32 1, %v6166_v2  ;;  %v1375_v24 = vshrl.u32 %v9333_v7, %v6105_v55  ;;  %v1399_v26 = vsel %vm1391_vm11, %v1378_v3, %v1381_v21  ;;  %v608_v55 = vpop.permute.xlu1 %607 }
  0xc4   : > { %vm1392_vm12 = vcmp.lt.s32.totalorder %v6108_v57, 2  ;;  %v1396_v27 = vsel %vm1394_vm5, %v1384_v46, 2102212464  ;;  %v1401_v29 = vsel %vm1393_vm9, %v1384_v46, %v1400_v19  ;;  %v1403_v33 = vsel %vm1391_vm11, %v1381_v21, %v1384_v46 }
  0xc5   : > { %v1314_v35 = vsel %vm1312_vm10, %v1313_v23, %v6166_v2  ;;  %v1395_v25 = vsel %vm1391_vm11, %v1375_v24, %v1378_v3  ;;  %v1402_v62 = vsel %vm1392_vm12, %v1399_v26, %v1401_v29  ;;  %v1406_v36 = vsel %vm1392_vm12, %v1403_v33, %v1405_v43 }
  0xc6   : > { %v1315_v34 = vadd.s32 %v1314_v35, %v1310_v22  ;;  %v1397_v37 = vsel %vm1393_vm9, %v1381_v21, %v1396_v27  ;;  %v6208_v39 = vmul.u32.u64.low %v6114_v0, %v1406_v36  ;;  %v6209_v42 = vmul.u32.u64.high %v6114_v0, %v1406_v36, %v6208_v39 }
  0xc7   : > { %v6212_v38 = vmul.u32.u64.low %v6114_v0, %v1402_v62  ;;  %v6213_v44 = vmul.u32.u64.high %v6114_v0, %v1402_v62, %v6212_v38  ;;  %v619_v50 = vadd.f32 %v608_v55, %v6070_v58  ;;  %v6218_v51 = vsub.s32 32, %v6172_v6 }
  0xc8   : > { %v1316_v45 = vadd.s32 536870912, %v1315_v34  ;;  %v1398_v52 = vsel %vm1392_vm12, %v1395_v25, %v1397_v37  ;;  %v6223_v54 = vsub.s32 32, %v6183_v20  ;;  %v620_v3 = vadd.f32 %v608_v55, %v6072_v59 }
  0xc9   : > { %vm1416_vm13 = vc.u32 %v6209_v42, %v6212_v38  ;;  %v1417_v2 = vadd.s32 1, %v6213_v44  ;;  %v6233_v58 = vmul.f32 %v6054_v40, %v6078_v4  ;;  %v1414_v57 = vmul.u32 %v6114_v0, %v1398_v52 }
  0xca   : > { %v6225_v61 = vshrl.u32 %v1316_v45, 30  ;;  %v6237_v8 = vmul.f32 30.0, %v619_v50  ;;  %v6240_v12 = vshrl.u32 %v6128_v13, 5  ;;  %v866_v15 = vshrl.u32 %v9342_v53, %v6218_v51 }
  0xcb   : > { %v869_v19 = vshrl.u32 %v9326_v47, %v6218_v51  ;;  %v1418_v59 = vsel %vm1416_vm13, %v1417_v2, %v6213_v44  ;;  %v970_v40 = vshrl.u32 %v9342_v53, %v6223_v54  ;;  %v973_v21 = vshrl.u32 %v9326_v47, %v6223_v54 }
  0xcc   : > { %v1318_v5 = vshll.u32 %v6225_v61, 30  ;;  %v1419_v46 = vadd.s32 %v1418_v59, %v1414_v57  ;;  %v865_v13 = vshll.u32 %v9340_v60, %v6172_v6  ;;  %v868_v43 = vshll.u32 %v9342_v53, %v6172_v6 }
  0xcd   : > { %v6258_v22 = vshrl.u32 %v6130_v14, 5  ;;  %v6260_v23 = vmul.f32 30.0, %v620_v3  ;;  %v969_v24 = vshll.u32 %v9340_v60, %v6183_v20  ;;  %v972_v26 = vshll.u32 %v9342_v53, %v6183_v20 }
  0xce   : > { %v6251_v0 = vsub.s32 %v1315_v34, %v1318_v5  ;;  %v1420_v29 = vadd.s32 536870912, %v1419_v46  ;;  %v6269_v33 = vmul.f32 %v6056_v41, %v6078_v4  ;;  %v6271_v35 = vor.u32 %v866_v15, %v865_v13 }
  0xcf   : > { %v870_v25 = vor.u32 %v869_v19, %v868_v43  ;;  %v1050_v14 = vand.u32 2139095040, %v6237_v8  ;;  %v6274_v62 = vor.u32 %v970_v40, %v969_v24  ;;  %v974_v36 = vor.u32 %v973_v21, %v972_v26 }
  0xd0   : > { %v1321_v27 = vsub.s32 0, %v6251_v0  ;;  %v6277_v34 = vshrl.u32 %v1420_v29, 30  ;;  %v6281_v37 = vmul.f32 %v6060_v48, %v6162_v63  ;;  %v6285_v41 = vmul.f32 %v6062_v49, %v6162_v63 }
  0xd1   : > { %v1154_v4 = vand.u32 2139095040, %v6260_v23  ;;  %vm874_vm15 = vcmp.lt.s32.totalorder %v6240_v12, 4  ;;  %vm978_vm0 = vcmp.lt.s32.totalorder %v6258_v22, 4  ;;  %v839_v44 = vand.u32 2147483647, %v6086_v17 }
  0xd2   : > { %v5424_v55 = vmin.u32 %v1321_v27, %v6251_v0  ;;  %v880_v48 = vsel %vm874_vm15, %v6271_v35, 920167782  ;;  %v884_v45 = vsel %vm874_vm15, %v870_v25, 1326507024  ;;  %v1422_v49 = vshll.u32 %v6277_v34, 30 }
  0xd3   : > { %v1051_v63 = vshrl.u32 %v1050_v14, 23  ;;  %v6301_v50 = vsel %vm978_vm0, %v6274_v62, 920167782  ;;  %v6305_v52 = vsel %vm978_vm0, %v974_v36, 1326507024  ;;  %v857_v5 = vshrl.u32 %v9352_v9, %v6218_v51 }
  0xd4   : > { %v1323_v39 = vclz %v5424_v55  ;;  %v1311_v57 = vadd.s32 %v6165_v1, %v6158_v56  ;;  %v1341_v15 = vsub.s32 4, %v6225_v61  ;;  %v1423_v19 = vsub.s32 %v1419_v46, %v1422_v49 }
  0xd5   : > { %v1155_v59 = vshrl.u32 %v1154_v4, 23  ;;  %v846_v40 = vand.u32 8388607, %v839_v44  ;;  %v856_v28 = vshll.u32 %v9333_v7, %v6172_v6  ;;  %v860_v21 = vshrl.u32 %v9350_v16, %v6218_v51 }
  0xd6   : > { %v5425_v3 = vadd.s32 4294967294, %v1323_v39  ;;  %v1425_v43 = vsub.s32 0, %v1423_v19  ;;  %v5415_v24 = vadd.s32 4294967169, %v1051_v63  ;;  %v855_v56 = vshrl.u32 %v9333_v7, %v6218_v51 }
  0xd7   : > { %v858_v46 = vor.u32 %v857_v5, %v856_v28  ;;  %v859_v27 = vshll.u32 %v9352_v9, %v6172_v6  ;;  %v1342_v29 = vsel %vm1257_vm14, %v1341_v15, %v6225_v61  ;;  %v862_v14 = vshll.u32 %v9350_v16, %v6172_v6 }
  0xd8   : > { %vm5426_vm2 = vcmp.lt.s32.totalorder %v5425_v3, 0  ;;  %v5428_v25 = vmin.u32 %v1425_v43, %v1423_v19  ;;  %v863_v36 = vshrl.u32 %v9340_v60, %v6218_v51  ;;  %v1415_v63 = vadd.s32 %v6212_v38, %v6209_v42 }
  0xd9   : > { %v1326_v13 = vsel %vm5426_vm2, 0, %v5425_v3  ;;  %v861_v49 = vor.u32 %v860_v21, %v859_v27  ;;  %v6338_v5 = vadd.s32 1, %v5415_v24  ;;  %v5419_v28 = vadd.s32 4294967169, %v1155_v59 }
  0xda   : > { %v1327_v1 = vsub.s32 32, %v1326_v13  ;;  %v1331_v26 = vsub.s32 4294967266, %v1326_v13  ;;  %v1328_v55 = vshll.u32 %v6251_v0, %v1326_v13  ;;  %v1427_v3 = vclz %v5428_v25 }
  0xdb   : > { %v847_v43 = vor.u32 8388608, %v846_v40  ;;  %v864_v31 = vor.u32 %v863_v36, %v862_v14  ;;  %v1344_v6 = vsel %vm6309_vm1, 0, %v1342_v29  ;;  %vm871_vm3 = vcmp.lt.s32.totalorder %v6240_v12, 1 }
  0xdc   : > { %v1329_v4 = vshrl.u32 %v1311_v57, %v1327_v1  ;;  %v1332_v39 = vadd.s32 127, %v1331_v26  ;;  %v5429_v51 = vadd.s32 4294967294, %v1427_v3  ;;  %vm873_vm4 = vcmp.lt.s32.totalorder %v6240_v12, 3 }
  0xdd   : > { %v875_v57 = vsel %vm871_vm3, %v855_v56, %v858_v46  ;;  %v876_v42 = vsel %vm874_vm15, %v864_v31, 2102212464  ;;  %v879_v38 = vsel %vm871_vm3, %v858_v46, %v861_v49  ;;  %v881_v40 = vsel %vm873_vm4, %v864_v31, %v880_v48 }
  0xde   : > { %v1330_v61 = vor.u32 %v1329_v4, %v1328_v55  ;;  %v1333_v15 = vshll.u32 %v1332_v39, 23  ;;  %vm5430_vm5 = vcmp.lt.s32.totalorder %v5429_v51, 0  ;;  %v877_v59 = vsel %vm873_vm4, %v861_v49, %v876_v42 }
  0xdf   : > { %v883_v21 = vsel %vm871_vm3, %v861_v49, %v864_v31  ;;  %v1430_v1 = vsel %vm5430_vm5, 0, %v5429_v51  ;;  %vm872_vm6 = vcmp.lt.s32.totalorder %v6240_v12, 2  ;;  %v885_v46 = vsel %vm873_vm4, %v6271_v35, %v884_v45 }
  0xe0   : > { %v1334_v0 = vor.u32 4788187, %v1333_v15  ;;  %v1337_v24 = vcvt.s32.f32 %v1330_v61  ;;  %v1431_v26 = vsub.s32 32, %v1430_v1  ;;  %v1435_v27 = vsub.s32 4294967266, %v1430_v1 }
  0xe1   : > { %v878_v56 = vsel %vm872_vm6, %v875_v57, %v877_v59  ;;  %v882_v25 = vsel %vm872_vm6, %v879_v38, %v881_v40  ;;  %v886_v14 = vsel %vm872_vm6, %v883_v21, %v885_v46  ;;  %v887_v36 = vshll.u32 %v847_v43, 8 }
  0xe2   : > { %v1335_v13 = vand.u32 2147483647, %v1334_v0  ;;  %v1432_v55 = vshll.u32 %v1423_v19, %v1430_v1  ;;  %v1433_v4 = vshrl.u32 %v1415_v63, %v1431_v26  ;;  %v1436_v48 = vadd.s32 127, %v1435_v27 }
  0xe3   : > { %v943_v31 = vand.u32 2147483647, %v6088_v18  ;;  %v6355_v49 = vadd.s32 1, %v5419_v28  ;;  %v6357_v3 = vmul.u32.u64.low %v887_v36, %v886_v14  ;;  %v6358_v61 = vmul.u32.u64.high %v887_v36, %v886_v14, %v6357_v3 }
  0xe4   : > { %v1338_v29 = vmul.f32 %v1337_v24, %v1335_v13  ;;  %v1434_v15 = vor.u32 %v1433_v4, %v1432_v55  ;;  %v1437_v51 = vshll.u32 %v1436_v48, 23  ;;  %v1348_v45 = vadd.s32 3, %v1344_v6 }
  0xe5   : > { %v6360_v0 = vmul.u32.u64.low %v887_v36, %v882_v25  ;;  %v6361_v12 = vmul.u32.u64.high %v887_v36, %v882_v25, %v6360_v0  ;;  %vm1361_vm7 = vcmp.lt.s32.totalorder %v6082_v11, 0  ;;  %v1445_v19 = vsub.s32 4, %v6277_v34 }
  0xe6   : > { %v1339_v39 = vxor.u32 2147483648, %v1338_v29  ;;  %v894_v63 = vmul.u32 %v887_v36, %v878_v56  ;;  %vm6373_vm8 = vcmp.le.f32.partialorder %v1359_v30, 0.7853982  ;;  %v1438_v57 = vor.u32 4788187, %v1437_v51 }
  0xe7   : > { %vm1058_vm9 = vcmp.gt.s32.totalorder %v6338_v5, 0  ;;  %v950_v6 = vand.u32 8388607, %v943_v31  ;;  %v959_v42 = vshrl.u32 %v9333_v7, %v6223_v54  ;;  %v1441_v38 = vcvt.s32.f32 %v1434_v15 }
  0xe8   : > { %v1340_v35 = vsel %vm1257_vm14, %v1339_v39, %v1338_v29  ;;  %vm896_vm10 = vc.u32 %v6358_v61, %v6360_v0  ;;  %v960_v30 = vshll.u32 %v9333_v7, %v6183_v20  ;;  %v1439_v2 = vand.u32 2147483647, %v1438_v57 }
  0xe9   : > { %v1343_v28 = vsel %vm6309_vm1, %v6080_v10, %v1340_v35  ;;  %v897_v59 = vadd.s32 1, %v6361_v12  ;;  %v961_v40 = vshrl.u32 %v9352_v9, %v6223_v54  ;;  %v963_v21 = vshll.u32 %v9352_v9, %v6183_v20 }
  0xea   : > { %5672 = vcosq.f32 %v1343_v28  ;;  %v964_v13 = vshrl.u32 %v9350_v16, %v6223_v54  ;;  %v966_v24 = vshll.u32 %v9350_v16, %v6183_v20  ;;  %v967_v1 = vshrl.u32 %v9340_v60, %v6223_v54 }
  0xeb   : > { %5674 = vsinq.f32 %v1343_v28  ;;  %v1442_v26 = vmul.f32 %v1441_v38, %v1439_v2  ;;  %v898_v27 = vsel %vm896_vm10, %v897_v59, %v6361_v12  ;;  %v951_v56 = vor.u32 8388608, %v950_v6  ;;  %v598_v59 = vpop.permute.xlu1 %597 }
  0xec   : > { %v962_v46 = vor.u32 %v961_v40, %v960_v30  ;;  %v899_v29 = vadd.s32 %v898_v27, %v894_v63  ;;  %v965_v25 = vor.u32 %v964_v13, %v963_v21  ;;  %v968_v14 = vor.u32 %v967_v1, %v966_v24 }
  0xed   : > { %vm975_vm11 = vcmp.lt.s32.totalorder %v6258_v22, 1  ;;  %v1443_v36 = vxor.u32 2147483648, %v1442_v26  ;;  %vm976_vm12 = vcmp.lt.s32.totalorder %v6258_v22, 2  ;;  %vm977_vm13 = vcmp.lt.s32.totalorder %v6258_v22, 3 }
  0xee   : > { %v979_v55 = vsel %vm975_vm11, %v959_v42, %v962_v46  ;;  %v900_v20 = vadd.s32 536870912, %v899_v29  ;;  %v980_v54 = vsel %vm978_vm0, %v968_v14, 2102212464  ;;  %v983_v4 = vsel %vm975_vm11, %v962_v46, %v965_v25 }
  0xef   : > { %v985_v48 = vsel %vm977_vm13, %v968_v14, %v6301_v50  ;;  %v1444_v39 = vsel %vm1361_vm7, %v1443_v36, %v1442_v26  ;;  %v987_v15 = vsel %vm975_vm11, %v965_v25, %v968_v14  ;;  %v991_v51 = vshll.u32 %v951_v56, 8 }
  0xf0   : > { %v986_v3 = vsel %vm976_vm12, %v983_v4, %v985_v48  ;;  %v1447_v12 = vsel %vm6373_vm8, %v6082_v11, %v1444_v39  ;;  %v6411_v35 = vshrl.u32 %v900_v20, 30  ;;  %v981_v63 = vsel %vm977_vm13, %v965_v25, %v980_v54 }
  0xf1   : > { %v989_v28 = vsel %vm977_vm13, %v6274_v62, %v6305_v52  ;;  %5676 = vcosq.f32 %v1447_v12  ;;  %v6417_v57 = vmul.u32.u64.low %v991_v51, %v986_v3  ;;  %v6418_v6 = vmul.u32.u64.high %v991_v51, %v986_v3, %v6417_v57 }
  0xf2   : > { %v990_v50 = vsel %vm976_vm12, %v987_v15, %v989_v28  ;;  %v1446_v42 = vsel %vm1361_vm7, %v1445_v19, %v6277_v34  ;;  %5678 = vsinq.f32 %v1447_v12  ;;  %v1059_v38 = vsel %vm1058_vm9, %v6338_v5, 0 }
  0xf3   : > { %v902_v30 = vshll.u32 %v6411_v35, 30  ;;  %v1349_v62 = vand.u32 3, %v1348_v45  ;;  %v6428_v52 = vmul.u32.u64.low %v991_v51, %v990_v50  ;;  %v6429_v2 = vmul.u32.u64.high %v991_v51, %v990_v50, %v6428_v52 }
  0xf4   : > { %v583_v40 = vadd.f32 %v6281_v37, %v6233_v58  ;;  %v982_v34 = vsel %vm976_vm12, %v979_v55, %v981_v63  ;;  %v584_v19 = vadd.f32 %v6285_v41, %v6269_v33  ;;  %v1448_v5 = vsel %vm6373_vm8, 0, %v1446_v42 }
  0xf5   : > { %v6433_v21 = vsub.s32 %v899_v29, %v902_v30  ;;  %v6441_v45 = vand.u32 31, %v1059_v38  ;;  %v1001_v24 = vadd.s32 1, %v6418_v6  ;;  %vm1162_vm14 = vcmp.gt.s32.totalorder %v6355_v49, 0 }
  0xf6   : > { %v615_v37 = vadd.f32 %v598_v59, %v583_v40  ;;  %vm1351_vm15 = vcmp.eq.s32.totalorder %v1349_v62, 0  ;;  %v998_v27 = vmul.u32 %v991_v51, %v982_v34  ;;  %vm1000_vm0 = vc.u32 %v6429_v2, %v6417_v57 }
  0xf7   : > { %v5673_v13 = vpop.eup %5672  ;;  %v905_v58 = vsub.s32 0, %v6433_v21  ;;  %vm1354_vm1 = vcmp.eq.s32.totalorder %v1349_v62, 2  ;;  %v1452_v33 = vadd.s32 3, %v1448_v5  ;;  %v1002_v43 = vsel %vm1000_vm0, %v1001_v24, %v6418_v6 }
  0xf8   : > { %v5675_v1 = vpop.eup %5674  ;;  %v1355_v26 = vxor.u32 2147483648, %v5673_v13  ;;  %v6451_v29 = vsub.s32 32, %v6441_v45  ;;  %v1003_v25 = vadd.s32 %v1002_v43, %v998_v27  ;;  %vm1347_vm2 = vweird.f32 %v6080_v10 }
  0xf9   : > { %v1352_v22 = vxor.u32 2147483648, %v5675_v1  ;;  %v5408_v41 = vmin.u32 %v905_v58, %v6433_v21  ;;  %v616_v36 = vadd.f32 %v598_v59, %v584_v19  ;;  %v6454_v55 = vmul.f32 30.0, %v615_v37  ;;  %v1485_v19 = vpop.permute.xlu0 %1484 }
  0xfa   : > { %v1356_v46 = vsel %vm1354_vm1, %v1355_v26, %v5675_v1  ;;  %vm1350_vm3 = vcmp.lt.s32.totalorder %v1349_v62, 2  ;;  %vm1451_vm4 = vweird.f32 %v6082_v11  ;;  %v1163_v20 = vsel %vm1162_vm14, %v6355_v49, 0 }
  0xfb   : > { %v1353_v56 = vsel %vm1351_vm15, %v5673_v13, %v1352_v22  ;;  %v907_v14 = vclz %v5408_v41  ;;  %v1004_v54 = vadd.s32 536870912, %v1003_v25  ;;  %v1453_v48 = vand.u32 3, %v1452_v33 }
  0xfc   : > { %v1357_v4 = vsel %vm1350_vm3, %v1353_v56, %v1356_v46  ;;  %v6460_v39 = vshrl.u32 %v1059_v38, 5  ;;  %v1073_v15 = vshll.u32 %v9340_v60, %v6441_v45  ;;  %v1074_v51 = vshrl.u32 %v9342_v53, %v6451_v29 }
  0xfd   : > { %v5409_v3 = vadd.s32 4294967294, %v907_v14  ;;  %v1076_v12 = vshll.u32 %v9342_v53, %v6441_v45  ;;  %v6468_v63 = vshrl.u32 %v1004_v54, 30  ;;  %v6470_v50 = vand.u32 31, %v1163_v20 }
  0xfe   : > { %v5677_v28 = vpop.eup %5676  ;;  %v6472_v49 = vmul.f32 30.0, %v616_v36  ;;  %v634_v6 = vand.u32 2139095040, %v6454_v55  ;;  %v1358_v38 = vsel %vm1347_vm2, nan, %v1357_v4  ;;  %vm1454_vm6 = vcmp.lt.s32.totalorder %v1453_v48, 2 }
  0xff   : > { %vm5410_vm5 = vcmp.lt.s32.totalorder %v5409_v3, 0  ;;  %v5679_v42 = vpop.eup %5678  ;;  %v1459_v30 = vxor.u32 2147483648, %v5677_v28  ;;  %v1006_v52 = vshll.u32 %v6468_v63, 30  ;;  %vm1458_vm7 = vcmp.eq.s32.totalorder %v1453_v48, 2 }
 0x100   : > { %v6477_v62 = vsel %vm5410_vm5, 0, %v5409_v3  ;;  %v1456_v59 = vxor.u32 2147483648, %v5679_v42  ;;  %v1077_v40 = vshrl.u32 %v9326_v47, %v6451_v29  ;;  %vm1455_vm8 = vcmp.eq.s32.totalorder %v1453_v48, 0 }
 0x101   : > { %v1460_v34 = vsel %vm1458_vm7, %v1459_v30, %v5679_v42  ;;  %vm841_vm9 = vcmp.lt.s32.totalorder %v6086_v17, 0  ;;  %v915_v13 = vsub.s32 4294967266, %v6477_v62  ;;  %v6484_v10 = vsub.s32 %v1003_v25, %v1006_v52 }
 0x102   : > { %v1457_v5 = vsel %vm1455_vm8, %v5677_v28, %v1456_v59  ;;  %v6486_v24 = vmul.f32 %v1485_v19, %v1358_v38  ;;  %v635_v1 = vshrl.u32 %v634_v6, 23  ;;  %v738_v26 = vand.u32 2139095040, %v6472_v49 }
 0x103   : > { %v1461_v58 = vsel %vm1454_vm6, %v1457_v5, %v1460_v34  ;;  %vm1082_vm10 = vcmp.lt.s32.totalorder %v6460_v39, 4  ;;  %v6491_v37 = vsub.s32 32, %v6470_v50  ;;  %v1009_v22 = vsub.s32 0, %v6484_v10 }
 0x104   : > { %v1462_v27 = vsel %vm1451_vm4, nan, %v1461_v58  ;;  %v6496_v33 = vor.u32 %v1074_v51, %v1073_v15  ;;  %v1078_v41 = vor.u32 %v1077_v40, %v1076_v12  ;;  %v6498_v43 = vshrl.u32 %v1163_v20, 5 }
 0x105   : > { %vm6502_vm11 = vcmp.le.f32.partialorder %v839_v44, 0.7853982  ;;  %v6506_v46 = vmul.f32 %v1485_v19, %v1462_v27  ;;  %v916_v25 = vadd.s32 127, %v915_v13  ;;  %v925_v14 = vsub.s32 4, %v6411_v35 }
 0x106   : > { %v5412_v36 = vmin.u32 %v1009_v22, %v6484_v10  ;;  %v6511_v11 = vand.u32 4294901760, %v6486_v24  ;;  %v911_v54 = vsub.s32 32, %v6477_v62  ;;  %v5399_v20 = vadd.s32 4294967169, %v635_v1 }
 0x107   : > { %v739_v4 = vshrl.u32 %v738_v26, 23  ;;  %v6515_v48 = vand.u32 4294901760, %v6506_v46  ;;  %v1178_v44 = vshrl.u32 %v9342_v53, %v6491_v37  ;;  %v1181_v3 = vshrl.u32 %v9326_v47, %v6491_v37 }
 0x108   : > { %v1011_v15 = vclz %v5412_v36  ;;  %v1177_v51 = vshll.u32 %v9340_v60, %v6470_v50  ;;  %v1180_v12 = vshll.u32 %v9342_v53, %v6470_v50  ;;  %v895_v28 = vadd.s32 %v6360_v0, %v6358_v61 }
 0x109   : > { %v1029_v6 = vsub.s32 4, %v6468_v63  ;;  %v6531_v42 = vsel %vm1082_vm10, %v6496_v33, 920167782  ;;  %v1092_v38 = vsel %vm1082_vm10, %v1078_v41, 1326507024  ;;  %v917_v30 = vshll.u32 %v916_v25, 23  ;;  %1561 = vmatprep.subr.mxu0 %v6515_v48 }
 0x10a   : > { %v5413_v52 = vadd.s32 4294967294, %v1011_v15  ;;  %v913_v59 = vshrl.u32 %v895_v28, %v911_v54  ;;  %v926_v40 = vsel %vm841_vm9, %v925_v14, %v6411_v35  ;;  %v641_v61 = vadd.s32 1, %v5399_v20  ;;  %1563 = vmatpush1.msra.mxu0 %v6511_v11 }
 0x10b   : > { %v5403_v0 = vadd.s32 4294967169, %v739_v4  ;;  %v6540_v34 = vor.u32 %v1178_v44, %v1177_v51  ;;  %v1182_v19 = vor.u32 %v1181_v3, %v1180_v12  ;;  %vm945_vm12 = vcmp.lt.s32.totalorder %v6088_v18, 0 }
 0x10c   : > { %vm5414_vm13 = vcmp.lt.s32.totalorder %v5413_v52, 0  ;;  %v912_v13 = vshll.u32 %v6433_v21, %v6477_v62  ;;  %v1030_v1 = vsel %vm945_vm12, %v1029_v6, %v6468_v63  ;;  %v1047_v35 = vand.u32 2147483647, %v6237_v8 }
 0x10d   : > { %v1014_v5 = vsel %vm5414_vm13, 0, %v5413_v52  ;;  %vm1186_vm14 = vcmp.lt.s32.totalorder %v6498_v43, 4  ;;  %v918_v26 = vor.u32 4788187, %v917_v30  ;;  %v928_v58 = vsel %vm6502_vm11, 0, %v926_v40 }
 0x10e   : > { %v1019_v22 = vsub.s32 4294967266, %v1014_v5  ;;  %v914_v27 = vor.u32 %v913_v59, %v912_v13  ;;  %vm6554_vm15 = vcmp.le.f32.partialorder %v943_v31, 0.7853982  ;;  %vm642_vm0 = vcmp.gt.s32.totalorder %v641_v61, 0 }
 0x10f   : > { %v745_v21 = vadd.s32 1, %v5403_v0  ;;  %v6561_v63 = vsel %vm1186_vm14, %v6540_v34, 920167782  ;;  %v1032_v25 = vsel %vm6554_vm15, 0, %v1030_v1  ;;  %v1065_v14 = vshrl.u32 %v9352_v9, %v6451_v29 }
 0x110   : > { %v1020_v62 = vadd.s32 127, %v1019_v22  ;;  %v6569_v31 = vsel %vm1186_vm14, %v1182_v19, 1326507024  ;;  %v932_v36 = vadd.s32 3, %v928_v58  ;;  %v999_v54 = vadd.s32 %v6417_v57, %v6429_v2 }
 0x111   : > { %v1054_v20 = vand.u32 8388607, %v1047_v35  ;;  %v919_v4 = vand.u32 2147483647, %v918_v26  ;;  %v643_v44 = vsel %vm642_vm0, %v641_v61, 0  ;;  %v1063_v3 = vshrl.u32 %v9333_v7, %v6451_v29 }
 0x112   : > { %v1064_v15 = vshll.u32 %v9333_v7, %v6441_v45  ;;  %v921_v51 = vcvt.s32.f32 %v914_v27  ;;  %v1015_v12 = vsub.s32 32, %v1014_v5  ;;  %v1036_v28 = vadd.s32 3, %v1032_v25 }
 0x113   : > { %vm746_vm1 = vcmp.gt.s32.totalorder %v745_v21, 0  ;;  %v1021_v6 = vshll.u32 %v1020_v62, 23  ;;  %v1067_v57 = vshll.u32 %v9352_v9, %v6441_v45  ;;  %v1068_v2 = vshrl.u32 %v9350_v16, %v6451_v29 }
 0x114   : > { %v1066_v30 = vor.u32 %v1065_v14, %v1064_v15  ;;  %v6583_v52 = vand.u32 31, %v643_v44  ;;  %v1055_v59 = vor.u32 8388608, %v1054_v20  ;;  %v1070_v40 = vshll.u32 %v9350_v16, %v6441_v45 }
 0x115   : > { %v1071_v61 = vshrl.u32 %v9340_v60, %v6451_v29  ;;  %v922_v0 = vmul.f32 %v921_v51, %v919_v4  ;;  %v1016_v19 = vshll.u32 %v6484_v10, %v1014_v5  ;;  %v6590_v13 = vsel %vm746_vm1, %v745_v21, 0 }
 0x116   : > { %v1069_v1 = vor.u32 %v1068_v2, %v1067_v57  ;;  %v1017_v26 = vshrl.u32 %v999_v54, %v1015_v12  ;;  %vm1079_vm2 = vcmp.lt.s32.totalorder %v6460_v39, 1  ;;  %vm1081_vm3 = vcmp.lt.s32.totalorder %v6460_v39, 3 }
 0x117   : > { %v1072_v58 = vor.u32 %v1071_v61, %v1070_v40  ;;  %v1022_v22 = vor.u32 4788187, %v1021_v6  ;;  %vm1080_vm4 = vcmp.lt.s32.totalorder %v6460_v39, 2  ;;  %v1093_v45 = vsel %vm1081_vm3, %v6496_v33, %v1092_v38 }
 0x118   : > { %v1087_v27 = vsel %vm1079_vm2, %v1066_v30, %v1069_v1  ;;  %v1095_v21 = vshll.u32 %v1055_v59, 8  ;;  %v1083_v62 = vsel %vm1079_vm2, %v1063_v3, %v1066_v30  ;;  %v923_v20 = vxor.u32 2147483648, %v922_v0 }
 0x119   : > { %v1084_v29 = vsel %vm1082_vm10, %v1072_v58, 2102212464  ;;  %v1089_v10 = vsel %vm1081_vm3, %v1072_v58, %v6531_v42  ;;  %v1091_v5 = vsel %vm1079_vm2, %v1069_v1, %v1072_v58  ;;  %v1018_v4 = vor.u32 %v1017_v26, %v1016_v19 }
 0x11a   : > { %v1085_v25 = vsel %vm1081_vm3, %v1069_v1, %v1084_v29  ;;  %v1090_v14 = vsel %vm1080_vm4, %v1087_v27, %v1089_v10  ;;  %v1094_v54 = vsel %vm1080_vm4, %v1091_v5, %v1093_v45  ;;  %v6608_v33 = vsub.f32 %v6486_v24, %v6511_v11 }
 0x11b   : > { %v6603_v15 = vmul.u32.u64.low %v1095_v21, %v1094_v54  ;;  %v6604_v51 = vmul.u32.u64.high %v1095_v21, %v1094_v54, %v6603_v15  ;;  %v6610_v42 = vand.u32 3, %v932_v36  ;;  %v6616_v12 = vand.u32 3, %v1036_v28 }
 0x11c   : > { %v6612_v38 = vmul.u32.u64.low %v1095_v21, %v1090_v14  ;;  %v6613_v3 = vmul.u32.u64.high %v1095_v21, %v1090_v14, %v6612_v38  ;;  %v6618_v6 = vshrl.u32 %v643_v44, 5  ;;  %v1086_v30 = vsel %vm1080_vm4, %v1083_v62, %v1085_v25 }
 0x11d   : > { %v1151_v57 = vand.u32 2147483647, %v6260_v23  ;;  %v1023_v2 = vand.u32 2147483647, %v1022_v22  ;;  %v6624_v59 = vsub.s32 32, %v6583_v52  ;;  %v6627_v24 = vand.u32 31, %v6590_v13 }
 0x11e   : > { %v1169_v36 = vshrl.u32 %v9352_v9, %v6491_v37  ;;  %v924_v28 = vsel %vm841_vm9, %v923_v20, %v922_v0  ;;  %v1025_v44 = vcvt.s32.f32 %v1018_v4  ;;  %vm1104_vm5 = vc.u32 %v6604_v51, %v6612_v38 }
 0x11f   : > { %v1168_v39 = vshll.u32 %v9333_v7, %v6470_v50  ;;  %v1102_v40 = vmul.u32 %v1095_v21, %v1086_v30  ;;  %v1105_v61 = vadd.s32 1, %v6613_v3  ;;  %v1158_v19 = vand.u32 8388607, %v1151_v57 }
 0x120   : > { %v1171_v1 = vshll.u32 %v9352_v9, %v6470_v50  ;;  %v1172_v0 = vshrl.u32 %v9350_v16, %v6491_v37  ;;  %v1174_v58 = vshll.u32 %v9350_v16, %v6470_v50  ;;  %v1175_v22 = vshrl.u32 %v9340_v60, %v6491_v37 }
 0x121   : > { %v1170_v26 = vor.u32 %v1169_v36, %v1168_v39  ;;  %v927_v27 = vsel %vm6502_vm11, %v6086_v17, %v924_v28  ;;  %v1026_v45 = vmul.f32 %v1025_v44, %v1023_v2  ;;  %v657_v29 = vshll.u32 %v9340_v60, %v6583_v52 }
 0x122   : > { %v1106_v10 = vsel %vm1104_vm5, %v1105_v61, %v6613_v3  ;;  %v660_v5 = vshll.u32 %v9342_v53, %v6583_v52  ;;  %v1173_v62 = vor.u32 %v1172_v0, %v1171_v1  ;;  %v1176_v25 = vor.u32 %v1175_v22, %v1174_v58 }
 0x123   : > { %v1107_v21 = vadd.s32 %v1106_v10, %v1102_v40  ;;  %v658_v50 = vshrl.u32 %v9342_v53, %v6624_v59  ;;  %v6659_v14 = vsub.s32 32, %v6627_v24  ;;  %v1159_v56 = vor.u32 8388608, %v1158_v19 }
 0x124   : > { %vm1183_vm6 = vcmp.lt.s32.totalorder %v6498_v43, 1  ;;  %5680 = vcosq.f32 %v927_v27  ;;  %vm1185_vm7 = vcmp.lt.s32.totalorder %v6498_v43, 3  ;;  %v1027_v4 = vxor.u32 2147483648, %v1026_v45 }
 0x125   : > { %v1108_v54 = vadd.s32 536870912, %v1107_v21  ;;  %v1191_v20 = vsel %vm1183_vm6, %v1170_v26, %v1173_v62  ;;  %v661_v15 = vshrl.u32 %v9326_v47, %v6624_v59  ;;  %v1193_v3 = vsel %vm1185_vm7, %v1176_v25, %v6561_v63 }
 0x126   : > { %v1195_v30 = vsel %vm1183_vm6, %v1173_v62, %v1176_v25  ;;  %v1167_v36 = vshrl.u32 %v9333_v7, %v6491_v37  ;;  %vm1184_vm8 = vcmp.lt.s32.totalorder %v6498_v43, 2  ;;  %v1197_v28 = vsel %vm1185_vm7, %v6540_v34, %v6569_v31 }
 0x127   : > { %v6672_v2 = vshrl.u32 %v1108_v54, 30  ;;  %v1188_v44 = vsel %vm1186_vm14, %v1176_v25, 2102212464  ;;  %v1194_v63 = vsel %vm1184_vm8, %v1191_v20, %v1193_v3  ;;  %v1198_v39 = vsel %vm1184_vm8, %v1195_v30, %v1197_v28 }
 0x128   : > { %v1199_v40 = vshll.u32 %v1159_v56, 8  ;;  %v6687_v61 = vor.u32 %v658_v50, %v657_v29  ;;  %v6690_v37 = vshrl.u32 %v6590_v13, 5  ;;  %v762_v19 = vshrl.u32 %v9342_v53, %v6659_v14 }
 0x129   : > { %v1110_v34 = vshll.u32 %v6672_v2, 30  ;;  %v1028_v31 = vsel %vm945_vm12, %v1027_v4, %v1026_v45  ;;  %v1187_v1 = vsel %vm1183_vm6, %v1167_v36, %v1170_v26  ;;  %v1189_v13 = vsel %vm1185_vm7, %v1173_v62, %v1188_v44 }
 0x12a   : > { %v6699_v0 = vmul.u32.u64.low %v1199_v40, %v1198_v39  ;;  %v6700_v58 = vmul.u32.u64.high %v1199_v40, %v1198_v39, %v6699_v0  ;;  %v6706_v29 = vmul.u32.u64.low %v1199_v40, %v1194_v63  ;;  %v6707_v10 = vmul.u32.u64.high %v1199_v40, %v1194_v63, %v6706_v29 }
 0x12b   : > { %v6702_v22 = vsub.s32 %v1107_v21, %v1110_v34  ;;  %v6712_v25 = vsub.f32 %v6506_v46, %v6515_v48  ;;  %5682 = vsinq.f32 %v927_v27  ;;  %v662_v45 = vor.u32 %v661_v15, %v660_v5 }
 0x12c   : > { %v761_v26 = vshll.u32 %v9340_v60, %v6627_v24  ;;  %v1031_v21 = vsel %vm6554_vm15, %v6088_v18, %v1028_v31  ;;  %vm666_vm9 = vcmp.lt.s32.totalorder %v6618_v6, 4  ;;  %v6722_v62 = vshrl.u32 %v9326_v47, %v6659_v14 }
 0x12d   : > { %v1113_v50 = vsub.s32 0, %v6702_v22  ;;  %v672_v46 = vsel %vm666_vm9, %v6687_v61, 920167782  ;;  %vm770_vm10 = vcmp.lt.s32.totalorder %v6690_v37, 4  ;;  %v1190_v41 = vsel %vm1184_vm8, %v1187_v1, %v1189_v13 }
 0x12e   : > { %v6728_v27 = vor.u32 %v762_v19, %v761_v26  ;;  %v6735_v5 = vshll.u32 %v9342_v53, %v6627_v24  ;;  %vm1208_vm11 = vc.u32 %v6700_v58, %v6706_v29  ;;  %v1209_v54 = vadd.s32 1, %v6707_v10 }
 0x12f   : > { %v5416_v56 = vmin.u32 %v1113_v50, %v6702_v22  ;;  %5684 = vcosq.f32 %v1031_v21  ;;  %v676_v20 = vsel %vm666_vm9, %v662_v45, 1326507024  ;;  %v631_v4 = vand.u32 2147483647, %v6454_v55 }
 0x130   : > { %v649_v43 = vshrl.u32 %v9352_v9, %v6624_v59  ;;  %5686 = vsinq.f32 %v1031_v21  ;;  %v766_v15 = vor.u32 %v6722_v62, %v6735_v5  ;;  %v1206_v30 = vmul.u32 %v1199_v40, %v1190_v41 }
 0x131   : > { %v1115_v3 = vclz %v5416_v56  ;;  %v6748_v36 = vpop.eup %5680  ;;  %v6753_v28 = vsel %vm770_vm10, %v6728_v27, 920167782  ;;  %v1103_v44 = vadd.s32 %v6612_v38, %v6604_v51  ;;  %v1210_v63 = vsel %vm1208_vm11, %v1209_v54, %v6707_v10 }
 0x132   : > { %v648_v39 = vshll.u32 %v9333_v7, %v6583_v52  ;;  %vm1049_vm12 = vcmp.lt.s32.totalorder %v6237_v8, 0  ;;  %v1211_v34 = vadd.s32 %v1210_v63, %v1206_v30  ;;  %v651_v40 = vshll.u32 %v9352_v9, %v6583_v52 }
 0x133   : > { %v5417_v19 = vadd.s32 4294967294, %v1115_v3  ;;  %v652_v31 = vshrl.u32 %v9350_v16, %v6624_v59  ;;  %v638_v1 = vand.u32 8388607, %v631_v4  ;;  %v654_v51 = vshll.u32 %v9350_v16, %v6583_v52 }
 0x134   : > { %v650_v0 = vor.u32 %v649_v43, %v648_v39  ;;  %v655_v38 = vshrl.u32 %v9340_v60, %v6624_v59  ;;  %v939_v13 = vxor.u32 2147483648, %v6748_v36  ;;  %v1212_v10 = vadd.s32 536870912, %v1211_v34 }
 0x135   : > { %vm5418_vm13 = vcmp.lt.s32.totalorder %v5417_v19, 0  ;;  %v653_v45 = vor.u32 %v652_v31, %v651_v40  ;;  %vm6774_vm14 = vcmp.le.f32.partialorder %v1047_v35, 0.7853982  ;;  %v1133_v50 = vsub.s32 4, %v6672_v2 }
 0x136   : > { %v1118_v21 = vsel %vm5418_vm13, 0, %v5417_v19  ;;  %v656_v41 = vor.u32 %v655_v38, %v654_v51  ;;  %vm663_vm15 = vcmp.lt.s32.totalorder %v6618_v6, 1  ;;  %vm935_vm0 = vcmp.eq.s32.totalorder %v6610_v42, 0 }
 0x137   : > { %vm938_vm1 = vcmp.eq.s32.totalorder %v6610_v42, 2  ;;  %v1119_v52 = vsub.s32 32, %v1118_v21  ;;  %v1123_v56 = vsub.s32 4294967266, %v1118_v21  ;;  %v6782_v54 = vshrl.u32 %v1212_v10, 30 }
 0x138   : > { %vm665_vm2 = vcmp.lt.s32.totalorder %v6618_v6, 3  ;;  %v1120_v35 = vshll.u32 %v6702_v22, %v1118_v21  ;;  %v639_v43 = vor.u32 8388608, %v638_v1  ;;  %v671_v3 = vsel %vm663_vm15, %v650_v0, %v653_v45  ;;  %v5683_v63 = vpop.eup %5682 }
 0x139   : > { %v673_v30 = vsel %vm665_vm2, %v656_v41, %v672_v46  ;;  %v1121_v39 = vshrl.u32 %v1103_v44, %v1119_v52  ;;  %v1124_v19 = vadd.s32 127, %v1123_v56  ;;  %v1214_v40 = vshll.u32 %v6782_v54, 30 }
 0x13a   : > { %v675_v31 = vsel %vm663_vm15, %v653_v45, %v656_v41  ;;  %v647_v51 = vshrl.u32 %v9333_v7, %v6624_v59  ;;  %vm664_vm3 = vcmp.lt.s32.totalorder %v6618_v6, 2  ;;  %v668_v22 = vsel %vm666_vm9, %v656_v41, 2102212464 }
 0x13b   : > { %v677_v46 = vsel %vm665_vm2, %v6687_v61, %v676_v20  ;;  %v1122_v1 = vor.u32 %v1121_v39, %v1120_v35  ;;  %v1125_v44 = vshll.u32 %v1124_v19, 23  ;;  %v6801_v38 = vsub.s32 %v1211_v34, %v1214_v40 }
 0x13c   : > { %v674_v10 = vsel %vm664_vm3, %v671_v3, %v673_v30  ;;  %v936_v21 = vxor.u32 2147483648, %v5683_v63  ;;  %v1134_v59 = vsel %vm1049_vm12, %v1133_v50, %v6672_v2  ;;  %v678_v52 = vsel %vm664_vm3, %v675_v31, %v677_v46  ;;  %v6810_v56 = vpop.eup %5684 }
 0x13d   : > { %v679_v41 = vshll.u32 %v639_v43, 8  ;;  %v1126_v47 = vor.u32 4788187, %v1125_v44  ;;  %v1217_v61 = vsub.s32 0, %v6801_v38  ;;  %v667_v20 = vsel %vm663_vm15, %v647_v51, %v650_v0  ;;  %v6817_v35 = vpop.eup %5686 }
 0x13e   : > { %v669_v34 = vsel %vm665_vm2, %v653_v45, %v668_v22  ;;  %v1129_v39 = vcvt.s32.f32 %v1122_v1  ;;  %v1136_v19 = vsel %vm6774_vm14, 0, %v1134_v59  ;;  %v6832_v0 = vsel %vm935_vm0, %v6748_v36, %v936_v21 }
 0x13f   : > { %v6819_v3 = vmul.u32.u64.low %v679_v41, %v678_v52  ;;  %v6820_v30 = vmul.u32.u64.high %v679_v41, %v678_v52, %v6819_v3  ;;  %v6822_v2 = vmul.u32.u64.low %v679_v41, %v674_v10  ;;  %v6823_v50 = vmul.u32.u64.high %v679_v41, %v674_v10, %v6822_v2 }
 0x140   : > { %v1127_v43 = vand.u32 2147483647, %v1126_v47  ;;  %v5420_v40 = vmin.u32 %v1217_v61, %v6801_v38  ;;  %v6836_v45 = vsel %vm938_vm1, %v939_v13, %v5683_v63  ;;  %v780_v47 = vsel %vm770_vm10, %v766_v15, 1326507024 }
 0x141   : > { %v670_v31 = vsel %vm664_vm3, %v667_v20, %v669_v34  ;;  %v1040_v51 = vxor.u32 2147483648, %v6817_v35  ;;  %v1043_v22 = vxor.u32 2147483648, %v6810_v56  ;;  %v1140_v1 = vadd.s32 3, %v1136_v19 }
 0x142   : > { %v1130_v46 = vmul.f32 %v1129_v39, %v1127_v43  ;;  %v1219_v36 = vclz %v5420_v40  ;;  %vm688_vm4 = vc.u32 %v6820_v30, %v6822_v2  ;;  %v689_v13 = vadd.s32 1, %v6823_v50 }
 0x143   : > { %v735_v62 = vand.u32 2147483647, %v6472_v49  ;;  %v1207_v15 = vadd.s32 %v6706_v29, %v6700_v58  ;;  %v686_v63 = vmul.u32 %v679_v41, %v670_v31  ;;  %vm1042_vm5 = vcmp.eq.s32.totalorder %v6616_v12, 2 }
 0x144   : > { %v1131_v5 = vxor.u32 2147483648, %v1130_v46  ;;  %v5421_v6 = vadd.s32 4294967294, %v1219_v36  ;;  %v690_v44 = vsel %vm688_vm4, %v689_v13, %v6823_v50  ;;  %v752_v10 = vshll.u32 %v9333_v7, %v6627_v24 }
 0x145   : > { %v753_v21 = vshrl.u32 %v9352_v9, %v6659_v14  ;;  %v756_v59 = vshrl.u32 %v9350_v16, %v6659_v14  ;;  %v691_v58 = vadd.s32 %v690_v44, %v686_v63  ;;  %v755_v29 = vshll.u32 %v9352_v9, %v6627_v24 }
 0x146   : > { %v1132_v52 = vsel %vm1049_vm12, %v1131_v5, %v1130_v46  ;;  %vm5422_vm6 = vcmp.lt.s32.totalorder %v5421_v6, 0  ;;  %v742_v20 = vand.u32 8388607, %v735_v62  ;;  %vm1039_vm7 = vcmp.eq.s32.totalorder %v6616_v12, 0 }
 0x147   : > { %v1135_v41 = vsel %vm6774_vm14, %v6237_v8, %v1132_v52  ;;  %v1222_v61 = vsel %vm5422_vm6, 0, %v5421_v6  ;;  %v754_v34 = vor.u32 %v753_v21, %v752_v10  ;;  %v757_v43 = vor.u32 %v756_v59, %v755_v29 }
 0x148   : > { %5688 = vcosq.f32 %v1135_v41  ;;  %v1223_v3 = vsub.s32 32, %v1222_v61  ;;  %v1227_v50 = vsub.s32 4294967266, %v1222_v61  ;;  %v692_v39 = vadd.s32 536870912, %v691_v58 }
 0x149   : > { %5690 = vsinq.f32 %v1135_v41  ;;  %v758_v19 = vshll.u32 %v9350_v16, %v6627_v24  ;;  %v759_v26 = vshrl.u32 %v9340_v60, %v6659_v14  ;;  %v1224_v40 = vshll.u32 %v6801_v38, %v1222_v61 }
 0x14a   : > { %v1225_v31 = vshrl.u32 %v1207_v15, %v1223_v3  ;;  %v1228_v46 = vadd.s32 127, %v1227_v50  ;;  %v751_v36 = vshrl.u32 %v9333_v7, %v6659_v14  ;;  %v6878_v13 = vshrl.u32 %v692_v39, 30 }
 0x14b   : > { %v743_v5 = vor.u32 8388608, %v742_v20  ;;  %v760_v6 = vor.u32 %v759_v26, %v758_v19  ;;  %vm767_vm8 = vcmp.lt.s32.totalorder %v6690_v37, 1  ;;  %vm1153_vm9 = vcmp.lt.s32.totalorder %v6260_v23, 0 }
 0x14c   : > { %v1226_v63 = vor.u32 %v1225_v31, %v1224_v40  ;;  %v1229_v24 = vshll.u32 %v1228_v46, 23  ;;  %vm769_vm11 = vcmp.lt.s32.totalorder %v6690_v37, 3  ;;  %v775_v38 = vsel %vm767_vm8, %v754_v34, %v757_v43 }
 0x14d   : > { %v694_v15 = vshll.u32 %v6878_v13, 30  ;;  %v772_v14 = vsel %vm770_vm10, %v760_v6, 2102212464  ;;  %v777_v44 = vsel %vm769_vm11, %v760_v6, %v6753_v28  ;;  %v781_v10 = vsel %vm769_vm11, %v6728_v27, %v780_v47 }
 0x14e   : > { %v6893_v21 = vsel %vm1042_vm5, %v1043_v22, %v6817_v35  ;;  %vm6897_vm12 = vcmp.le.f32.partialorder %v1151_v57, 0.7853982  ;;  %v1230_v52 = vor.u32 4788187, %v1229_v24  ;;  %vm768_vm13 = vcmp.lt.s32.totalorder %v6690_v37, 2 }
 0x14f   : > { %v771_v29 = vsel %vm767_vm8, %v751_v36, %v754_v34  ;;  %v1233_v28 = vcvt.s32.f32 %v1226_v63  ;;  %v6904_v41 = vsub.s32 %v691_v58, %v694_v15  ;;  %v773_v27 = vsel %vm769_vm11, %v757_v43, %v772_v14 }
 0x150   : > { %v779_v47 = vsel %vm767_vm8, %v757_v43, %v760_v6  ;;  %v1231_v22 = vand.u32 2147483647, %v1230_v52  ;;  %v778_v57 = vsel %vm768_vm13, %v775_v38, %v777_v44  ;;  %v783_v20 = vshll.u32 %v743_v5, 8 }
 0x151   : > { %v782_v61 = vsel %vm768_vm13, %v779_v47, %v781_v10  ;;  %v1141_v3 = vand.u32 3, %v1140_v1  ;;  %v1237_v50 = vsub.s32 4, %v6782_v54  ;;  %v697_v34 = vsub.s32 0, %v6904_v41 }
 0x152   : > { %v1679_v58 = vand.u32 4294901760, %v6712_v25  ;;  %v1041_v43 = vsel %vm1039_vm7, %v6810_v56, %v1040_v51  ;;  %v1234_v39 = vmul.f32 %v1233_v28, %v1231_v22  ;;  %vm934_vm10 = vcmp.lt.s32.totalorder %v6610_v42, 2 }
 0x153   : > { %v6920_v19 = vmul.u32.u64.low %v783_v20, %v782_v61  ;;  %v6921_v26 = vmul.u32.u64.high %v783_v20, %v782_v61, %v6920_v19  ;;  %v5400_v1 = vmin.u32 %v697_v34, %v6904_v41  ;;  %v774_v40 = vsel %vm768_vm13, %v771_v29, %v773_v27 }
 0x154   : > { %v6927_v31 = vmul.u32.u64.low %v783_v20, %v778_v57  ;;  %v6928_v46 = vmul.u32.u64.high %v783_v20, %v778_v57, %v6927_v31  ;;  %vm1038_vm14 = vcmp.lt.s32.totalorder %v6616_v12, 2  ;;  %v1235_v35 = vxor.u32 2147483648, %v1234_v39 }
 0x155   : > { %v1680_v56 = vsub.f32 %v6712_v25, %v1679_v58  ;;  %v1685_v51 = vand.u32 4294901760, %v6608_v33  ;;  %v5689_v36 = vpop.eup %5688  ;;  %vm1143_vm15 = vcmp.eq.s32.totalorder %v1141_v3, 0  ;;  %vm1146_vm0 = vcmp.eq.s32.totalorder %v1141_v3, 2 }
 0x156   : > { %v1238_v37 = vsel %vm1153_vm9, %v1237_v50, %v6782_v54  ;;  %v699_v5 = vclz %v5400_v1  ;;  %v9328_v6 = vmov 0.0   ;;  %v5691_v63 = vpop.eup %5690  ;;  %v1147_v24 = vxor.u32 2147483648, %v5689_v36 }
 0x157   : > { %1608 = vmatprep.mubr.f32.mxu0 %v9328_v6  ;;  %1757 = vmatprep.mubr.f32.mxu1 %v9328_v6  ;;  %v1236_v38 = vsel %vm1153_vm9, %v1235_v35, %v1234_v39  ;;  %v790_v15 = vmul.u32 %v783_v20, %v774_v40  ;;  %vm792_vm1 = vc.u32 %v6921_v26, %v6927_v31  ;;  %v1144_v14 = vxor.u32 2147483648, %v5691_v63 }
 0x158   : > { %v1239_v54 = vsel %vm6897_vm12, %v6260_v23, %v1236_v38  ;;  %v5401_v44 = vadd.s32 4294967294, %v699_v5  ;;  %v793_v10 = vadd.s32 1, %v6928_v46  ;;  %v1148_v52 = vsel %vm1146_vm0, %v1147_v24, %v5691_v63 }
 0x159   : > { %5692 = vcosq.f32 %v1239_v54  ;;  %v1681_v29 = vand.u32 4294901760, %v1680_v56  ;;  %v1686_v28 = vsub.f32 %v6608_v33, %v1685_v51  ;;  %v1145_v27 = vsel %vm1143_vm15, %v5689_v36, %v1144_v14  ;;  %v1480_v36 = vpop.permute.xlu1 %1479 }
 0x15a   : > { %5694 = vsinq.f32 %v1239_v54  ;;  %vm5402_vm2 = vcmp.lt.s32.totalorder %v5401_v44, 0  ;;  %v794_v47 = vsel %vm792_vm1, %v793_v10, %v6928_v46  ;;  %vm1142_vm3 = vcmp.lt.s32.totalorder %v1141_v3, 2 }
 0x15b   : > { %v702_v22 = vsel %vm5402_vm2, 0, %v5401_v44  ;;  %v795_v57 = vadd.s32 %v794_v47, %v790_v15  ;;  %1682 = vmatprep.subr.mxu1 %v1681_v29  ;;  %v1687_v61 = vand.u32 4294901760, %v1686_v28  ;;  %v1149_v20 = vsel %vm1142_vm3, %v1145_v27, %v1148_v52 }
 0x15c   : > { %v687_v50 = vadd.s32 %v6822_v2, %v6820_v30  ;;  %v703_v34 = vsub.s32 32, %v702_v22  ;;  %v707_v39 = vsub.s32 4294967266, %v702_v22  ;;  %v941_v19 = vsel %vm934_vm10, %v6832_v0, %v6836_v45 }
 0x15d   : > { %vm1139_vm4 = vweird.f32 %v6237_v8  ;;  %v1240_v3 = vsel %vm6897_vm12, 0, %v1238_v37  ;;  %v796_v1 = vadd.s32 536870912, %v795_v57  ;;  %1688 = vmatpush1.msra.mxu1 %v1687_v61  ;;  %v1045_v40 = vsel %vm1038_vm14, %v1041_v43, %v6893_v21  ;;  %v1475_v21 = vpop.permute.xlu0 %1474 }
 0x15e   : > { %v704_v30 = vshll.u32 %v6904_v41, %v702_v22  ;;  %v705_v2 = vshrl.u32 %v687_v50, %v703_v34  ;;  %v708_v46 = vadd.s32 127, %v707_v39  ;;  %vm931_vm5 = vweird.f32 %v6086_v17 }
 0x15f   : > { %vm1035_vm6 = vweird.f32 %v6088_v18  ;;  %v1150_v42 = vsel %vm1139_vm4, nan, %v1149_v20  ;;  %v6970_v0 = vshrl.u32 %v796_v1, 30  ;;  %v942_v8 = vsel %vm931_vm5, nan, %v941_v19 }
 0x160   : > { %v1244_v45 = vadd.s32 3, %v1240_v3  ;;  %v706_v59 = vor.u32 %v705_v2, %v704_v30  ;;  %v709_v35 = vshll.u32 %v708_v46, 23  ;;  %v1046_v56 = vsel %vm1035_vm6, nan, %v1045_v40 }
 0x161   : > { %v798_v12 = vshll.u32 %v6970_v0, 30  ;;  %v1491_v43 = vmul.f32 %v1480_v36, %v1150_v42  ;;  %v1489_v37 = vmul.f32 %v1475_v21, %v942_v8  ;;  %v1490_v63 = vmul.f32 %v1475_v21, %v1046_v56 }
 0x162   : > { %v710_v41 = vor.u32 4788187, %v709_v35  ;;  %v1245_v17 = vand.u32 3, %v1244_v45  ;;  %v713_v18 = vcvt.s32.f32 %v706_v59  ;;  %vm633_vm7 = vcmp.lt.s32.totalorder %v6454_v55, 0 }
 0x163   : > { %v799_v5 = vsub.s32 %v795_v57, %v798_v12  ;;  %v6973_v14 = vand.u32 4294901760, %v1491_v43  ;;  %v6975_v10 = vand.u32 4294901760, %v1489_v37  ;;  %v6978_v28 = vand.u32 4294901760, %v1490_v63 }
 0x164   : > { %v711_v24 = vand.u32 2147483647, %v710_v41  ;;  %vm1250_vm8 = vcmp.eq.s32.totalorder %v1245_v17, 2  ;;  %vm1247_vm9 = vcmp.eq.s32.totalorder %v1245_v17, 0  ;;  %vm6982_vm11 = vcmp.le.f32.partialorder %v631_v4, 0.7853982 }
 0x165   : > { %v801_v38 = vsub.s32 0, %v799_v5  ;;  %vm1246_vm12 = vcmp.lt.s32.totalorder %v1245_v17, 2  ;;  %v6987_v50 = vsub.f32 %v1491_v43, %v6973_v14  ;;  %vm1243_vm13 = vweird.f32 %v6260_v23 }
 0x166   : > { %v5693_v15 = vpop.eup %5692  ;;  %v714_v54 = vmul.f32 %v713_v18, %v711_v24  ;;  %v6996_v3 = vsub.f32 %v1490_v63, %v6978_v28  ;;  %v717_v40 = vsub.s32 4, %v6878_v13  ;;  %v7000_v2 = vsub.f32 %v1489_v37, %v6975_v10 }
 0x167   : > { %v5695_v44 = vpop.eup %5694  ;;  %v1251_v52 = vxor.u32 2147483648, %v5693_v15  ;;  %v5404_v29 = vmin.u32 %v801_v38, %v799_v5  ;;  %v1697_v46 = vand.u32 4294901760, %v6987_v50  ;;  %v791_v8 = vadd.s32 %v6927_v31, %v6921_v26 }
 0x168   : > { %v1248_v27 = vxor.u32 2147483648, %v5695_v44  ;;  %v715_v47 = vxor.u32 2147483648, %v714_v54  ;;  %v718_v35 = vsel %vm633_vm7, %v717_v40, %v6878_v13  ;;  %v1703_v56 = vand.u32 4294901760, %v6996_v3 }
 0x169   : > { %v1252_v22 = vsel %vm1250_vm8, %v1251_v52, %v5695_v44  ;;  %v803_v61 = vclz %v5404_v29  ;;  %v1698_v26 = vsub.f32 %v6987_v50, %v1697_v46  ;;  %v1709_v31 = vand.u32 4294901760, %v7000_v2 }
 0x16a   : > { %v1249_v20 = vsel %vm1247_vm9, %v5693_v15, %v1248_v27  ;;  %v716_v34 = vsel %vm633_vm7, %v715_v47, %v714_v54  ;;  %v720_v13 = vsel %vm6982_vm11, 0, %v718_v35  ;;  %v1704_v24 = vsub.f32 %v6996_v3, %v1703_v56  ;;  %v1496_v35 = vld [vmem:[%s9313_s3 + $0x8] sm:$0xff] }
 0x16b   : > { %v1253_v39 = vsel %vm1246_vm12, %v1249_v20, %v1252_v22  ;;  %v719_v19 = vsel %vm6982_vm11, %v6454_v55, %v716_v34  ;;  %v5405_v4 = vadd.s32 4294967294, %v803_v61  ;;  %v724_v18 = vadd.s32 3, %v720_v13  ;;  %v1470_v13 = vpop.permute.xlu1 %1469 }
 0x16c   : > { %v1254_v1 = vsel %vm1243_vm13, nan, %v1253_v39  ;;  %5696 = vcosq.f32 %v719_v19  ;;  %v1699_v38 = vand.u32 4294901760, %v1698_v26  ;;  %v1710_v15 = vsub.f32 %v7000_v2, %v1709_v31 }
 0x16d   : > { %v1492_v30 = vmul.f32 %v1480_v36, %v1254_v1  ;;  %5698 = vsinq.f32 %v719_v19  ;;  %vm5406_vm10 = vcmp.lt.s32.totalorder %v5405_v4, 0  ;;  %v1705_v47 = vand.u32 4294901760, %v1704_v24 }
 0x16e   : > { %v806_v23 = vsel %vm5406_vm10, 0, %v5405_v4  ;;  %v725_v57 = vand.u32 3, %v724_v18  ;;  %v1711_v61 = vand.u32 4294901760, %v1710_v15  ;;  %vm737_vm14 = vcmp.lt.s32.totalorder %v6472_v49, 0  ;;  %v1498_v18 = vld [vmem:[%s9313_s3 + $0x18] sm:$0xff] }
 0x16f   : > { %v7003_v42 = vand.u32 4294901760, %v1492_v30  ;;  %v807_v45 = vsub.s32 32, %v806_v23  ;;  %v811_v59 = vsub.s32 4294967266, %v806_v23  ;;  %v808_v12 = vshll.u32 %v799_v5, %v806_v23 }
 0x170   : > { %v821_v19 = vsub.s32 4, %v6970_v0  ;;  %vm7038_vm15 = vcmp.le.f32.partialorder %v735_v62, 0.7853982  ;;  %vm727_vm0 = vcmp.eq.s32.totalorder %v725_v57, 0  ;;  %vm730_vm1 = vcmp.eq.s32.totalorder %v725_v57, 2 }
 0x171   : > { %v7012_v36 = vsub.f32 %v1492_v30, %v7003_v42  ;;  %v809_v21 = vshrl.u32 %v791_v8, %v807_v45  ;;  %v812_v43 = vadd.s32 127, %v811_v59  ;;  %1565 = vmatprep.subr.mxu0 %v7003_v42  ;;  %v1495_v8 = vld [vmem:[%s9313_s3] sm:$0xff]  ;;  %vm9356_vm2 = vcmask 261120  }
 0x172   : > { %1567 = vmatpush1.msra.mxu0 %v6973_v14  ;;  %v822_v62 = vsel %vm737_vm14, %v821_v19, %v6970_v0  ;;  %vm726_vm3 = vcmp.lt.s32.totalorder %v725_v57, 2  ;;  %v1525_v59 = vsel %vm9356_vm2, %v1495_v8, 0  ;;  %vm723_vm4 = vweird.f32 %v6454_v55 }
 0x173   : > { %v810_v41 = vor.u32 %v809_v21, %v808_v12  ;;  %v813_v37 = vshll.u32 %v812_v43, 23  ;;  %1569 = vmatprep.subr.mxu0 %v6978_v28  ;;  %v1691_v5 = vand.u32 4294901760, %v7012_v36  ;;  %v824_v12 = vsel %vm7038_vm15, 0, %v822_v62 }
 0x174   : > { %1571 = vmatpush1.msra.mxu0 %v6975_v10  ;;  %v7056_v43 = vand.u32 4294901760, %v1525_v59  ;;  %v1528_v26 = vsel %vm9356_vm2, %v1496_v35, 0  ;;  %v828_v0 = vadd.s32 3, %v824_v12  ;;  %vm827_vm6 = vweird.f32 %v6472_v49 }
 0x175   : > { %v814_v63 = vor.u32 4788187, %v813_v37  ;;  %v1692_v17 = vsub.f32 %v7012_v36, %v1691_v5  ;;  %v817_v44 = vcvt.s32.f32 %v810_v41  ;;  %v1497_v41 = vld [vmem:[%s9313_s3 + $0x10] sm:$0xff] }
 0x176   : > { %v829_v24 = vand.u32 3, %v828_v0  ;;  %v1531_v55 = vsel %vm9356_vm2, %v1497_v41, 0 }
 0x177   : > { %v815_v54 = vand.u32 2147483647, %v814_v63  ;;  %v1693_v52 = vand.u32 4294901760, %v1692_v17  ;;  %v7062_v63 = vand.u32 4294901760, %v1528_v26  ;;  %v7065_v17 = vsub.f32 %v1525_v59, %v7056_v43 }
 0x178   : > { %vm834_vm5 = vcmp.eq.s32.totalorder %v829_v24, 2  ;;  %vm831_vm7 = vcmp.eq.s32.totalorder %v829_v24, 0  ;;  %vm830_vm8 = vcmp.lt.s32.totalorder %v829_v24, 2 }
 0x179   : > { %v5697_v29 = vpop.eup %5696  ;;  %v818_v27 = vmul.f32 %v817_v44, %v815_v54  ;;  %1694 = vmatprep.subr.mxu1 %v1693_v52  ;;  %v7074_v54 = vsub.f32 %v1528_v26, %v7062_v63 }
 0x17a   : > { %v5699_v22 = vpop.eup %5698  ;;  %1700 = vmatpush1.msra.mxu1 %v1699_v38  ;;  %v731_v34 = vxor.u32 2147483648, %v5697_v29 }
 0x17b   : > { %v728_v20 = vxor.u32 2147483648, %v5699_v22  ;;  %v819_v39 = vxor.u32 2147483648, %v818_v27  ;;  %1706 = vmatprep.subr.mxu1 %v1705_v47 }
 0x17c   : > { %1712 = vmatpush1.msra.mxu1 %v1711_v61  ;;  %v732_v23 = vsel %vm730_vm1, %v731_v34, %v5699_v22  ;;  %v1534_v22 = vsel %vm9356_vm2, %v1498_v18, 0  ;;  %v1622_v34 = vand.u32 4294901760, %v7074_v54 }
 0x17d   : > { %v820_v1 = vsel %vm737_vm14, %v819_v39, %v818_v27  ;;  %v729_v30 = vsel %vm727_vm0, %v5697_v29, %v728_v20  ;;  %v1611_v29 = vand.u32 4294901760, %v7065_v17  ;;  %v7077_v27 = vand.u32 4294901760, %v1531_v55 }
 0x17e   : > { %v823_v40 = vsel %vm7038_vm15, %v6472_v49, %v820_v1  ;;  %v733_v45 = vsel %vm726_vm3, %v729_v30, %v732_v23  ;;  %v7091_v1 = vand.u32 4294901760, %v1534_v22  ;;  %v1623_v30 = vsub.f32 %v7074_v54, %v1622_v34 }
 0x17f   : > { %5700 = vcosq.f32 %v823_v40  ;;  %v734_v21 = vsel %vm723_vm4, nan, %v733_v45  ;;  %v1612_v19 = vsub.f32 %v7065_v17, %v1611_v29  ;;  %v7089_v4 = vsub.f32 %v1531_v55, %v7077_v27 }
 0x180   : > { %5702 = vsinq.f32 %v823_v40  ;;  %v1487_v37 = vmul.f32 %v1470_v13, %v734_v21  ;;  %v7101_v59 = vsub.f32 %v1534_v22, %v7091_v1  ;;  %v1624_v21 = vand.u32 4294901760, %v1623_v30 }
 0x181   : > { %v1613_v62 = vand.u32 4294901760, %v1612_v19  ;;  %v1633_v45 = vand.u32 4294901760, %v7089_v4 }
 0x182   : > { %v7071_v15 = vand.u32 4294901760, %v1487_v37 }
 0x183   : > { %v1634_v0 = vsub.f32 %v7089_v4, %v1633_v45 }
 0x184   : > { %v7082_v20 = vsub.f32 %v1487_v37, %v7071_v15 }
 0x185   : > { %v1635_v55 = vand.u32 4294901760, %v1634_v0 }
 0x186   : > { %v1721_v23 = vand.u32 4294901760, %v7082_v20 }
 0x188   : > { %v1722_v12 = vsub.f32 %v7082_v20, %v1721_v23 }
 0x18a   : > { %v1723_v37 = vand.u32 4294901760, %v1722_v12 }
 0x18c   : > { %v5701_v38 = vpop.eup %5700 }
 0x18d   : > { %v5703_v44 = vpop.eup %5702  ;;  %v835_v52 = vxor.u32 2147483648, %v5701_v38 }
 0x18e   : > { %v832_v47 = vxor.u32 2147483648, %v5703_v44 }
 0x18f   : > { %v836_v57 = vsel %vm834_vm5, %v835_v52, %v5703_v44 }
 0x190   : > { %v833_v61 = vsel %vm831_vm7, %v5701_v38, %v832_v47 }
 0x191   : > { %v837_v39 = vsel %vm830_vm8, %v833_v61, %v836_v57 }
 0x192   : > { %v838_v49 = vsel %vm827_vm6, nan, %v837_v39 }
 0x193   : > { %v1488_v40 = vmul.f32 %v1470_v13, %v838_v49  ;;  %v1644_v13 = vand.u32 4294901760, %v7101_v59 }
 0x195   : > { %v7097_v8 = vand.u32 4294901760, %v1488_v40  ;;  %v1645_v18 = vsub.f32 %v7101_v59, %v1644_v13 }
 0x197   : > { %v1714_v35 = vsub.f32 %v1488_v40, %v7097_v8  ;;  %1573 = vmatprep.subr.mxu0 %v7097_v8  ;;  %v1646_v38 = vand.u32 4294901760, %v1645_v18 }
 0x198   : > { %1575 = vmatpush1.msra.mxu0 %v7071_v15 }
 0x199   : > { %1614 = vmatmul.mubr.f32.vlgmr.msra.gmra.mxu0 %v1613_v62  ;;  %1812 = vmatprep.subr.mxu0 %v6712_v25  ;;  %v1715_v26 = vand.u32 4294901760, %v1714_v35 }
 0x19a   : > { %1815 = vmatpush1.msra.mxu0 %v6608_v33  ;;  %1619 = vmatprep.mubr.f32.mxu0 %v9328_v6 }
 0x19b   : > { %1818 = vmatprep.subr.mxu0 %v7012_v36  ;;  %v1716_v41 = vsub.f32 %v1714_v35, %v1715_v26 }
 0x19c   : > { %1821 = vmatpush1.msra.mxu0 %v6987_v50 }
 0x19d   : > { %1625 = vmatmul.mubr.f32.gmra.mxu0 %v1624_v21  ;;  %1824 = vmatprep.subr.mxu0 %v6996_v3  ;;  %v1717_v24 = vand.u32 4294901760, %v1716_v41 }
 0x19e   : > { %1827 = vmatpush1.msra.mxu0 %v7000_v2  ;;  %1630 = vmatprep.mubr.f32.mxu0 %v9328_v6 }
 0x19f   : > { %1718 = vmatprep.subr.mxu1 %v1717_v24  ;;  %1830 = vmatprep.subr.mxu0 %v1714_v35  ;;  %v7239_v35 = vpop.permute.xlu0 %1520 }
 0x1a0   : > { %1724 = vmatpush1.msra.mxu1 %v1723_v37  ;;  %1833 = vmatpush1.msra.mxu0 %v7082_v20 }
 0x1a1   : > { %1636 = vmatmul.mubr.f32.gmra.mxu0 %v1635_v55  ;;  %1759 = vmatmul.mubr.f32.vlgmr.msra.gmra.mxu1 %v7056_v43 }
 0x1a2   : > { %1924 = vmatprep.subr.mxu1 %v6515_v48  ;;  %2035 = vmatprep.subr.mxu0 %v1679_v58 }
 0x1a3   : > { %1926 = vmatpush1.msra.mxu1 %v6511_v11  ;;  %1641 = vmatprep.mubr.f32.mxu0 %v9328_v6  ;;  %v1511_v24 = vpop.permute.xlu0 %1510 }
 0x1a4   : > { %1928 = vmatprep.subr.mxu1 %v7003_v42  ;;  %1764 = vmatprep.mubr.f32.mxu1 %v9328_v6 }
 0x1a5   : > { %1930 = vmatpush1.msra.mxu1 %v6973_v14  ;;  %1647 = vmatmul.mubr.f32.gmra.mxu0 %v1646_v38 }
 0x1a6   : > { %1766 = vmatmul.mubr.f32.gmra.mxu1 %v7062_v63  ;;  %1932 = vmatprep.subr.mxu1 %v6978_v28 }
 0x1a7   : > { %1934 = vmatpush1.msra.mxu1 %v6975_v10  ;;  %1771 = vmatprep.mubr.f32.mxu1 %v9328_v6 }
 0x1a8   : > { %1936 = vmatprep.subr.mxu1 %v7097_v8  ;;  %1866 = vmatprep.mubr.f32.mxu0 %v9328_v6 }
 0x1a9   : > { %1938 = vmatpush1.msra.mxu1 %v7071_v15  ;;  %1869 = vmatmul.mubr.f32.vlgmr.msra.gmra.mxu0 %v7065_v17  ;;  %v7221_v17 = vpop.permute.xlu1 %1515 }
 0x1aa   : > { %1773 = vmatmul.mubr.f32.gmra.mxu1 %v7077_v27  ;;  %2039 = vmatpush1.msra.mxu0 %v1685_v51 }
 0x1ab   : > { %2150 = vmatprep.subr.mxu1 %v6515_v48  ;;  %2043 = vmatprep.subr.mxu0 %v1691_v5 }
 0x1ac   : > { %2047 = vmatpush1.msra.mxu0 %v1697_v46  ;;  %1778 = vmatprep.mubr.f32.mxu1 %v9328_v6 }
 0x1ad   : > { %1874 = vmatprep.mubr.f32.mxu0 %v9328_v6  ;;  %2051 = vmatprep.subr.mxu0 %v1703_v56  ;;  %v1506_v47 = vpop.permute.xlu1 %1505 }
 0x1ae   : > { %1780 = vmatmul.mubr.f32.gmra.mxu1 %v7091_v1  ;;  %1877 = vmatmul.mubr.f32.gmra.mxu0 %v7074_v54 }
 0x1af   : > { %2055 = vmatpush1.msra.mxu0 %v1709_v31  ;;  %1882 = vmatprep.mubr.f32.mxu0 %v9328_v6 }
 0x1b0   : > { %2059 = vmatprep.subr.mxu0 %v1715_v26  ;;  %1971 = vmatprep.mubr.f32.mxu1 %v9328_v6 }
 0x1b1   : > { %2063 = vmatpush1.msra.mxu0 %v1721_v23 }
 0x1b2   : > { %1885 = vmatmul.mubr.f32.gmra.mxu0 %v7089_v4  ;;  %1975 = vmatmul.mubr.f32.vlgmr.msra.gmra.mxu1 %v1611_v29 }
 0x1b3   : > { %2152 = vmatpush1.msra.mxu1 %v6511_v11  ;;  %1890 = vmatprep.mubr.f32.mxu0 %v9328_v6 }
 0x1b4   : > { %2154 = vmatprep.subr.mxu1 %v7003_v42  ;;  %1980 = vmatprep.mubr.f32.mxu1 %v9328_v6 }
 0x1b5   : > { %2156 = vmatpush1.msra.mxu1 %v6973_v14 }
 0x1b6   : > { %2158 = vmatprep.subr.mxu1 %v6978_v28  ;;  %1893 = vmatmul.mubr.f32.gmra.mxu0 %v7101_v59 }
 0x1b7   : > { %1984 = vmatmul.mubr.f32.gmra.mxu1 %v1622_v34  ;;  %2096 = vmatprep.mubr.f32.mxu0 %v9328_v6 }
 0x1b8   : > { %2160 = vmatpush1.msra.mxu1 %v6975_v10  ;;  %1989 = vmatprep.mubr.f32.mxu1 %v9328_v6 }
 0x1b9   : > { %2162 = vmatprep.subr.mxu1 %v7097_v8 }
 0x1ba   : > { %2164 = vmatpush1.msra.mxu1 %v7071_v15  ;;  %2098 = vmatmul.mubr.f32.vlgmr.msra.gmra.mxu0 %v7056_v43 }
 0x1bb   : > { %1993 = vmatmul.mubr.f32.gmra.mxu1 %v1633_v45  ;;  %2103 = vmatprep.mubr.f32.mxu0 %v9328_v6 }
 0x1bc   : > { %1998 = vmatprep.mubr.f32.mxu1 %v9328_v6 }
 0x1be   : > { %2105 = vmatmul.mubr.f32.gmra.mxu0 %v7062_v63 }
 0x1bf   : > { %2002 = vmatmul.mubr.f32.gmra.mxu1 %v1644_v13  ;;  %2110 = vmatprep.mubr.f32.mxu0 %v9328_v6 }
 0x1c0   : > { %2197 = vmatprep.mubr.f32.mxu1 %v9328_v6 }
 0x1c2   : > { %2112 = vmatmul.mubr.f32.gmra.mxu0 %v7077_v27 }
 0x1c3   : > { %2199 = vmatmul.mubr.f32.vlgmr.msra.gmra.mxu1 %v7056_v43  ;;  %2117 = vmatprep.mubr.f32.mxu0 %v9328_v6 }
 0x1c4   : > { %2204 = vmatprep.mubr.f32.mxu1 %v9328_v6 }
 0x1c6   : > { %2119 = vmatmul.mubr.f32.gmra.mxu0 %v7091_v1 }
 0x1c7   : > { %2206 = vmatmul.mubr.f32.gmra.mxu1 %v7062_v63  ;;  %3202 = vmatprep.mubr.f32.mxu0 %v9328_v6 }
 0x1c8   : > { %2211 = vmatprep.mubr.f32.mxu1 %v9328_v6 }
 0x1cb   : > { %2213 = vmatmul.mubr.f32.gmra.mxu1 %v7077_v27 }
 0x1cc   : > { %2218 = vmatprep.mubr.f32.mxu1 %v9328_v6 }
 0x1cf   : > { %2220 = vmatmul.mubr.f32.gmra.mxu1 %v7091_v1 }
 0x1d0   : > { %3351 = vmatprep.mubr.f32.mxu1 %v9328_v6 }
 0x259   : > { %v1615_v11 = vpop.f32.mrf.mxu0 }
 0x25a   : > { %v1616_v61 = vadd.f32 %v1615_v11, %v1506_v47 }
 0x25b   : > { %v1617_v48 = vpop.f32.mrf.mxu0 }
 0x25c   : > { %v1618_v34 = vadd.f32 %v1617_v48, %v1506_v47 }
 0x25d   : > { %v1626_v33 = vpop.f32.mrf.mxu0 }
 0x25e   : > { %v1627_v18 = vadd.f32 %v1626_v33, %v1511_v24 }
 0x25f   : > { %v7201_v25 = vpop.f32.mrf.mxu0 }
 0x260   : > { %v1629_v33 = vadd.f32 %v7201_v25, %v1511_v24  ;;  %v9397_v24 = vmov 1326507024  }
 0x261   : > { %v7203_v58 = vpop.f32.mrf.mxu0  ;;  %v1760_v51 = vpop.f32.mrf.mxu1 }
 0x262   : > { %v1761_v39 = vadd.f32 %v1760_v51, %v1616_v61 }
 0x263   : > { %v7205_v14 = vpop.f32.mrf.mxu0  ;;  %v1762_v10 = vpop.f32.mrf.mxu1 }
 0x264   : > { %v1763_v1 = vadd.f32 %v1762_v10, %v1618_v34 }
 0x265   : > { %v7207_v28 = vpop.f32.mrf.mxu0 }
 0x266   : > { %v1767_v50 = vpop.f32.mrf.mxu1 }
 0x267   : > { %v7209_v3 = vpop.f32.mrf.mxu0  ;;  %v1768_v11 = vadd.f32 %v1767_v50, %v1627_v18 }
 0x268   : > { %v7211_v2 = vpop.f32.mrf.mxu1 }
 0x269   : > { %v1870_v46 = vpop.f32.mrf.mxu0 }
 0x26a   : > { %v7213_v42 = vpop.f32.mrf.mxu1  ;;  %v1871_v49 = vadd.f32 %v1870_v46, %v1761_v39 }
 0x26b   : > { %v1872_v56 = vpop.f32.mrf.mxu0 }
 0x26c   : > { %v7215_v36 = vpop.f32.mrf.mxu1  ;;  %v1873_v30 = vadd.f32 %v1872_v56, %v1763_v1 }
 0x26e   : > { %v7217_v31 = vpop.f32.mrf.mxu1  ;;  %v1878_v5 = vpop.f32.mrf.mxu0 }
 0x26f   : > { %v1879_v10 = vadd.f32 %v1878_v5, %v1768_v11  ;;  %v1770_v5 = vadd.f32 %v7211_v2, %v1629_v33 }
 0x270   : > { %v7219_v43 = vpop.f32.mrf.mxu1  ;;  %v1880_v63 = vpop.f32.mrf.mxu0 }
 0x272   : > { %v7223_v15 = vpop.f32.mrf.mxu0  ;;  %v1976_v54 = vpop.f32.mrf.mxu1 }
 0x273   : > { %v1977_v23 = vadd.f32 %v1976_v54, %v1871_v49 }
 0x274   : > { %v7225_v44 = vpop.f32.mrf.mxu0  ;;  %v1978_v52 = vpop.f32.mrf.mxu1 }
 0x275   : > { %v1979_v45 = vadd.f32 %v1978_v52, %v1873_v30 }
 0x276   : > { %v7227_v29 = vpop.f32.mrf.mxu0 }
 0x277   : > { %v1985_v27 = vpop.f32.mrf.mxu1 }
 0x278   : > { %v7229_v22 = vpop.f32.mrf.mxu0  ;;  %v1986_v56 = vadd.f32 %v1985_v27, %v1879_v10 }
 0x279   : > { %v1987_v57 = vpop.f32.mrf.mxu1 }
 0x27a   : > { %v2099_v19 = vpop.f32.mrf.mxu0 }
 0x27b   : > { %v7231_v20 = vpop.f32.mrf.mxu1  ;;  %v2100_v59 = vadd.f32 %v2099_v19, %v1977_v23  ;;  %v1881_v23 = vadd.f32 %v1880_v63, %v1770_v5 }
 0x27c   : > { %v2101_v8 = vpop.f32.mrf.mxu0 }
 0x27d   : > { %v7233_v4 = vpop.f32.mrf.mxu1  ;;  %v2102_v21 = vadd.f32 %v2101_v8, %v1979_v45 }
 0x27e   : > { %v2106_v46 = vpop.f32.mrf.mxu0 }
 0x27f   : > { %v7235_v40 = vpop.f32.mrf.mxu1  ;;  %v2107_v47 = vadd.f32 %v2106_v46, %v1986_v56 }
 0x281   : > { %v7237_v62 = vpop.f32.mrf.mxu1 }
 0x283   : > { %v2200_v12 = vpop.f32.mrf.mxu1 }
 0x284   : > { %v7241_v26 = vadd.f32 %v2200_v12, %v2100_v59  ;;  %v1988_v59 = vadd.f32 %v1987_v57, %v1881_v23 }
 0x285   : > { %v2202_v0 = vpop.f32.mrf.mxu1 }
 0x286   : > { %9394 = vst [vmem:[#allocation9_spill] sm:$0xff] %v7241_v26  ;;  %v2229_v13 = vand.u32 2139095040, %v7241_v26  ;;  %v7244_v41 = vadd.f32 %v2202_v0, %v2102_v21  ;;  %v9331_v50 = vand.u32 2147483647, %v7241_v26 }
 0x287   : > { %v2207_v52 = vpop.f32.mrf.mxu1 }
 0x288   : > { %9395 = vst [vmem:[#allocation10_spill] sm:$0xff] %v7244_v41  ;;  %v2230_v37 = vshrl.u32 %v2229_v13, 23  ;;  %v2333_v55 = vand.u32 2139095040, %v7244_v41  ;;  %v7247_v34 = vadd.f32 %v2207_v52, %v2107_v47  ;;  %v2233_v8 = vand.u32 8388607, %v9331_v50  ;;  %v2108_v13 = vpop.f32.mrf.mxu0 }
 0x289   : > { %v9330_v57 = vand.u32 2147483647, %v7244_v41  ;;  %v2209_v56 = vpop.f32.mrf.mxu1 }
 0x28a   : > { %v5431_v38 = vadd.s32 4294967169, %v2230_v37  ;;  %v2334_v51 = vshrl.u32 %v2333_v55, 23  ;;  %9396 = vst [vmem:[#allocation11_spill] sm:$0xff] %v7247_v34  ;;  %v2437_v1 = vand.u32 2139095040, %v7247_v34  ;;  %v2234_v18 = vor.u32 8388608, %v2233_v8 }
 0x28c   : > { %v2236_v48 = vadd.s32 1, %v5431_v38  ;;  %v5435_v54 = vadd.s32 4294967169, %v2334_v51  ;;  %v2438_v30 = vshrl.u32 %v2437_v1, 23  ;;  %v7286_v5 = vshll.u32 %v2234_v18, 8 }
 0x28e   : > { %vm2237_vm9 = vcmp.gt.s32.totalorder %v2236_v48, 0  ;;  %v2340_v39 = vadd.s32 1, %v5435_v54  ;;  %v5439_v2 = vadd.s32 4294967169, %v2438_v30  ;;  %v2109_v54 = vadd.f32 %v2108_v13, %v1988_v59 }
 0x28f   : > { %v2238_v61 = vsel %vm2237_vm9, %v2236_v48, 0 }
 0x290   : > { %v2240_v19 = vand.u32 31, %v2238_v61  ;;  %vm2341_vm11 = vcmp.gt.s32.totalorder %v2340_v39, 0  ;;  %v7264_v37 = vshrl.u32 %v2238_v61, 5  ;;  %v2444_v61 = vadd.s32 1, %v5439_v2 }
 0x291   : > { %v2342_v27 = vsel %vm2341_vm11, %v2340_v39, 0  ;;  %v7290_v30 = vadd.f32 %v2209_v56, %v2109_v54 }
 0x292   : > { %v7252_v49 = vsub.s32 32, %v2240_v19  ;;  %v2344_v12 = vand.u32 31, %v2342_v27  ;;  %v2252_v0 = vshll.u32 %v9340_v60, %v2240_v19  ;;  %v2243_v38 = vshll.u32 %v9333_v7, %v2240_v19 }
 0x293   : > { %v2246_v11 = vshll.u32 %v9352_v9, %v2240_v19  ;;  %v2249_v51 = vshll.u32 %v9350_v16, %v2240_v19  ;;  %v2255_v10 = vshll.u32 %v9342_v53, %v2240_v19  ;;  %vm2261_vm12 = vcmp.lt.s32.totalorder %v7264_v37, 4 }
 0x294   : > { %v2253_v45 = vshrl.u32 %v9342_v53, %v7252_v49  ;;  %v2244_v25 = vshrl.u32 %v9352_v9, %v7252_v49  ;;  %v2247_v21 = vshrl.u32 %v9350_v16, %v7252_v49  ;;  %v2250_v63 = vshrl.u32 %v9340_v60, %v7252_v49 }
 0x295   : > { %v2256_v55 = vshrl.u32 %v9397_v24, %v7252_v49  ;;  %v7275_v46 = vsub.s32 32, %v2344_v12  ;;  %v2337_v19 = vand.u32 8388607, %v9330_v57  ;;  %vm2258_vm13 = vcmp.lt.s32.totalorder %v7264_v37, 1 }
 0x296   : > { %v2254_v48 = vor.u32 %v2253_v45, %v2252_v0  ;;  %v7277_v52 = vor.u32 %v2244_v25, %v2243_v38  ;;  %v7279_v47 = vor.u32 %v2247_v21, %v2246_v11  ;;  %v7281_v39 = vor.u32 %v2250_v63, %v2249_v51 }
 0x297   : > { %v2257_v1 = vor.u32 %v2256_v55, %v2255_v10  ;;  %vm2260_vm10 = vcmp.lt.s32.totalorder %v7264_v37, 3  ;;  %v2357_v23 = vshrl.u32 %v9342_v53, %v7275_v46  ;;  %vm2445_vm14 = vcmp.gt.s32.totalorder %v2444_v61, 0 }
 0x298   : > { %v2267_v33 = vsel %vm2261_vm12, %v2254_v48, 920167782  ;;  %v2266_v8 = vsel %vm2258_vm13, %v7277_v52, %v7279_v47  ;;  %v7300_v45 = vshrl.u32 %v2342_v27, 5  ;;  %v2360_v59 = vshrl.u32 %v9397_v24, %v7275_v46 }
 0x299   : > { %v2446_v25 = vsel %vm2445_vm14, %v2444_v61, 0  ;;  %v2268_v21 = vsel %vm2260_vm10, %v7281_v39, %v2267_v33  ;;  %v2271_v0 = vsel %vm2261_vm12, %v2257_v1, 1326507024  ;;  %v2356_v2 = vshll.u32 %v9340_v60, %v2344_v12 }
 0x29a   : > { %v2448_v13 = vand.u32 31, %v2446_v25  ;;  %v2348_v63 = vshrl.u32 %v9352_v9, %v7275_v46  ;;  %v2351_v27 = vshrl.u32 %v9350_v16, %v7275_v46  ;;  %v2354_v55 = vshrl.u32 %v9340_v60, %v7275_v46 }
 0x29b   : > { %v2359_v18 = vshll.u32 %v9342_v53, %v2344_v12  ;;  %vm2259_vm15 = vcmp.lt.s32.totalorder %v7264_v37, 2  ;;  %v2338_v38 = vor.u32 8388608, %v2337_v19  ;;  %v2358_v11 = vor.u32 %v2357_v23, %v2356_v2 }
 0x29c   : > { %v9332_v51 = vand.u32 2147483647, %v7247_v34  ;;  %v2347_v10 = vshll.u32 %v9333_v7, %v2344_v12  ;;  %v2350_v56 = vshll.u32 %v9352_v9, %v2344_v12  ;;  %v2353_v54 = vshll.u32 %v9350_v16, %v2344_v12 }
 0x29d   : > { %v2361_v61 = vor.u32 %v2360_v59, %v2359_v18  ;;  %v2269_v1 = vsel %vm2259_vm15, %v2266_v8, %v2268_v21  ;;  %v2270_v33 = vsel %vm2258_vm13, %v7279_v47, %v7281_v39  ;;  %v2272_v19 = vsel %vm2260_vm10, %v2254_v48, %v2271_v0 }
 0x29e   : > { %v7330_v23 = vsub.s32 32, %v2448_v13  ;;  %v7332_v2 = vor.u32 %v2348_v63, %v2347_v10  ;;  %v7334_v6 = vor.u32 %v2351_v27, %v2350_v56  ;;  %v7336_v57 = vor.u32 %v2354_v55, %v2353_v54 }
 0x29f   : > { %vm2365_vm0 = vcmp.lt.s32.totalorder %v7300_v45, 4  ;;  %v7341_v8 = vshll.u32 %v2338_v38, 8  ;;  %v7345_v59 = vand.u32 8388607, %v9332_v51  ;;  %v2541_v48 = vand.u32 2139095040, %v7290_v30 }
 0x2a0   : > { %v2371_v12 = vsel %vm2365_vm0, %v2358_v11, 920167782  ;;  %v2242_v21 = vshrl.u32 %v9333_v7, %v7252_v49  ;;  %v7351_v0 = vmul.u32.u64.low %v7286_v5, %v2269_v1  ;;  %v7352_v63 = vmul.u32.u64.high %v7286_v5, %v2269_v1, %v7351_v0 }
 0x2a1   : > { %v2375_v27 = vsel %vm2365_vm0, %v2361_v61, 1326507024  ;;  %v2273_v55 = vsel %vm2259_vm15, %v2270_v33, %v2272_v19  ;;  %vm2362_vm1 = vcmp.lt.s32.totalorder %v7300_v45, 1  ;;  %vm2364_vm3 = vcmp.lt.s32.totalorder %v7300_v45, 3 }
 0x2a2   : > { %v2461_v18 = vshrl.u32 %v9342_v53, %v7330_v23  ;;  %v2370_v49 = vsel %vm2362_vm1, %v7332_v2, %v7334_v6  ;;  %v2372_v38 = vsel %vm2364_vm3, %v7336_v57, %v2371_v12  ;;  %v2374_v10 = vsel %vm2362_vm1, %v7334_v6, %v7336_v57 }
 0x2a3   : > { %v2464_v56 = vshrl.u32 %v9397_v24, %v7330_v23  ;;  %v2376_v54 = vsel %vm2364_vm3, %v2358_v11, %v2375_v27  ;;  %v7378_v61 = vshrl.u32 %v2446_v25, 5  ;;  %v2460_v1 = vshll.u32 %v9340_v60, %v2448_v13 }
 0x2a4   : > { %v2542_v33 = vshrl.u32 %v2541_v48, 23  ;;  %v2452_v19 = vshrl.u32 %v9352_v9, %v7330_v23  ;;  %v2455_v12 = vshrl.u32 %v9350_v16, %v7330_v23  ;;  %v2458_v50 = vshrl.u32 %v9340_v60, %v7330_v23 }
 0x2a5   : > { %v2463_v51 = vshll.u32 %v9342_v53, %v2448_v13  ;;  %v7389_v7 = vmul.u32.u64.low %v7286_v5, %v2273_v55  ;;  %v7390_v32 = vmul.u32.u64.high %v7286_v5, %v2273_v55, %v7389_v7  ;;  %vm2363_vm4 = vcmp.lt.s32.totalorder %v7300_v45, 2 }
 0x2a6   : > { %v2462_v25 = vor.u32 %v2461_v18, %v2460_v1  ;;  %v9398_v11 = vmov 683565275   ;;  %v2454_v27 = vshll.u32 %v9352_v9, %v2448_v13  ;;  %v2457_v41 = vshll.u32 %v9350_v16, %v2448_v13 }
 0x2a7   : > { %v2451_v48 = vshll.u32 %v9398_v11, %v2448_v13  ;;  %v2465_v34 = vor.u32 %v2464_v56, %v2463_v51  ;;  %v2263_v60 = vsel %vm2261_vm12, %v7281_v39, 2102212464  ;;  %v2373_v53 = vsel %vm2363_vm4, %v2370_v49, %v2372_v38 }
 0x2a8   : > { %v2377_v7 = vsel %vm2363_vm4, %v2374_v10, %v2376_v54  ;;  %v5443_v55 = vadd.s32 4294967169, %v2542_v33  ;;  %v7403_v18 = vor.u32 %v2455_v12, %v2454_v27  ;;  %v2459_v1 = vor.u32 %v2458_v50, %v2457_v41 }
 0x2a9   : > { %v2453_v26 = vor.u32 %v2452_v19, %v2451_v48  ;;  %vm2469_vm5 = vcmp.lt.s32.totalorder %v7378_v61, 4  ;;  %v1638_v13 = vadd.f32 %v7203_v58, %v7221_v17  ;;  %v2262_v39 = vsel %vm2258_vm13, %v2242_v21, %v7277_v52 }
 0x2aa   : > { %v2442_v51 = vor.u32 8388608, %v7345_v59  ;;  %v2475_v49 = vsel %vm2469_vm5, %v2462_v25, 920167782  ;;  %v2264_v38 = vsel %vm2260_vm10, %v7279_v47, %v2263_v60  ;;  %v2479_v58 = vsel %vm2469_vm5, %v2465_v34, 1326507024 }
 0x2ab   : > { %v7418_v41 = vmul.u32.u64.low %v7341_v8, %v2373_v53  ;;  %v7419_v50 = vmul.u32.u64.high %v7341_v8, %v2373_v53, %v7418_v41  ;;  %v7425_v10 = vmul.u32.u64.low %v7341_v8, %v2377_v7  ;;  %v7426_v52 = vmul.u32.u64.high %v7341_v8, %v2377_v7, %v7425_v10  ;;  %v2113_v7 = vpop.f32.mrf.mxu0 }
 0x2ac   : > { %vm2466_vm6 = vcmp.lt.s32.totalorder %v7378_v61, 1  ;;  %vm2468_vm7 = vcmp.lt.s32.totalorder %v7378_v61, 3  ;;  %v2284_v59 = vadd.s32 1, %v7352_v63  ;;  %v2548_v47 = vadd.s32 1, %v5443_v55 }
 0x2ad   : > { %v2474_v60 = vsel %vm2466_vm6, %v2453_v26, %v7403_v18  ;;  %v2476_v53 = vsel %vm2468_vm7, %v2459_v1, %v2475_v49  ;;  %v1775_v34 = vadd.f32 %v7213_v42, %v1638_v13  ;;  %vm2283_vm8 = vc.u32 %v7390_v32, %v7351_v0 }
 0x2ae   : > { %v2478_v21 = vsel %vm2466_vm6, %v7403_v18, %v2459_v1  ;;  %v2480_v56 = vsel %vm2468_vm7, %v2462_v25, %v2479_v58  ;;  %v2265_v54 = vsel %vm2259_vm15, %v2262_v39, %v2264_v38  ;;  %vm2467_vm9 = vcmp.lt.s32.totalorder %v7378_v61, 2 }
 0x2af   : > { %vm2549_vm11 = vcmp.gt.s32.totalorder %v2548_v47, 0  ;;  %v1887_v33 = vadd.f32 %v7223_v15, %v1775_v34  ;;  %v2477_v42 = vsel %vm2467_vm9, %v2474_v60, %v2476_v53  ;;  %v2285_v12 = vsel %vm2283_vm8, %v2284_v59, %v7352_v63 }
 0x2b0   : > { %v2550_v19 = vsel %vm2549_vm11, %v2548_v47, 0  ;;  %v2481_v48 = vsel %vm2467_vm9, %v2478_v21, %v2480_v56  ;;  %v7453_v27 = vshll.u32 %v2442_v51, 8  ;;  %v2281_v55 = vmul.u32 %v7286_v5, %v2265_v54 }
 0x2b1   : > { %v2552_v25 = vand.u32 31, %v2550_v19  ;;  %v1995_v37 = vadd.f32 %v7231_v20, %v1887_v33  ;;  %v2367_v15 = vsel %vm2365_vm0, %v7336_v57, 2102212464  ;;  %v9349_v13 = vand.u32 2147483647, %v7290_v30  ;;  %v2214_v57 = vpop.f32.mrf.mxu1 }
 0x2b2   : > { %v2346_v63 = vshrl.u32 %v9398_v11, %v7275_v46  ;;  %v7464_v39 = vmul.u32.u64.low %v7453_v27, %v2477_v42  ;;  %v7465_v49 = vmul.u32.u64.high %v7453_v27, %v2477_v42, %v7464_v39  ;;  %v7470_v20 = vadd.s32 %v2285_v12, %v2281_v55 }
 0x2b3   : > { %v7468_v51 = vsub.s32 32, %v2552_v25  ;;  %v2388_v5 = vadd.s32 1, %v7419_v50  ;;  %v7474_v38 = vmul.u32.u64.low %v7453_v27, %v2481_v48  ;;  %v7475_v58 = vmul.u32.u64.high %v7453_v27, %v2481_v48, %v7474_v38 }
 0x2b4   : > { %v2114_v10 = vadd.f32 %v2113_v7, %v1995_v37  ;;  %v2366_v46 = vsel %vm2362_vm1, %v2346_v63, %v7332_v2  ;;  %v2368_v59 = vsel %vm2364_vm3, %v7334_v6, %v2367_v15  ;;  %vm2387_vm12 = vc.u32 %v7426_v52, %v7418_v41 }
 0x2b5   : > { %v2450_v60 = vshrl.u32 %v9398_v11, %v7330_v23  ;;  %v2471_v53 = vsel %vm2469_vm5, %v2459_v1, 2102212464  ;;  %v2545_v47 = vand.u32 8388607, %v9349_v13  ;;  %v2556_v34 = vshrl.u32 %v9352_v9, %v7468_v51 }
 0x2b6   : > { %v2559_v2 = vshrl.u32 %v9350_v16, %v7468_v51  ;;  %v7495_v21 = vadd.f32 %v2214_v57, %v2114_v10  ;;  %v2287_v6 = vadd.s32 536870912, %v7470_v20  ;;  %v2369_v56 = vsel %vm2363_vm4, %v2366_v46, %v2368_v59 }
 0x2b7   : > { %v2389_v23 = vsel %vm2387_vm12, %v2388_v5, %v7419_v50  ;;  %v2470_v1 = vsel %vm2466_vm6, %v2450_v60, %v2453_v26  ;;  %v2472_v54 = vsel %vm2468_vm7, %v7403_v18, %v2471_v53  ;;  %v2555_v33 = vshll.u32 %v9398_v11, %v2552_v25 }
 0x2b8   : > { %v2558_v42 = vshll.u32 %v9352_v9, %v2552_v25  ;;  %v9399_v12 = vmov 2102212464   ;;  %v2551_v37 = vshrl.u32 %v2550_v19, 5  ;;  %v9400_v7 = vmov 920167782  }
 0x2b9   : > { %v2562_v48 = vshrl.u32 %v9399_v12, %v7468_v51  ;;  %v2564_v45 = vshll.u32 %v9399_v12, %v2552_v25  ;;  %v2565_v50 = vshrl.u32 %v9400_v7, %v7468_v51  ;;  %v2568_v26 = vshrl.u32 %v9397_v24, %v7468_v51 }
 0x2ba   : > { %v2492_v55 = vadd.s32 1, %v7465_v49  ;;  %v2557_v15 = vor.u32 %v2556_v34, %v2555_v33  ;;  %v2560_v18 = vor.u32 %v2559_v2, %v2558_v42  ;;  %v2561_v63 = vshll.u32 %v9350_v16, %v2552_v25 }
 0x2bb   : > { %v2385_v5 = vmul.u32 %v7341_v8, %v2369_v56  ;;  %vm2491_vm13 = vc.u32 %v7475_v58, %v7464_v39  ;;  %v2566_v19 = vor.u32 %v2565_v50, %v2564_v45  ;;  %v2567_v38 = vshll.u32 %v9400_v7, %v2552_v25 }
 0x2bc   : > { %v7521_v57 = vshrl.u32 %v2287_v6, 30  ;;  %v2473_v10 = vsel %vm2467_vm9, %v2470_v1, %v2472_v54  ;;  %v2563_v46 = vor.u32 %v2562_v48, %v2561_v63  ;;  %v2546_v60 = vor.u32 8388608, %v2545_v47 }
 0x2bd   : > { %v7525_v59 = vadd.s32 %v2389_v23, %v2385_v5  ;;  %v2569_v53 = vor.u32 %v2568_v26, %v2567_v38  ;;  %vm2570_vm10 = vcmp.lt.s32.totalorder %v2551_v37, 1  ;;  %v2493_v34 = vsel %vm2491_vm13, %v2492_v55, %v7465_v49 }
 0x2be   : > { %vm2573_vm14 = vcmp.lt.s32.totalorder %v2551_v37, 4  ;;  %v2578_v8 = vsel %vm2570_vm10, %v2557_v15, %v2560_v18  ;;  %v2645_v2 = vand.u32 2139095040, %v7495_v21  ;;  %v2489_v25 = vmul.u32 %v7453_v27, %v2473_v10 }
 0x2bf   : > { %vm2572_vm15 = vcmp.lt.s32.totalorder %v2551_v37, 3  ;;  %v2579_v6 = vsel %vm2573_vm14, %v2566_v19, 920167782  ;;  %v2289_v61 = vshll.u32 %v7521_v57, 30  ;;  %vm2571_vm0 = vcmp.lt.s32.totalorder %v2551_v37, 2 }
 0x2c0   : > { %v2580_v56 = vsel %vm2572_vm15, %v2563_v46, %v2579_v6  ;;  %v2582_v47 = vsel %vm2570_vm10, %v2560_v18, %v2563_v46  ;;  %v2494_v23 = vadd.s32 %v2493_v34, %v2489_v25  ;;  %v2583_v49 = vsel %vm2573_vm14, %v2569_v53, 1326507024 }
 0x2c1   : > { %v2581_v1 = vsel %vm2571_vm0, %v2578_v8, %v2580_v56  ;;  %v2586_v54 = vshll.u32 %v2546_v60, 8  ;;  %v2391_v33 = vadd.s32 536870912, %v7525_v59  ;;  %v2575_v42 = vsel %vm2573_vm14, %v2563_v46, 2102212464 }
 0x2c2   : > { %v2584_v48 = vsel %vm2572_vm15, %v2566_v19, %v2583_v49  ;;  %v2646_v27 = vshrl.u32 %v2645_v2, 23  ;;  %v2554_v45 = vshrl.u32 %v9398_v11, %v7468_v51  ;;  %v1640_v63 = vadd.f32 %v7205_v14, %v7221_v17 }
 0x2c3   : > { %v2585_v50 = vsel %vm2571_vm0, %v2582_v47, %v2584_v48  ;;  %v7540_v26 = vmul.u32.u64.low %v2586_v54, %v2581_v1  ;;  %v7541_v55 = vmul.u32.u64.high %v2586_v54, %v2581_v1, %v7540_v26  ;;  %v1649_v19 = vadd.f32 %v7207_v28, %v7239_v35  ;;  %v2216_v1 = vpop.f32.mrf.mxu1 }
 0x2c4   : > { %v7546_v5 = vmul.u32.u64.low %v2586_v54, %v2585_v50  ;;  %v7547_v38 = vmul.u32.u64.high %v2586_v54, %v2585_v50, %v7546_v5  ;;  %v5447_v10 = vadd.s32 4294967169, %v2646_v27  ;;  %v2495_v46 = vadd.s32 536870912, %v2494_v23 }
 0x2c5   : > { %v2574_v60 = vsel %vm2570_vm10, %v2554_v45, %v2557_v15  ;;  %v2576_v51 = vsel %vm2572_vm15, %v2560_v18, %v2575_v42  ;;  %v1777_v53 = vadd.f32 %v7215_v36, %v1640_v63  ;;  %v7555_v34 = vsub.s32 %v7470_v20, %v2289_v61  ;;  %v2115_v15 = vpop.f32.mrf.mxu0 }
 0x2c6   : > { %v7557_v8 = vshrl.u32 %v2391_v33, 30  ;;  %v2652_v14 = vadd.s32 1, %v5447_v10  ;;  %v2596_v17 = vadd.s32 1, %v7541_v55  ;;  %v1782_v2 = vadd.f32 %v7217_v31, %v1649_v19 }
 0x2c7   : > { %v1889_v25 = vadd.f32 %v7225_v44, %v1777_v53  ;;  %v2577_v28 = vsel %vm2571_vm0, %v2574_v60, %v2576_v51  ;;  %v7563_v6 = vshrl.u32 %v2495_v46, 30  ;;  %vm2595_vm1 = vc.u32 %v7547_v38, %v7540_v26  ;;  %v2120_v19 = vpop.f32.mrf.mxu0 }
 0x2c8   : > { %v9347_v36 = vand.u32 2147483647, %v7495_v21  ;;  %vm2653_vm3 = vcmp.gt.s32.totalorder %v2652_v14, 0  ;;  %v2292_v20 = vsub.s32 0, %v7555_v34  ;;  %v2393_v18 = vshll.u32 %v7557_v8, 30 }
 0x2c9   : > { %v2597_v61 = vsel %vm2595_vm1, %v2596_v17, %v7541_v55  ;;  %v2654_v31 = vsel %vm2653_vm3, %v2652_v14, 0  ;;  %v1997_v44 = vadd.f32 %v7233_v4, %v1889_v25  ;;  %v2593_v37 = vmul.u32 %v2586_v54, %v2577_v28 }
 0x2ca   : > { %v2656_v56 = vand.u32 31, %v2654_v31  ;;  %v1895_v47 = vadd.f32 %v7227_v29, %v1782_v2  ;;  %v2497_v33 = vshll.u32 %v7563_v6, 30  ;;  %v5432_v45 = vmin.u32 %v2292_v20, %v7555_v34 }
 0x2cb   : > { %v2116_v49 = vadd.f32 %v2115_v15, %v1997_v44  ;;  %v7574_v42 = vadd.s32 %v2597_v61, %v2593_v37  ;;  %v7579_v50 = vsub.s32 %v7525_v59, %v2393_v18  ;;  %v2649_v4 = vand.u32 8388607, %v9347_v36 }
 0x2cc   : > { %v2657_v48 = vsub.s32 32, %v2656_v56  ;;  %v2004_v27 = vadd.f32 %v7235_v40, %v1895_v47  ;;  %v2659_v54 = vshll.u32 %v9398_v11, %v2656_v56  ;;  %v2662_v5 = vshll.u32 %v9352_v9, %v2656_v56 }
 0x2cd   : > { %v7586_v63 = vadd.f32 %v2216_v1, %v2116_v49  ;;  %v2668_v10 = vshll.u32 %v9399_v12, %v2656_v56  ;;  %v7592_v46 = vsub.s32 %v2494_v23, %v2497_v33  ;;  %v2599_v60 = vadd.s32 536870912, %v7574_v42 }
 0x2ce   : > { %v2660_v29 = vshrl.u32 %v9352_v9, %v2657_v48  ;;  %v2663_v55 = vshrl.u32 %v9350_v16, %v2657_v48  ;;  %v2666_v40 = vshrl.u32 %v9399_v12, %v2657_v48  ;;  %v2669_v59 = vshrl.u32 %v9400_v7, %v2657_v48 }
 0x2cf   : > { %v2655_v51 = vshrl.u32 %v2654_v31, 5  ;;  %v2665_v53 = vshll.u32 %v9350_v16, %v2656_v56  ;;  %v2672_v25 = vshrl.u32 %v9397_v24, %v2657_v48  ;;  %v2671_v20 = vshll.u32 %v9400_v7, %v2656_v56 }
 0x2d0   : > { %v2661_v14 = vor.u32 %v2660_v29, %v2659_v54  ;;  %v2664_v17 = vor.u32 %v2663_v55, %v2662_v5  ;;  %v2670_v2 = vor.u32 %v2669_v59, %v2668_v10  ;;  %v2749_v15 = vand.u32 2139095040, %v7586_v63 }
 0x2d1   : > { %v2667_v28 = vor.u32 %v2666_v40, %v2665_v53  ;;  %v1651_v18 = vadd.f32 %v7209_v3, %v7239_v35  ;;  %v2294_v23 = vclz %v5432_v45  ;;  %v2121_v61 = vadd.f32 %v2120_v19, %v2004_v27 }
 0x2d2   : > { %v2650_v44 = vor.u32 8388608, %v2649_v4  ;;  %v7601_v37 = vshrl.u32 %v2599_v60, 30  ;;  %v2673_v31 = vor.u32 %v2672_v25, %v2671_v20  ;;  %vm2674_vm4 = vcmp.lt.s32.totalorder %v2655_v51, 1 }
 0x2d3   : > { %vm2677_vm5 = vcmp.lt.s32.totalorder %v2655_v51, 4  ;;  %v2396_v47 = vsub.s32 0, %v7579_v50  ;;  %v2500_v1 = vsub.s32 0, %v7592_v46  ;;  %v2682_v49 = vsel %vm2674_vm4, %v2661_v14, %v2664_v17 }
 0x2d4   : > { %v2683_v56 = vsel %vm2677_vm5, %v2670_v2, 920167782  ;;  %v2658_v33 = vshrl.u32 %v9398_v11, %v2657_v48  ;;  %vm2676_vm6 = vcmp.lt.s32.totalorder %v2655_v51, 3  ;;  %v2679_v3 = vsel %vm2677_vm5, %v2667_v28, 2102212464  ;;  %v2221_v48 = vpop.f32.mrf.mxu1 }
 0x2d5   : > { %v2750_v35 = vshrl.u32 %v2749_v15, 23  ;;  %vm2675_vm7 = vcmp.lt.s32.totalorder %v2655_v51, 2  ;;  %v2684_v27 = vsel %vm2676_vm6, %v2667_v28, %v2683_v56  ;;  %v2686_v45 = vsel %vm2674_vm4, %v2664_v17, %v2667_v28 }
 0x2d6   : > { %v2690_v4 = vshll.u32 %v2650_v44, 8  ;;  %v2601_v54 = vshll.u32 %v7601_v37, 30  ;;  %v2678_v29 = vsel %vm2674_vm4, %v2658_v33, %v2661_v14  ;;  %v2685_v55 = vsel %vm2675_vm7, %v2682_v49, %v2684_v27 }
 0x2d7   : > { %v2687_v5 = vsel %vm2677_vm5, %v2673_v31, 1326507024  ;;  %v2680_v40 = vsel %vm2676_vm6, %v2664_v17, %v2679_v3  ;;  %v5433_v60 = vadd.s32 4294967294, %v2294_v23  ;;  %v5436_v53 = vmin.u32 %v2396_v47, %v7579_v50 }
 0x2d8   : > { %v2688_v10 = vsel %vm2676_vm6, %v2670_v2, %v2687_v5  ;;  %v7611_v59 = vmul.u32.u64.low %v2690_v4, %v2685_v55  ;;  %v7612_v19 = vmul.u32.u64.high %v2690_v4, %v2685_v55, %v7611_v59  ;;  %v5451_v28 = vadd.s32 4294967169, %v2750_v35 }
 0x2d9   : > { %v2689_v25 = vsel %vm2675_vm7, %v2686_v45, %v2688_v10  ;;  %v1784_v20 = vadd.f32 %v7219_v43, %v1651_v18  ;;  %v5440_v14 = vmin.u32 %v2500_v1, %v7592_v46  ;;  %v7623_v17 = vsub.s32 %v7574_v42, %v2601_v54 }
 0x2da   : > { %v7619_v15 = vmul.u32.u64.low %v2690_v4, %v2689_v25  ;;  %v7620_v44 = vmul.u32.u64.high %v2690_v4, %v2689_v25, %v7619_v15  ;;  %v2681_v2 = vsel %vm2675_vm7, %v2678_v29, %v2680_v40  ;;  %v2756_v31 = vadd.s32 1, %v5451_v28 }
 0x2db   : > { %v7626_v49 = vadd.f32 %v2221_v48, %v2121_v61  ;;  %v2700_v23 = vadd.s32 1, %v7612_v19  ;;  %v1897_v47 = vadd.f32 %v7229_v22, %v1784_v20  ;;  %vm5434_vm8 = vcmp.lt.s32.totalorder %v5433_v60, 0 }
 0x2dc   : > { %v2398_v56 = vclz %v5436_v53  ;;  %vm2757_vm9 = vcmp.gt.s32.totalorder %v2756_v31, 0  ;;  %v2502_v43 = vclz %v5440_v14  ;;  %v2697_v18 = vmul.u32 %v2690_v4, %v2681_v2  ;;  %v2122_v53 = vpop.f32.mrf.mxu0 }
 0x2dd   : > { %vm2699_vm11 = vc.u32 %v7620_v44, %v7611_v59  ;;  %v2758_v1 = vsel %vm2757_vm9, %v2756_v31, 0  ;;  %v2604_v42 = vsub.s32 0, %v7623_v17  ;;  %v9346_v61 = vand.u32 2147483647, %v7586_v63 }
 0x2de   : > { %v2701_v51 = vsel %vm2699_vm11, %v2700_v23, %v7612_v19  ;;  %v2853_v33 = vand.u32 2139095040, %v7626_v49  ;;  %v2760_v35 = vand.u32 31, %v2758_v1  ;;  %v2006_v22 = vadd.f32 %v7237_v62, %v1897_v47 }
 0x2df   : > { %v2702_v3 = vadd.s32 %v2701_v51, %v2697_v18  ;;  %v7637_v27 = vsel %vm5434_vm8, 0, %v5433_v60  ;;  %v5437_v45 = vadd.s32 4294967294, %v2398_v56  ;;  %v5441_v4 = vadd.s32 4294967294, %v2502_v43 }
 0x2e0   : > { %v2761_v29 = vsub.s32 32, %v2760_v35  ;;  %v5444_v55 = vmin.u32 %v2604_v42, %v7623_v17  ;;  %v2753_v5 = vand.u32 8388607, %v9346_v61  ;;  %v2763_v40 = vshll.u32 %v9398_v11, %v2760_v35 }
 0x2e1   : > { %v2703_v54 = vadd.s32 536870912, %v2702_v3  ;;  %v2854_v10 = vshrl.u32 %v2853_v33, 23  ;;  %v2766_v62 = vshll.u32 %v9352_v9, %v2760_v35  ;;  %v2769_v25 = vshll.u32 %v9350_v16, %v2760_v35 }
 0x2e2   : > { %v2764_v48 = vshrl.u32 %v9352_v9, %v2761_v29  ;;  %v2767_v60 = vshrl.u32 %v9350_v16, %v2761_v29  ;;  %v2770_v28 = vshrl.u32 %v9399_v12, %v2761_v29  ;;  %v2772_v20 = vshll.u32 %v9399_v12, %v2760_v35 }
 0x2e3   : > { %v7643_v19 = vshrl.u32 %v2703_v54, 30  ;;  %v2773_v14 = vshrl.u32 %v9400_v7, %v2761_v29  ;;  %v2759_v2 = vshrl.u32 %v2758_v1, 5  ;;  %v2775_v23 = vshll.u32 %v9400_v7, %v2760_v35 }
 0x2e4   : > { %v2765_v31 = vor.u32 %v2764_v48, %v2763_v40  ;;  %v2768_v47 = vor.u32 %v2767_v60, %v2766_v62  ;;  %v2771_v56 = vor.u32 %v2770_v28, %v2769_v25  ;;  %v2776_v18 = vshrl.u32 %v9397_v24, %v2761_v29 }
 0x2e5   : > { %v2705_v15 = vshll.u32 %v7643_v19, 30  ;;  %v2774_v43 = vor.u32 %v2773_v14, %v2772_v20  ;;  %v2123_v42 = vadd.f32 %v2122_v53, %v2006_v22  ;;  %v2606_v51 = vclz %v5444_v55 }
 0x2e6   : > { %v2754_v33 = vor.u32 8388608, %v2753_v5  ;;  %v2302_v54 = vsub.s32 4294967266, %v7637_v27  ;;  %vm5438_vm12 = vcmp.lt.s32.totalorder %v5437_v45, 0  ;;  %vm5442_vm13 = vcmp.lt.s32.totalorder %v5441_v4, 0 }
 0x2e7   : > { %v2777_v61 = vor.u32 %v2776_v18, %v2775_v23  ;;  %v7656_v36 = vsub.s32 %v2702_v3, %v2705_v15  ;;  %vm2778_vm10 = vcmp.lt.s32.totalorder %v2759_v2, 1  ;;  %vm2781_vm14 = vcmp.lt.s32.totalorder %v2759_v2, 4 }
 0x2e8   : > { %v5455_v1 = vadd.s32 4294967169, %v2854_v10  ;;  %v2762_v35 = vshrl.u32 %v9398_v11, %v2761_v29  ;;  %v2783_v40 = vsel %vm2781_vm14, %v2771_v56, 2102212464  ;;  %v2786_v48 = vsel %vm2778_vm10, %v2765_v31, %v2768_v47 }
 0x2e9   : > { %v2787_v62 = vsel %vm2781_vm14, %v2774_v43, 920167782  ;;  %v5445_v60 = vadd.s32 4294967294, %v2606_v51  ;;  %vm2780_vm15 = vcmp.lt.s32.totalorder %v2759_v2, 3  ;;  %v2790_v22 = vsel %vm2778_vm10, %v2768_v47, %v2771_v56 }
 0x2ea   : > { %v2794_v55 = vshll.u32 %v2754_v33, 8  ;;  %vm2779_vm0 = vcmp.lt.s32.totalorder %v2759_v2, 2  ;;  %v2782_v5 = vsel %vm2778_vm10, %v2762_v35, %v2765_v31  ;;  %v2788_v53 = vsel %vm2780_vm15, %v2771_v56, %v2787_v62 }
 0x2eb   : > { %v2791_v25 = vsel %vm2781_vm14, %v2777_v61, 1326507024  ;;  %v2708_v28 = vsub.s32 0, %v7656_v36  ;;  %v2784_v3 = vsel %vm2780_vm15, %v2768_v47, %v2783_v40  ;;  %v2789_v20 = vsel %vm2779_vm0, %v2786_v48, %v2788_v53 }
 0x2ec   : > { %v2792_v14 = vsel %vm2780_vm15, %v2774_v43, %v2791_v25  ;;  %v7662_v29 = vmul.u32.u64.low %v2794_v55, %v2789_v20  ;;  %v7663_v15 = vmul.u32.u64.high %v2794_v55, %v2789_v20, %v7662_v29  ;;  %v2860_v23 = vadd.s32 1, %v5455_v1  ;;  %v2223_v1 = vpop.f32.mrf.mxu1 }
 0x2ed   : > { %v2793_v10 = vsel %vm2779_vm0, %v2790_v22, %v2792_v14  ;;  %v7668_v18 = vadd.s32 %v7351_v0, %v7390_v32  ;;  %v7670_v31 = vadd.s32 127, %v2302_v54  ;;  %v7678_v43 = vadd.s32 %v7418_v41, %v7426_v52 }
 0x2ee   : > { %v7672_v61 = vmul.u32.u64.low %v2794_v55, %v2793_v10  ;;  %v7673_v56 = vmul.u32.u64.high %v2794_v55, %v2793_v10, %v7672_v61  ;;  %v7681_v51 = vsel %vm5438_vm12, 0, %v5437_v45  ;;  %vm2861_vm1 = vcmp.gt.s32.totalorder %v2860_v23, 0 }
 0x2ef   : > { %v7684_v33 = vsel %vm5442_vm13, 0, %v5441_v4  ;;  %v2785_v32 = vsel %vm2779_vm0, %v2782_v5, %v2784_v3  ;;  %v9348_v0 = vand.u32 2147483647, %v7626_v49  ;;  %v2862_v54 = vsel %vm2861_vm1, %v2860_v23, 0 }
 0x2f0   : > { %vm5446_vm3 = vcmp.lt.s32.totalorder %v5445_v60, 0  ;;  %v5448_v35 = vmin.u32 %v2708_v28, %v7656_v36  ;;  %v2804_v40 = vadd.s32 1, %v7663_v15  ;;  %v2864_v41 = vand.u32 31, %v2862_v54 }
 0x2f1   : > { %v2801_v48 = vmul.u32 %v2794_v55, %v2785_v32  ;;  %vm2803_vm4 = vc.u32 %v7673_v56, %v7662_v29  ;;  %v7697_v22 = vadd.f32 %v2223_v1, %v2123_v42  ;;  %v2510_v5 = vsub.s32 4294967266, %v7684_v33 }
 0x2f2   : > { %v2865_v62 = vsub.s32 32, %v2864_v41  ;;  %v7700_v53 = vsel %vm5446_vm3, 0, %v5445_v60  ;;  %v2805_v25 = vsel %vm2803_vm4, %v2804_v40, %v7663_v15  ;;  %v2857_v28 = vand.u32 8388607, %v9348_v0 }
 0x2f3   : > { %v2710_v3 = vclz %v5448_v35  ;;  %v2806_v20 = vadd.s32 %v2805_v25, %v2801_v48  ;;  %v2867_v10 = vshll.u32 %v9398_v11, %v2864_v41  ;;  %v2870_v42 = vshll.u32 %v9352_v9, %v2864_v41 }
 0x2f4   : > { %v2868_v14 = vshrl.u32 %v9352_v9, %v2865_v62  ;;  %v2871_v55 = vshrl.u32 %v9350_v16, %v2865_v62  ;;  %v2873_v23 = vshll.u32 %v9350_v16, %v2864_v41  ;;  %v2874_v60 = vshrl.u32 %v9399_v12, %v2865_v62 }
 0x2f5   : > { %v2807_v61 = vadd.s32 536870912, %v2806_v20  ;;  %v2863_v32 = vshrl.u32 %v2862_v54, 5  ;;  %v2876_v15 = vshll.u32 %v9399_v12, %v2864_v41  ;;  %v2877_v1 = vshrl.u32 %v9400_v7, %v2865_v62 }
 0x2f6   : > { %v2506_v35 = vsub.s32 32, %v7684_v33  ;;  %v2869_v40 = vor.u32 %v2868_v14, %v2867_v10  ;;  %v2872_v48 = vor.u32 %v2871_v55, %v2870_v42  ;;  %v2875_v25 = vor.u32 %v2874_v60, %v2873_v23 }
 0x2f7   : > { %v7714_v0 = vshrl.u32 %v2807_v61, 30  ;;  %v2878_v13 = vor.u32 %v2877_v1, %v2876_v15  ;;  %v2879_v52 = vshll.u32 %v9400_v7, %v2864_v41  ;;  %v2880_v45 = vshrl.u32 %v9397_v24, %v2865_v62 }
 0x2f8   : > { %v2511_v47 = vadd.s32 127, %v2510_v5  ;;  %v2614_v16 = vsub.s32 4294967266, %v7700_v53  ;;  %v5449_v54 = vadd.s32 4294967294, %v2710_v3  ;;  %v2858_v9 = vor.u32 8388608, %v2857_v28 }
 0x2f9   : > { %v2809_v4 = vshll.u32 %v7714_v0, 30  ;;  %v2881_v2 = vor.u32 %v2880_v45, %v2879_v52  ;;  %vm2882_vm5 = vcmp.lt.s32.totalorder %v2863_v32, 1  ;;  %vm2885_vm6 = vcmp.lt.s32.totalorder %v2863_v32, 4 }
 0x2fa   : > { %v2866_v14 = vshrl.u32 %v9398_v11, %v2865_v62  ;;  %vm2884_vm7 = vcmp.lt.s32.totalorder %v2863_v32, 3  ;;  %v2890_v55 = vsel %vm2882_vm5, %v2869_v40, %v2872_v48  ;;  %v2891_v10 = vsel %vm2885_vm6, %v2878_v13, 920167782 }
 0x2fb   : > { %v7723_v41 = vsub.s32 %v2806_v20, %v2809_v4  ;;  %vm2883_vm8 = vcmp.lt.s32.totalorder %v2863_v32, 2  ;;  %v2887_v5 = vsel %vm2885_vm6, %v2875_v25, 2102212464  ;;  %v2892_v3 = vsel %vm2884_vm7, %v2875_v25, %v2891_v10 }
 0x2fc   : > { %v2610_v28 = vsub.s32 32, %v7700_v53  ;;  %v2893_v52 = vsel %vm2883_vm8, %v2890_v55, %v2892_v3  ;;  %v2898_v45 = vshll.u32 %v2858_v9, 8  ;;  %v2957_v42 = vand.u32 2139095040, %v7697_v22 }
 0x2fd   : > { %v2812_v62 = vsub.s32 0, %v7723_v41  ;;  %v2886_v23 = vsel %vm2882_vm5, %v2866_v14, %v2869_v40  ;;  %v2894_v60 = vsel %vm2882_vm5, %v2872_v48, %v2875_v25  ;;  %v2895_v4 = vsel %vm2885_vm6, %v2881_v2, 1326507024 }
 0x2fe   : > { %v2888_v20 = vsel %vm2884_vm7, %v2872_v48, %v2887_v5  ;;  %v2896_v61 = vsel %vm2884_vm7, %v2878_v13, %v2895_v4  ;;  %v7736_v15 = vmul.u32.u64.low %v2898_v45, %v2893_v52  ;;  %v7737_v1 = vmul.u32.u64.high %v2898_v45, %v2893_v52, %v7736_v15 }
 0x2ff   : > { %v2615_v55 = vadd.s32 127, %v2614_v16  ;;  %vm5450_vm9 = vcmp.lt.s32.totalorder %v5449_v54, 0  ;;  %v5452_v9 = vmin.u32 %v2812_v62, %v7723_v41  ;;  %v2897_v10 = vsel %vm2883_vm8, %v2894_v60, %v2896_v61 }
 0x300   : > { %v2490_v40 = vadd.s32 %v7464_v39, %v7475_v58  ;;  %v2507_v2 = vshll.u32 %v7592_v46, %v7684_v33  ;;  %v7746_v25 = vmul.u32.u64.low %v2898_v45, %v2897_v10  ;;  %v7747_v48 = vmul.u32.u64.high %v2898_v45, %v2897_v10, %v7746_v25 }
 0x301   : > { %v2594_v13 = vadd.s32 %v7540_v26, %v7547_v38  ;;  %v2814_v14 = vclz %v5452_v9  ;;  %v2889_v16 = vsel %vm2883_vm8, %v2886_v23, %v2888_v20  ;;  %v2958_v5 = vshrl.u32 %v2957_v42, 23 }
 0x302   : > { %v2508_v3 = vshrl.u32 %v2490_v40, %v2506_v35  ;;  %v2512_v52 = vshll.u32 %v2511_v47, 23  ;;  %v7752_v62 = vsel %vm5450_vm9, 0, %v5449_v54  ;;  %v2908_v60 = vadd.s32 1, %v7737_v1 }
 0x303   : > { %v2612_v39 = vshrl.u32 %v2594_v13, %v2610_v28  ;;  %v2616_v58 = vshll.u32 %v2615_v55, 23  ;;  %v5453_v4 = vadd.s32 4294967294, %v2814_v14  ;;  %v5459_v46 = vadd.s32 4294967169, %v2958_v5 }
 0x304   : > { %v2611_v33 = vshll.u32 %v7623_v17, %v7700_v53  ;;  %v2905_v61 = vmul.u32 %v2898_v45, %v2889_v16  ;;  %vm2907_vm11 = vc.u32 %v7747_v48, %v7736_v15  ;;  %v9354_v26 = vand.u32 2147483647, %v7697_v22 }
 0x305   : > { %v2718_v38 = vsub.s32 4294967266, %v7752_v62  ;;  %vm5454_vm12 = vcmp.lt.s32.totalorder %v5453_v4, 0  ;;  %v2909_v47 = vsel %vm2907_vm11, %v2908_v60, %v7737_v1  ;;  %v2964_v32 = vadd.s32 1, %v5459_v46 }
 0x306   : > { %v9401_v54 = vsub.s32 4294967266, %v7681_v51  ;;  %v7768_v17 = vor.u32 %v2508_v3, %v2507_v2  ;;  %v2910_v53 = vadd.s32 %v2909_v47, %v2905_v61  ;;  %v7770_v45 = vor.u32 4788187, %v2512_v52 }
 0x307   : > { %v7772_v42 = vor.u32 %v2612_v39, %v2611_v33  ;;  %v7774_v23 = vor.u32 4788187, %v2616_v58  ;;  %vm2965_vm13 = vcmp.gt.s32.totalorder %v2964_v32, 0  ;;  %v2714_v20 = vsub.s32 32, %v7752_v62 }
 0x308   : > { %v7766_v28 = vadd.s32 127, %v9401_v54  ;;  %v7777_v1 = vsel %vm5454_vm12, 0, %v5453_v4  ;;  %v2911_v55 = vadd.s32 536870912, %v2910_v53  ;;  %v2966_v9 = vsel %vm2965_vm13, %v2964_v32, 0 }
 0x309   : > { %v9402_v10 = vsub.s32 32, %v7681_v51  ;;  %v2719_v2 = vadd.s32 127, %v2718_v38  ;;  %v2961_v25 = vand.u32 8388607, %v9354_v26  ;;  %v2968_v13 = vand.u32 31, %v2966_v9 }
 0x30a   : > { %v2698_v5 = vadd.s32 %v7611_v59, %v7620_v44  ;;  %v7790_v3 = vshrl.u32 %v2911_v55, 30  ;;  %v2715_v4 = vshll.u32 %v7656_v36, %v7752_v62  ;;  %v9403_v44 = vmov 2475754826  }
 0x30b   : > { %v7782_v40 = vshrl.u32 %v7678_v43, %v9402_v10  ;;  %v2822_v43 = vsub.s32 4294967266, %v7777_v1  ;;  %v2969_v39 = vsub.s32 32, %v2968_v13  ;;  %v2720_v61 = vshll.u32 %v2719_v2, 23 }
 0x30c   : > { %v2716_v46 = vshrl.u32 %v2698_v5, %v2714_v20  ;;  %v2913_v33 = vshll.u32 %v7790_v3, 30  ;;  %v2962_v38 = vor.u32 8388608, %v2961_v25  ;;  %v2971_v59 = vshll.u32 %v9398_v11, %v2968_v13 }
 0x30d   : > { %v2972_v47 = vshrl.u32 %v9403_v44, %v2969_v39  ;;  %v2974_v54 = vshll.u32 %v9403_v44, %v2968_v13  ;;  %v9404_v55 = vmov 2131351028   ;;  %v2978_v26 = vshrl.u32 %v9399_v12, %v2969_v39 }
 0x30e   : > { %v7801_v32 = vsub.s32 %v2910_v53, %v2913_v33  ;;  %v2975_v10 = vshrl.u32 %v9404_v55, %v2969_v39  ;;  %v2802_v36 = vadd.s32 %v7662_v29, %v7673_v56  ;;  %v2823_v62 = vadd.s32 127, %v2822_v43 }
 0x30f   : > { %v2967_v20 = vshrl.u32 %v2966_v9, 5  ;;  %v2977_v2 = vshll.u32 %v9404_v55, %v2968_v13  ;;  %v2973_v5 = vor.u32 %v2972_v47, %v2971_v59  ;;  %v2980_v53 = vshll.u32 %v9399_v12, %v2968_v13 }
 0x310   : > { %v2916_v25 = vsub.s32 0, %v7801_v32  ;;  %v2976_v35 = vor.u32 %v2975_v10, %v2974_v54  ;;  %v2981_v60 = vshrl.u32 %v9400_v7, %v2969_v39  ;;  %v2983_v58 = vshll.u32 %v9400_v7, %v2968_v13 }
 0x311   : > { %v2979_v33 = vor.u32 %v2978_v26, %v2977_v2  ;;  %v2984_v16 = vshrl.u32 %v9397_v24, %v2969_v39  ;;  %v2717_v52 = vor.u32 %v2716_v46, %v2715_v4  ;;  %v2721_v14 = vor.u32 4788187, %v2720_v61 }
 0x312   : > { %v5456_v29 = vmin.u32 %v2916_v25, %v7801_v32  ;;  %v3002_v56 = vshll.u32 %v2962_v38, 8  ;;  %v2818_v9 = vsub.s32 32, %v7777_v1  ;;  %v2982_v43 = vor.u32 %v2981_v60, %v2980_v53 }
 0x313   : > { %v2985_v55 = vor.u32 %v2984_v16, %v2983_v58  ;;  %vm2986_vm10 = vcmp.lt.s32.totalorder %v2967_v20, 1  ;;  %v2824_v59 = vshll.u32 %v2823_v62, 23  ;;  %vm2989_vm14 = vcmp.lt.s32.totalorder %v2967_v20, 4 }
 0x314   : > { %v2918_v47 = vclz %v5456_v29  ;;  %v2994_v26 = vsel %vm2986_vm10, %v2973_v5, %v2976_v35  ;;  %v2970_v54 = vshrl.u32 %v9398_v11, %v2969_v39  ;;  %vm2988_vm15 = vcmp.lt.s32.totalorder %v2967_v20, 3 }
 0x315   : > { %v2991_v13 = vsel %vm2989_vm14, %v2979_v33, 2102212464  ;;  %v2995_v10 = vsel %vm2989_vm14, %v2982_v43, 920167782  ;;  %vm2987_vm0 = vcmp.lt.s32.totalorder %v2967_v20, 2  ;;  %v2998_v61 = vsel %vm2986_vm10, %v2976_v35, %v2979_v33 }
 0x316   : > { %v5457_v4 = vadd.s32 4294967294, %v2918_v47  ;;  %v2996_v46 = vsel %vm2988_vm15, %v2979_v33, %v2995_v10  ;;  %v2819_v60 = vshll.u32 %v7723_v41, %v7777_v1  ;;  %v2820_v16 = vshrl.u32 %v2802_v36, %v2818_v9 }
 0x317   : > { %v2997_v58 = vsel %vm2987_vm0, %v2994_v26, %v2996_v46  ;;  %v2999_v38 = vsel %vm2989_vm14, %v2985_v55, 1326507024  ;;  %v2990_v62 = vsel %vm2986_vm10, %v2970_v54, %v2973_v5  ;;  %v2992_v2 = vsel %vm2988_vm15, %v2976_v35, %v2991_v13 }
 0x318   : > { %vm5458_vm1 = vcmp.lt.s32.totalorder %v5457_v4, 0  ;;  %v3000_v39 = vsel %vm2988_vm15, %v2982_v43, %v2999_v38  ;;  %v7824_v29 = vmul.u32.u64.low %v3002_v56, %v2997_v58  ;;  %v7825_v47 = vmul.u32.u64.high %v3002_v56, %v2997_v58, %v7824_v29 }
 0x319   : > { %v2921_v25 = vsel %vm5458_vm1, 0, %v5457_v4  ;;  %v3001_v53 = vsel %vm2987_vm0, %v2998_v61, %v3000_v39  ;;  %v2825_v33 = vor.u32 4788187, %v2824_v59  ;;  %v2906_v41 = vadd.s32 %v7736_v15, %v7747_v48 }
 0x31a   : > { %v2922_v1 = vsub.s32 32, %v2921_v25  ;;  %v2926_v36 = vsub.s32 4294967266, %v2921_v25  ;;  %v2722_v9 = vand.u32 2147483647, %v2721_v14  ;;  %v2821_v55 = vor.u32 %v2820_v16, %v2819_v60 }
 0x31b   : > { %v7830_v26 = vmul.u32.u64.low %v3002_v56, %v3001_v53  ;;  %v7831_v10 = vmul.u32.u64.high %v3002_v56, %v3001_v53, %v7830_v26  ;;  %v2923_v35 = vshll.u32 %v7801_v32, %v2921_v25  ;;  %v2993_v54 = vsel %vm2987_vm0, %v2990_v62, %v2992_v2  ;;  %v9410_v32 = vld [vmem:[#allocation9_spill] sm:$0xff] }
 0x31c   : > { %v2924_v5 = vshrl.u32 %v2906_v41, %v2922_v1  ;;  %v2927_v43 = vadd.s32 127, %v2926_v36  ;;  %v9405_v13 = vshll.u32 %v7766_v28, 23  ;;  %v9406_v59 = vand.u32 2147483647, %v7770_v45 }
 0x31d   : > { %v9407_v15 = vcvt.s32.f32 %v7768_v17  ;;  %v9408_v14 = vand.u32 2147483647, %v7774_v23  ;;  %v9409_v46 = vcvt.s32.f32 %v7772_v42  ;;  %v3012_v60 = vadd.s32 1, %v7825_v47 }
 0x31e   : > { %v2409_v4 = vor.u32 4788187, %v9405_v13  ;;  %vm2228_vm3 = vcmp.lt.s32.totalorder %v9410_v32, 0  ;;  %v2724_v16 = vcvt.s32.f32 %v2717_v52  ;;  %v2826_v20 = vand.u32 2147483647, %v2825_v33 }
 0x31f   : > { %v2517_v48 = vmul.f32 %v9407_v15, %v9406_v59  ;;  %v2621_v61 = vmul.f32 %v9409_v46, %v9408_v14  ;;  %v2925_v58 = vor.u32 %v2924_v5, %v2923_v35  ;;  %v2928_v38 = vshll.u32 %v2927_v43, 23 }
 0x320   : > { %v9411_v28 = vsub.s32 32, %v7637_v27  ;;  %v9412_v17 = vshll.u32 %v7579_v50, %v7681_v51  ;;  %v3009_v62 = vmul.u32 %v3002_v56, %v2993_v54  ;;  %vm3011_vm4 = vc.u32 %v7831_v10, %v7824_v29  ;;  %v9414_v56 = vld [vmem:[#allocation11_spill] sm:$0xff] }
 0x321   : > { %v2725_v42 = vmul.f32 %v2724_v16, %v2722_v9  ;;  %v2828_v2 = vcvt.s32.f32 %v2821_v55  ;;  %v2929_v39 = vor.u32 4788187, %v2928_v38  ;;  %v3013_v52 = vsel %vm3011_vm4, %v3012_v60, %v7825_v47  ;;  %v9425_v16 = vld [vmem:[#allocation10_spill] sm:$0xff] }
 0x322   : > { %v2300_v45 = vshrl.u32 %v7668_v18, %v9411_v28  ;;  %v2405_v23 = vor.u32 %v7782_v40, %v9412_v17  ;;  %v9413_v25 = vshll.u32 %v7670_v31, 23  ;;  %v2410_v33 = vand.u32 2147483647, %v2409_v4 }
 0x323   : > { %v2518_v41 = vxor.u32 2147483648, %v2517_v48  ;;  %v3014_v18 = vadd.s32 %v3013_v52, %v3009_v62  ;;  %v2622_v1 = vxor.u32 2147483648, %v2621_v61  ;;  %v2829_v36 = vmul.f32 %v2828_v2, %v2826_v20 }
 0x324   : > { %v2305_v53 = vor.u32 4788187, %v9413_v25  ;;  %v2930_v50 = vand.u32 2147483647, %v2929_v39  ;;  %v2932_v51 = vcvt.s32.f32 %v2925_v58  ;;  %v2312_v40 = vsub.s32 4, %v7521_v57 }
 0x325   : > { %vm2436_vm5 = vcmp.lt.s32.totalorder %v9414_v56, 0  ;;  %vm2540_vm6 = vcmp.lt.s32.totalorder %v7290_v30, 0  ;;  %v3015_v9 = vadd.s32 536870912, %v3014_v18  ;;  %v9415_v47 = vshll.u32 %v7555_v34, %v7637_v27 }
 0x326   : > { %v2412_v31 = vcvt.s32.f32 %v2405_v23  ;;  %v2726_v26 = vxor.u32 2147483648, %v2725_v42  ;;  %v2933_v35 = vmul.f32 %v2932_v51, %v2930_v50  ;;  %v9416_v5 = vand.u32 2147483647, %v9414_v56 }
 0x327   : > { %v2301_v55 = vor.u32 %v2300_v45, %v9415_v47  ;;  %v2519_v54 = vsel %vm2436_vm5, %v2518_v41, %v2517_v48  ;;  %v9419_v13 = vand.u32 2147483647, %v7290_v30  ;;  %v7879_v34 = vshrl.u32 %v3015_v9, 30 }
 0x328   : > { %vm7867_vm7 = vcmp.le.f32.partialorder %v9416_v5, 0.7853982  ;;  %v9422_v27 = vand.u32 2147483647, %v9410_v32  ;;  %v2306_v15 = vand.u32 2147483647, %v2305_v53  ;;  %v2413_v14 = vmul.f32 %v2412_v31, %v2410_v33 }
 0x329   : > { %vm7875_vm8 = vcmp.le.f32.partialorder %v9419_v13, 0.7853982  ;;  %v2623_v46 = vsel %vm2540_vm6, %v2622_v1, %v2621_v61  ;;  %v2830_v48 = vxor.u32 2147483648, %v2829_v36  ;;  %v7892_v60 = vsel %vm2228_vm3, %v2312_v40, %v7521_v57 }
 0x32a   : > { %vm7883_vm9 = vcmp.le.f32.partialorder %v9422_v27, 0.7853982  ;;  %vm2332_vm11 = vcmp.lt.s32.totalorder %v9425_v16, 0  ;;  %v2416_v20 = vsub.s32 4, %v7557_v8  ;;  %vm2644_vm12 = vcmp.lt.s32.totalorder %v7495_v21, 0 }
 0x32b   : > { %v3017_v58 = vshll.u32 %v7879_v34, 30  ;;  %v2308_v38 = vcvt.s32.f32 %v2301_v55  ;;  %v2522_v28 = vsel %vm7867_vm7, %v9414_v56, %v2519_v54  ;;  %v2727_v61 = vsel %vm2644_vm12, %v2726_v26, %v2725_v42 }
 0x32c   : > { %v2934_v45 = vxor.u32 2147483648, %v2933_v35  ;;  %v2626_v57 = vsel %vm7875_vm8, %v7290_v30, %v2623_v46  ;;  %v9426_v17 = vand.u32 2147483647, %v7495_v21  ;;  %vm2748_vm10 = vcmp.lt.s32.totalorder %v7586_v63, 0 }
 0x32d   : > { %v7913_v62 = vsub.s32 %v3014_v18, %v3017_v58  ;;  %v2309_v2 = vmul.f32 %v2308_v38, %v2306_v15  ;;  %v9429_v39 = vand.u32 2147483647, %v9425_v16  ;;  %v2414_v52 = vxor.u32 2147483648, %v2413_v14 }
 0x32e   : > { %vm7908_vm13 = vcmp.le.f32.partialorder %v9426_v17, 0.7853982  ;;  %v9432_v25 = vand.u32 2147483647, %v7586_v63  ;;  %v2831_v33 = vsel %vm2748_vm10, %v2830_v48, %v2829_v36  ;;  %5704 = vcosq.f32 %v2522_v28 }
 0x32f   : > { %vm7917_vm14 = vcmp.le.f32.partialorder %v9429_v39, 0.7853982  ;;  %v2730_v41 = vsel %vm7908_vm13, %v7495_v21, %v2727_v61  ;;  %vm2852_vm0 = vcmp.lt.s32.totalorder %v7626_v49, 0  ;;  %v3020_v18 = vsub.s32 0, %v7913_v62 }
 0x330   : > { %vm7923_vm15 = vcmp.le.f32.partialorder %v9432_v25, 0.7853982  ;;  %v2624_v1 = vsub.s32 4, %v7601_v37  ;;  %5706 = vsinq.f32 %v2626_v57  ;;  %v2832_v50 = vsub.s32 4, %v7714_v0 }
 0x331   : > { %v2935_v51 = vsel %vm2852_vm0, %v2934_v45, %v2933_v35  ;;  %5708 = vcosq.f32 %v2626_v57  ;;  %v2728_v36 = vsub.s32 4, %v7643_v19  ;;  %v2834_v40 = vsel %vm7923_vm15, %v7586_v63, %v2831_v33 }
 0x332   : > { %v5460_v9 = vmin.u32 %v3020_v18, %v7913_v62  ;;  %v2310_v47 = vxor.u32 2147483648, %v2309_v2  ;;  %v2520_v55 = vsub.s32 4, %v7563_v6  ;;  %5710 = vcosq.f32 %v2730_v41 }
 0x333   : > { %v9435_v31 = vand.u32 2147483647, %v7626_v49  ;;  %v2315_v35 = vsel %vm7883_vm9, 0, %v7892_v60  ;;  %5712 = vsinq.f32 %v2730_v41  ;;  %v2415_v13 = vsel %vm2332_vm11, %v2414_v52, %v2413_v14 }
 0x334   : > { %v3022_v54 = vclz %v5460_v9  ;;  %v2625_v27 = vsel %vm2540_vm6, %v2624_v1, %v7601_v37  ;;  %v2833_v15 = vsel %vm2748_vm10, %v2832_v50, %v7714_v0  ;;  %5714 = vcosq.f32 %v2834_v40 }
 0x335   : > { %vm7946_vm1 = vcmp.le.f32.partialorder %v9435_v31, 0.7853982  ;;  %v2729_v46 = vsel %vm2644_vm12, %v2728_v36, %v7643_v19  ;;  %5716 = vsinq.f32 %v2834_v40  ;;  %v2936_v48 = vsub.s32 4, %v7790_v3 }
 0x336   : > { %v2938_v5 = vsel %vm7946_vm1, %v7626_v49, %v2935_v51  ;;  %v5461_v60 = vadd.s32 4294967294, %v3022_v54  ;;  %v2311_v14 = vsel %vm2228_vm3, %v2310_v47, %v2309_v2  ;;  %v2417_v37 = vsel %vm2332_vm11, %v2416_v20, %v7557_v8 }
 0x337   : > { %v2521_v0 = vsel %vm2436_vm5, %v2520_v55, %v7563_v6  ;;  %5718 = vcosq.f32 %v2938_v5  ;;  %v2418_v19 = vsel %vm7917_vm14, %v9425_v16, %v2415_v13  ;;  %v2835_v58 = vsel %vm7923_vm15, 0, %v2833_v15 }
 0x338   : > { %5720 = vsinq.f32 %v2938_v5  ;;  %vm5462_vm4 = vcmp.lt.s32.totalorder %v5461_v60, 0  ;;  %v2627_v38 = vsel %vm7875_vm8, 0, %v2625_v27  ;;  %v2731_v8 = vsel %vm7908_vm13, 0, %v2729_v46 }
 0x339   : > { %5722 = vsinq.f32 %v2522_v28  ;;  %v3025_v20 = vsel %vm5462_vm4, 0, %v5461_v60  ;;  %v2937_v6 = vsel %vm2852_vm0, %v2936_v48, %v7790_v3  ;;  %v3010_v61 = vadd.s32 %v7824_v29, %v7831_v10 }
 0x33a   : > { %v3026_v45 = vsub.s32 32, %v3025_v20  ;;  %v3030_v57 = vsub.s32 4294967266, %v3025_v20  ;;  %v2314_v28 = vsel %vm7883_vm9, %v9410_v32, %v2311_v14  ;;  %v2419_v4 = vsel %vm7917_vm14, 0, %v2417_v37 }
 0x33b   : > { %v2523_v17 = vsel %vm7867_vm7, 0, %v2521_v0  ;;  %v2839_v23 = vadd.s32 3, %v2835_v58  ;;  %v2631_v2 = vadd.s32 3, %v2627_v38  ;;  %v3027_v39 = vshll.u32 %v7913_v62, %v3025_v20  ;;  %v7998_v25 = vpop.eup %5704 }
 0x33c   : > { %v3028_v3 = vshrl.u32 %v3010_v61, %v3026_v45  ;;  %v3031_v52 = vadd.s32 127, %v3030_v57  ;;  %v2319_v29 = vadd.s32 3, %v2315_v35  ;;  %5724 = vcosq.f32 %v2418_v19 }
 0x33d   : > { %v2735_v10 = vadd.s32 3, %v2731_v8  ;;  %v2939_v59 = vsel %vm7946_vm1, 0, %v2937_v6  ;;  %v8002_v53 = vpop.eup %5706  ;;  %5726 = vsinq.f32 %v2418_v19  ;;  %v2423_v42 = vadd.s32 3, %v2419_v4 }
 0x33e   : > { %v3029_v43 = vor.u32 %v3028_v3, %v3027_v39  ;;  %v3032_v33 = vshll.u32 %v3031_v52, 23  ;;  %v5709_v41 = vpop.eup %5708  ;;  %5728 = vcosq.f32 %v2314_v28  ;;  %v2527_v18 = vadd.s32 3, %v2523_v17 }
 0x33f   : > { %v8004_v62 = vand.u32 3, %v2839_v23  ;;  %v5711_v1 = vpop.eup %5710  ;;  %5730 = vsinq.f32 %v2314_v28  ;;  %v8006_v50 = vand.u32 3, %v2631_v2  ;;  %v2943_v51 = vadd.s32 3, %v2939_v59 }
 0x340   : > { %v3033_v36 = vor.u32 4788187, %v3032_v33  ;;  %v5713_v40 = vpop.eup %5712  ;;  %v8008_v9 = vand.u32 3, %v2735_v10  ;;  %v2635_v47 = vxor.u32 2147483648, %v8002_v53  ;;  %v8011_v31 = vand.u32 3, %v2319_v29 }
 0x341   : > { %v5715_v55 = vpop.eup %5714  ;;  %v8013_v26 = vand.u32 3, %v2423_v42  ;;  %v3036_v5 = vcvt.s32.f32 %v3029_v43  ;;  %v8015_v13 = vand.u32 3, %v2527_v18  ;;  %v9438_v27 = vand.u32 2147483647, %v7697_v22 }
 0x342   : > { %v3034_v35 = vand.u32 2147483647, %v3033_v36  ;;  %v5717_v54 = vpop.eup %5716  ;;  %vm2956_vm5 = vcmp.lt.s32.totalorder %v7697_v22, 0  ;;  %vm2842_vm6 = vcmp.eq.s32.totalorder %v8004_v62, 0  ;;  %v2944_v48 = vand.u32 3, %v2943_v51 }
 0x343   : > { %vm8019_vm3 = vcmp.le.f32.partialorder %v9438_v27, 0.7853982  ;;  %vm2845_vm7 = vcmp.eq.s32.totalorder %v8004_v62, 2  ;;  %vm2634_vm8 = vcmp.eq.s32.totalorder %v8006_v50, 0  ;;  %vm2841_vm9 = vcmp.lt.s32.totalorder %v8004_v62, 2  ;;  %v3090_v62 = vld [vmem:[%s9315_s5] sm:$0xff] }
 0x344   : > { %v5719_v46 = vpop.eup %5718  ;;  %v3037_v60 = vmul.f32 %v3036_v5, %v3034_v35  ;;  %vm2737_vm11 = vcmp.lt.s32.totalorder %v8008_v9, 2  ;;  %vm2738_vm12 = vcmp.eq.s32.totalorder %v8008_v9, 0  ;;  %vm2741_vm13 = vcmp.eq.s32.totalorder %v8008_v9, 2  ;;  %v8073_v9 = vpop.permute.xlu0 %3079 }
 0x345   : > { %v5721_v14 = vpop.eup %5720  ;;  %v2636_v37 = vsel %vm2634_vm8, %v5709_v41, %v2635_v47  ;;  %v2739_v58 = vxor.u32 2147483648, %v5713_v40  ;;  %v2742_v38 = vxor.u32 2147483648, %v5711_v1  ;;  %vm2633_vm10 = vcmp.lt.s32.totalorder %v8006_v50, 2 }
 0x346   : > { %v5723_v0 = vpop.eup %5722  ;;  %v3038_v19 = vxor.u32 2147483648, %v3037_v60  ;;  %v2638_v8 = vxor.u32 2147483648, %v5709_v41  ;;  %v3040_v20 = vsub.s32 4, %v7879_v34  ;;  %v2843_v6 = vxor.u32 2147483648, %v5717_v54 }
 0x347   : > { %v2846_v61 = vxor.u32 2147483648, %v5715_v55  ;;  %vm2734_vm14 = vweird.f32 %v7495_v21  ;;  %vm2637_vm15 = vcmp.eq.s32.totalorder %v8006_v50, 2  ;;  %vm2946_vm0 = vcmp.eq.s32.totalorder %v2944_v48, 0 }
 0x348   : > { %v3039_v45 = vsel %vm2956_vm5, %v3038_v19, %v3037_v60  ;;  %v2947_v57 = vxor.u32 2147483648, %v5721_v14  ;;  %v2950_v28 = vxor.u32 2147483648, %v5719_v46  ;;  %vm2838_vm1 = vweird.f32 %v7586_v63  ;;  %v3075_v60 = vpop.permute.xlu1 %3074 }
 0x349   : > { %v3042_v4 = vsel %vm8019_vm3, %v7697_v22, %v3039_v45  ;;  %vm2942_vm4 = vweird.f32 %v7626_v49  ;;  %vm2949_vm8 = vcmp.eq.s32.totalorder %v2944_v48, 2  ;;  %vm2630_vm2 = vweird.f32 %v7290_v30  ;;  %v5725_v2 = vpop.eup %5724 }
 0x34a   : > { %v2531_v17 = vxor.u32 2147483648, %v5723_v0  ;;  %v2534_v23 = vxor.u32 2147483648, %v7998_v25  ;;  %5732 = vcosq.f32 %v3042_v4  ;;  %v2740_v39 = vsel %vm2738_vm12, %v5711_v1, %v2739_v58  ;;  %v5727_v29 = vpop.eup %5726 }
 0x34b   : > { %v2743_v3 = vsel %vm2741_vm13, %v2742_v38, %v5713_v40  ;;  %v2639_v52 = vsel %vm2637_vm15, %v2638_v8, %v8002_v53  ;;  %v3041_v10 = vsel %vm2956_vm5, %v3040_v20, %v7879_v34  ;;  %5734 = vsinq.f32 %v3042_v4  ;;  %v5729_v43 = vpop.eup %5728  ;;  %v3070_v38 = vpop.permute.xlu0 %3069 }
 0x34c   : > { %v2844_v59 = vsel %vm2842_vm6, %v5715_v55, %v2843_v6  ;;  %v2847_v42 = vsel %vm2845_vm7, %v2846_v61, %v5717_v54  ;;  %v2948_v33 = vsel %vm2946_vm0, %v5719_v46, %v2947_v57  ;;  %v2951_v41 = vsel %vm2949_vm8, %v2950_v28, %v5721_v14  ;;  %v5731_v53 = vpop.eup %5730 }
 0x34d   : > { %vm2530_vm12 = vcmp.eq.s32.totalorder %v8015_v13, 0  ;;  %vm2533_vm13 = vcmp.eq.s32.totalorder %v8015_v13, 2  ;;  %vm2945_vm15 = vcmp.lt.s32.totalorder %v2944_v48, 2  ;;  %v2744_v34 = vsel %vm2737_vm11, %v2740_v39, %v2743_v3 }
 0x34e   : > { %v2532_v18 = vsel %vm2530_vm12, %v7998_v25, %v2531_v17  ;;  %v2535_v1 = vsel %vm2533_vm13, %v2534_v23, %v5723_v0  ;;  %v3043_v51 = vsel %vm8019_vm3, 0, %v3041_v10  ;;  %v2848_v36 = vsel %vm2841_vm9, %v2844_v59, %v2847_v42 }
 0x34f   : > { %v2427_v40 = vxor.u32 2147483648, %v5727_v29  ;;  %v2430_v47 = vxor.u32 2147483648, %v5725_v2  ;;  %v2952_v55 = vsel %vm2945_vm15, %v2948_v33, %v2951_v41  ;;  %v2640_v35 = vsel %vm2633_vm10, %v2636_v37, %v2639_v52 }
 0x350   : > { %vm2526_vm5 = vweird.f32 %v9414_v56  ;;  %vm2529_vm6 = vcmp.lt.s32.totalorder %v8015_v13, 2  ;;  %v2745_v25 = vsel %vm2734_vm14, nan, %v2744_v34  ;;  %v2323_v54 = vxor.u32 2147483648, %v5731_v53 }
 0x351   : > { %v2536_v5 = vsel %vm2529_vm6, %v2532_v18, %v2535_v1  ;;  %v2326_v27 = vxor.u32 2147483648, %v5729_v43  ;;  %v3047_v15 = vadd.s32 3, %v3043_v51  ;;  %v2849_v50 = vsel %vm2838_vm1, nan, %v2848_v36 }
 0x352   : > { %vm2426_vm3 = vcmp.eq.s32.totalorder %v8013_v26, 0  ;;  %vm2429_vm7 = vcmp.eq.s32.totalorder %v8013_v26, 2  ;;  %v2953_v13 = vsel %vm2942_vm4, nan, %v2952_v55  ;;  %v2641_v21 = vsel %vm2630_vm2, nan, %v2640_v35 }
 0x353   : > { %v2428_v46 = vsel %vm2426_vm3, %v5725_v2, %v2427_v40  ;;  %v2431_v48 = vsel %vm2429_vm7, %v2430_v47, %v5727_v29  ;;  %vm2425_vm9 = vcmp.lt.s32.totalorder %v8013_v26, 2  ;;  %vm2322_vm11 = vcmp.eq.s32.totalorder %v8011_v31, 0  ;;  %v3091_v26 = vld [vmem:[%s9315_s5 + $0x8] sm:$0xff]  ;;  %v3092_v29 = vld [vmem:[%s9315_s5 + $0x10] sm:$0xff]  ;;  %v3093_v40 = vld [vmem:[%s9315_s5 + $0x18] sm:$0xff] }
 0x354   : > { %vm2325_vm10 = vcmp.eq.s32.totalorder %v8011_v31, 2  ;;  %vm9441_vm14 = vcmask 261120   ;;  %v3087_v14 = vmul.f32 %v3075_v60, %v2849_v50  ;;  %v2537_v37 = vsel %vm2526_vm5, nan, %v2536_v5 }
 0x355   : > { %v3119_v63 = vsel %vm9441_vm14, %v3090_v62, 0  ;;  %v2324_v49 = vsel %vm2322_vm11, %v5729_v43, %v2323_v54  ;;  %v2327_v0 = vsel %vm2325_vm10, %v2326_v27, %v5731_v53  ;;  %v3048_v19 = vand.u32 3, %v3047_v15  ;;  %vm9442_vm1 = vmmov %vm9441_vm14 }
 0x356   : > { %v3088_v30 = vmul.f32 %v8073_v9, %v2953_v13  ;;  %v2432_v58 = vsel %vm2425_vm9, %v2428_v46, %v2431_v48  ;;  %v3086_v8 = vmul.f32 %v3075_v60, %v2745_v25  ;;  %vm2321_vm2 = vcmp.lt.s32.totalorder %v8011_v31, 2  ;;  %v3065_v31 = vpop.permute.xlu1 %3064  ;;  %vm9443_vm5 = vmmov %vm9442_vm1 }
 0x357   : > { %v8099_v20 = vand.u32 4294901760, %v3119_v63  ;;  %v5733_v6 = vpop.eup %5732  ;;  %v3085_v61 = vmul.f32 %v3070_v38, %v2641_v21  ;;  %v3084_v56 = vmul.f32 %v3070_v38, %v2537_v37  ;;  %vm2422_vm0 = vweird.f32 %v9425_v16  ;;  %vm9444_vm6 = vmmov %vm9442_vm1 }
 0x358   : > { %v2328_v45 = vsel %vm2321_vm2, %v2324_v49, %v2327_v0  ;;  %v5735_v57 = vpop.eup %5734  ;;  %v3054_v28 = vxor.u32 2147483648, %v5733_v6  ;;  %v8102_v4 = vand.u32 4294901760, %v3087_v14  ;;  %v2433_v17 = vsel %vm2422_vm0, nan, %v2432_v58 }
 0x359   : > { %v3122_v23 = vsel %vm9442_vm1, %v3091_v26, 0  ;;  %v3051_v2 = vxor.u32 2147483648, %v5735_v57  ;;  %vm3053_vm4 = vcmp.eq.s32.totalorder %v3048_v19, 2  ;;  %v8105_v39 = vand.u32 4294901760, %v3088_v30 }
 0x35a   : > { %vm2318_vm8 = vweird.f32 %v9410_v32  ;;  %vm3050_vm12 = vcmp.eq.s32.totalorder %v3048_v19, 0  ;;  %v3055_v3 = vsel %vm3053_vm4, %v3054_v28, %v5735_v57  ;;  %v8109_v16 = vsub.f32 %v3119_v63, %v8099_v20 }
 0x35b   : > { %v2329_v52 = vsel %vm2318_vm8, nan, %v2328_v45  ;;  %vm3049_vm13 = vcmp.lt.s32.totalorder %v3048_v19, 2  ;;  %v3052_v10 = vsel %vm3050_vm12, %v5733_v6, %v3051_v2  ;;  %v3083_v59 = vmul.f32 %v3065_v31, %v2433_v17 }
 0x35c   : > { %v8114_v42 = vand.u32 4294901760, %v3122_v23  ;;  %vm3046_vm15 = vweird.f32 %v7697_v22  ;;  %v3056_v43 = vsel %vm3049_vm13, %v3052_v10, %v3055_v3  ;;  %v8117_v32 = vand.u32 4294901760, %v3086_v8 }
 0x35d   : > { %v8119_v33 = vand.u32 4294901760, %v3085_v61  ;;  %v3057_v41 = vsel %vm3046_vm15, nan, %v3056_v43  ;;  %v8122_v53 = vsub.f32 %v3088_v30, %v8105_v39  ;;  %v3082_v34 = vmul.f32 %v3065_v31, %v2329_v52 }
 0x35e   : > { %v3125_v18 = vsel %vm9443_vm5, %v3092_v29, 0  ;;  %v3089_v1 = vmul.f32 %v8073_v9, %v3057_v41  ;;  %v8126_v51 = vand.u32 4294901760, %v3084_v56  ;;  %v3205_v36 = vand.u32 4294901760, %v8109_v16 }
 0x35f   : > { %v8130_v22 = vsub.f32 %v3087_v14, %v8102_v4  ;;  %v8135_v47 = vand.u32 4294901760, %v3083_v59  ;;  %v8138_v55 = vsub.f32 %v3122_v23, %v8114_v42  ;;  %v8143_v9 = vsub.f32 %v3086_v8, %v8117_v32 }
 0x360   : > { %v8140_v35 = vand.u32 4294901760, %v3089_v1  ;;  %v8145_v25 = vand.u32 4294901760, %v3125_v18  ;;  %v8147_v5 = vand.u32 4294901760, %v3082_v34  ;;  %v3279_v54 = vand.u32 4294901760, %v8122_v53 }
 0x361   : > { %v8151_v27 = vsub.f32 %v3085_v61, %v8119_v33  ;;  %v3128_v62 = vsel %vm9444_vm6, %v3093_v40, 0  ;;  %v8156_v15 = vsub.f32 %v3084_v56, %v8126_v51  ;;  %v3206_v50 = vsub.f32 %v8109_v16, %v3205_v36 }
 0x362   : > { %3155 = vmatprep.subr.mxu0 %v8140_v35  ;;  %v8162_v13 = vsub.f32 %v3089_v1, %v8140_v35  ;;  %v3285_v21 = vand.u32 4294901760, %v8130_v22  ;;  %v3216_v46 = vand.u32 4294901760, %v8138_v55  ;;  %v8168_v48 = vsub.f32 %v3083_v59, %v8135_v47 }
 0x363   : > { %3157 = vmatpush1.msra.mxu0 %v8105_v39  ;;  %v3291_v63 = vand.u32 4294901760, %v8143_v9  ;;  %v8174_v14 = vsub.f32 %v3125_v18, %v8145_v25  ;;  %v8176_v37 = vand.u32 4294901760, %v3128_v62  ;;  %v8180_v49 = vsub.f32 %v3082_v34, %v8147_v5 }
 0x364   : > { %3159 = vmatprep.subr.mxu0 %v8102_v4  ;;  %v3273_v60 = vand.u32 4294901760, %v8162_v13  ;;  %v3280_v0 = vsub.f32 %v8122_v53, %v3279_v54  ;;  %v3297_v19 = vand.u32 4294901760, %v8151_v27  ;;  %v3207_v30 = vand.u32 4294901760, %v3206_v50 }
 0x365   : > { %3161 = vmatpush1.msra.mxu0 %v8117_v32  ;;  %v3286_v26 = vsub.f32 %v8130_v22, %v3285_v21  ;;  %v3303_v38 = vand.u32 4294901760, %v8156_v15  ;;  %v3217_v8 = vsub.f32 %v8138_v55, %v3216_v46  ;;  %v3309_v6 = vand.u32 4294901760, %v8168_v48 }
 0x366   : > { %3163 = vmatprep.subr.mxu0 %v8119_v33  ;;  %v3274_v58 = vsub.f32 %v8162_v13, %v3273_v60  ;;  %v3292_v56 = vsub.f32 %v8143_v9, %v3291_v63  ;;  %v3227_v45 = vand.u32 4294901760, %v8174_v14  ;;  %v8203_v57 = vsub.f32 %v3128_v62, %v8176_v37 }
 0x367   : > { %3165 = vmatpush1.msra.mxu0 %v8126_v51  ;;  %v3281_v28 = vand.u32 4294901760, %v3280_v0  ;;  %v3298_v17 = vsub.f32 %v8151_v27, %v3297_v19  ;;  %v3315_v23 = vand.u32 4294901760, %v8180_v49  ;;  %v3287_v2 = vand.u32 4294901760, %v3286_v26 }
 0x368   : > { %3167 = vmatprep.subr.mxu0 %v8135_v47  ;;  %v3275_v61 = vand.u32 4294901760, %v3274_v58  ;;  %v3304_v31 = vsub.f32 %v8156_v15, %v3303_v38  ;;  %v3218_v3 = vand.u32 4294901760, %v3217_v8  ;;  %v3310_v52 = vsub.f32 %v8168_v48, %v3309_v6 }
 0x369   : > { %3169 = vmatpush1.msra.mxu0 %v8147_v5  ;;  %v3293_v29 = vand.u32 4294901760, %v3292_v56  ;;  %v3228_v10 = vsub.f32 %v8174_v14, %v3227_v45  ;;  %v3238_v59 = vand.u32 4294901760, %v8203_v57  ;;  %v9445_v43 = vmov 0.0  }
 0x36a   : > { %3208 = vmatmul.mubr.f32.vlgmr.msra.gmra.mxu0 %v3207_v30  ;;  %3276 = vmatprep.subr.mxu1 %v3275_v61  ;;  %v3299_v41 = vand.u32 4294901760, %v3298_v17  ;;  %v3316_v34 = vsub.f32 %v8180_v49, %v3315_v23  ;;  %v3305_v18 = vand.u32 4294901760, %v3304_v31  ;;  %v3311_v1 = vand.u32 4294901760, %v3310_v52 }
 0x36b   : > { %3406 = vmatprep.subr.mxu0 %v8162_v13  ;;  %3282 = vmatpush1.msra.mxu1 %v3281_v28  ;;  %v3229_v40 = vand.u32 4294901760, %v3228_v10  ;;  %v3239_v62 = vsub.f32 %v8203_v57, %v3238_v59 }
 0x36c   : > { %3409 = vmatpush1.msra.mxu0 %v8122_v53  ;;  %3288 = vmatprep.subr.mxu1 %v3287_v2  ;;  %v3317_v50 = vand.u32 4294901760, %v3316_v34 }
 0x36d   : > { %3412 = vmatprep.subr.mxu0 %v8130_v22  ;;  %3213 = vmatprep.mubr.f32.mxu0 %v9445_v43  ;;  %v3240_v13 = vand.u32 4294901760, %v3239_v62 }
 0x36e   : > { %3294 = vmatpush1.msra.mxu1 %v3293_v29  ;;  %3415 = vmatpush1.msra.mxu0 %v8143_v9 }
 0x36f   : > { %3219 = vmatmul.mubr.f32.gmra.mxu0 %v3218_v3  ;;  %3300 = vmatprep.subr.mxu1 %v3299_v41  ;;  %v8354_v3 = vpop.permute.xlu0 %3115 }
 0x370   : > { %3418 = vmatprep.subr.mxu0 %v8151_v27  ;;  %3306 = vmatpush1.msra.mxu1 %v3305_v18 }
 0x371   : > { %3421 = vmatpush1.msra.mxu0 %v8156_v15  ;;  %3312 = vmatprep.subr.mxu1 %v3311_v1 }
 0x372   : > { %3424 = vmatprep.subr.mxu0 %v8168_v48  ;;  %3224 = vmatprep.mubr.f32.mxu0 %v9445_v43 }
 0x373   : > { %3318 = vmatpush1.msra.mxu1 %v3317_v50  ;;  %3427 = vmatpush1.msra.mxu0 %v8180_v49  ;;  %v3106_v1 = vpop.permute.xlu0 %3105 }
 0x374   : > { %3230 = vmatmul.mubr.f32.gmra.mxu0 %v3229_v40  ;;  %3353 = vmatmul.mubr.f32.vlgmr.msra.gmra.mxu1 %v8099_v20 }
 0x375   : > { %3518 = vmatprep.subr.mxu1 %v8140_v35  ;;  %3629 = vmatprep.subr.mxu0 %v3273_v60 }
 0x376   : > { %3520 = vmatpush1.msra.mxu1 %v8105_v39  ;;  %3235 = vmatprep.mubr.f32.mxu0 %v9445_v43 }
 0x377   : > { %3522 = vmatprep.subr.mxu1 %v8102_v4  ;;  %3358 = vmatprep.mubr.f32.mxu1 %v9445_v43 }
 0x378   : > { %3524 = vmatpush1.msra.mxu1 %v8117_v32  ;;  %3241 = vmatmul.mubr.f32.gmra.mxu0 %v3240_v13 }
 0x379   : > { %3360 = vmatmul.mubr.f32.gmra.mxu1 %v8114_v42  ;;  %3526 = vmatprep.subr.mxu1 %v8119_v33 }
 0x37a   : > { %3528 = vmatpush1.msra.mxu1 %v8126_v51  ;;  %3365 = vmatprep.mubr.f32.mxu1 %v9445_v43 }
 0x37b   : > { %3530 = vmatprep.subr.mxu1 %v8135_v47  ;;  %3460 = vmatprep.mubr.f32.mxu0 %v9445_v43 }
 0x37c   : > { %3532 = vmatpush1.msra.mxu1 %v8147_v5  ;;  %3463 = vmatmul.mubr.f32.vlgmr.msra.gmra.mxu0 %v8109_v16 }
 0x37d   : > { %3367 = vmatmul.mubr.f32.gmra.mxu1 %v8145_v25  ;;  %3633 = vmatpush1.msra.mxu0 %v3279_v54 }
 0x37e   : > { %3744 = vmatprep.subr.mxu1 %v8140_v35  ;;  %3637 = vmatprep.subr.mxu0 %v3285_v21  ;;  %v8334_v21 = vpop.permute.xlu1 %3110 }
 0x37f   : > { %3641 = vmatpush1.msra.mxu0 %v3291_v63  ;;  %3372 = vmatprep.mubr.f32.mxu1 %v9445_v43 }
 0x380   : > { %3468 = vmatprep.mubr.f32.mxu0 %v9445_v43  ;;  %3645 = vmatprep.subr.mxu0 %v3297_v19 }
 0x381   : > { %3374 = vmatmul.mubr.f32.gmra.mxu1 %v8176_v37  ;;  %3471 = vmatmul.mubr.f32.gmra.mxu0 %v8138_v55 }
 0x382   : > { %3649 = vmatpush1.msra.mxu0 %v3303_v38  ;;  %3476 = vmatprep.mubr.f32.mxu0 %v9445_v43  ;;  %v3101_v49 = vpop.permute.xlu1 %3100 }
 0x383   : > { %3653 = vmatprep.subr.mxu0 %v3309_v6  ;;  %3565 = vmatprep.mubr.f32.mxu1 %v9445_v43 }
 0x384   : > { %3657 = vmatpush1.msra.mxu0 %v3315_v23 }
 0x385   : > { %3479 = vmatmul.mubr.f32.gmra.mxu0 %v8174_v14  ;;  %3569 = vmatmul.mubr.f32.vlgmr.msra.gmra.mxu1 %v3205_v36 }
 0x386   : > { %3746 = vmatpush1.msra.mxu1 %v8105_v39  ;;  %3484 = vmatprep.mubr.f32.mxu0 %v9445_v43 }
 0x387   : > { %3748 = vmatprep.subr.mxu1 %v8102_v4  ;;  %3574 = vmatprep.mubr.f32.mxu1 %v9445_v43 }
 0x388   : > { %3750 = vmatpush1.msra.mxu1 %v8117_v32 }
 0x389   : > { %3752 = vmatprep.subr.mxu1 %v8119_v33  ;;  %3487 = vmatmul.mubr.f32.gmra.mxu0 %v8203_v57 }
 0x38a   : > { %3578 = vmatmul.mubr.f32.gmra.mxu1 %v3216_v46  ;;  %3690 = vmatprep.mubr.f32.mxu0 %v9445_v43 }
 0x38b   : > { %3754 = vmatpush1.msra.mxu1 %v8126_v51  ;;  %3583 = vmatprep.mubr.f32.mxu1 %v9445_v43 }
 0x38c   : > { %3756 = vmatprep.subr.mxu1 %v8135_v47 }
 0x38d   : > { %3758 = vmatpush1.msra.mxu1 %v8147_v5  ;;  %3692 = vmatmul.mubr.f32.vlgmr.msra.gmra.mxu0 %v8099_v20 }
 0x38e   : > { %3587 = vmatmul.mubr.f32.gmra.mxu1 %v3227_v45  ;;  %3697 = vmatprep.mubr.f32.mxu0 %v9445_v43 }
 0x38f   : > { %3592 = vmatprep.mubr.f32.mxu1 %v9445_v43 }
 0x391   : > { %3699 = vmatmul.mubr.f32.gmra.mxu0 %v8114_v42 }
 0x392   : > { %3596 = vmatmul.mubr.f32.gmra.mxu1 %v3238_v59  ;;  %3704 = vmatprep.mubr.f32.mxu0 %v9445_v43 }
 0x393   : > { %3791 = vmatprep.mubr.f32.mxu1 %v9445_v43 }
 0x395   : > { %3706 = vmatmul.mubr.f32.gmra.mxu0 %v8145_v25 }
 0x396   : > { %3793 = vmatmul.mubr.f32.vlgmr.msra.gmra.mxu1 %v8099_v20  ;;  %3711 = vmatprep.mubr.f32.mxu0 %v9445_v43 }
 0x397   : > { %3798 = vmatprep.mubr.f32.mxu1 %v9445_v43 }
 0x399   : > { %3713 = vmatmul.mubr.f32.gmra.mxu0 %v8176_v37 }
 0x39a   : > { %3800 = vmatmul.mubr.f32.gmra.mxu1 %v8114_v42  ;;  %4766 = vmatprep.mubr.f32.mxu0 %v9445_v43 }
 0x39b   : > { %3805 = vmatprep.mubr.f32.mxu1 %v9445_v43 }
 0x39e   : > { %3807 = vmatmul.mubr.f32.gmra.mxu1 %v8145_v25 }
 0x39f   : > { %3812 = vmatprep.mubr.f32.mxu1 %v9445_v43 }
 0x3a2   : > { %3814 = vmatmul.mubr.f32.gmra.mxu1 %v8176_v37 }
 0x3a3   : > { %4882 = vmatprep.mubr.f32.mxu1 %v9445_v43 }
 0x42a   : > { %v3209_v20 = vpop.f32.mrf.mxu0 }
 0x42b   : > { %v3210_v30 = vadd.f32 %v3209_v20, %v3101_v49 }
 0x42c   : > { %v3211_v4 = vpop.f32.mrf.mxu0 }
 0x42d   : > { %v3212_v26 = vadd.f32 %v3211_v4, %v3101_v49 }
 0x42f   : > { %v3220_v39 = vpop.f32.mrf.mxu0 }
 0x430   : > { %v3221_v62 = vadd.f32 %v3220_v39, %v3106_v1 }
 0x431   : > { %v8312_v16 = vpop.f32.mrf.mxu0 }
 0x434   : > { %v8314_v32 = vpop.f32.mrf.mxu0  ;;  %v3354_v42 = vpop.f32.mrf.mxu1 }
 0x435   : > { %v3355_v38 = vadd.f32 %v3354_v42, %v3210_v30 }
 0x436   : > { %v8316_v33 = vpop.f32.mrf.mxu0  ;;  %v3356_v53 = vpop.f32.mrf.mxu1 }
 0x437   : > { %v3357_v61 = vadd.f32 %v3356_v53, %v3212_v26 }
 0x438   : > { %v8318_v51 = vpop.f32.mrf.mxu0 }
 0x439   : > { %v3361_v36 = vpop.f32.mrf.mxu1 }
 0x43a   : > { %v8320_v22 = vpop.f32.mrf.mxu0  ;;  %v3362_v13 = vadd.f32 %v3361_v36, %v3221_v62 }
 0x43b   : > { %v8322_v47 = vpop.f32.mrf.mxu1 }
 0x43c   : > { %v3464_v55 = vpop.f32.mrf.mxu0 }
 0x43d   : > { %v8324_v35 = vpop.f32.mrf.mxu1  ;;  %v3465_v56 = vadd.f32 %v3464_v55, %v3355_v38 }
 0x43e   : > { %v3466_v9 = vpop.f32.mrf.mxu0 }
 0x43f   : > { %v8326_v25 = vpop.f32.mrf.mxu1  ;;  %v3467_v57 = vadd.f32 %v3466_v9, %v3357_v61 }
 0x441   : > { %v8328_v5 = vpop.f32.mrf.mxu1  ;;  %v3472_v54 = vpop.f32.mrf.mxu0 }
 0x442   : > { %v3473_v42 = vadd.f32 %v3472_v54, %v3362_v13 }
 0x443   : > { %v8330_v27 = vpop.f32.mrf.mxu1  ;;  %v8332_v15 = vpop.f32.mrf.mxu0 }
 0x445   : > { %v8336_v46 = vpop.f32.mrf.mxu0  ;;  %v3570_v48 = vpop.f32.mrf.mxu1 }
 0x446   : > { %v3571_v28 = vadd.f32 %v3570_v48, %v3465_v56 }
 0x447   : > { %v8338_v60 = vpop.f32.mrf.mxu0  ;;  %v3572_v63 = vpop.f32.mrf.mxu1 }
 0x448   : > { %v3573_v2 = vadd.f32 %v3572_v63, %v3467_v57  ;;  %v9447_v57 = vmov 2131351028  }
 0x449   : > { %v8340_v14 = vpop.f32.mrf.mxu0 }
 0x44a   : > { %v3579_v37 = vpop.f32.mrf.mxu1 }
 0x44b   : > { %v8342_v0 = vpop.f32.mrf.mxu0  ;;  %v3580_v9 = vadd.f32 %v3579_v37, %v3473_v42 }
 0x44c   : > { %v8344_v19 = vpop.f32.mrf.mxu1 }
 0x44d   : > { %v3693_v8 = vpop.f32.mrf.mxu0 }
 0x44e   : > { %v8346_v58 = vpop.f32.mrf.mxu1  ;;  %v3694_v31 = vadd.f32 %v3693_v8, %v3571_v28 }
 0x44f   : > { %v3695_v17 = vpop.f32.mrf.mxu0 }
 0x450   : > { %v8348_v6 = vpop.f32.mrf.mxu1  ;;  %v3696_v29 = vadd.f32 %v3695_v17, %v3573_v2 }
 0x451   : > { %v3700_v53 = vpop.f32.mrf.mxu0 }
 0x452   : > { %v8350_v45 = vpop.f32.mrf.mxu1  ;;  %v3701_v30 = vadd.f32 %v3700_v53, %v3580_v9 }
 0x454   : > { %v8352_v23 = vpop.f32.mrf.mxu1 }
 0x456   : > { %v3794_v52 = vpop.f32.mrf.mxu1 }
 0x457   : > { %v8356_v10 = vadd.f32 %v3794_v52, %v3694_v31 }
 0x458   : > { %v3796_v59 = vpop.f32.mrf.mxu1 }
 0x459   : > { %v3823_v41 = vand.u32 2139095040, %v8356_v10  ;;  %v8359_v34 = vadd.f32 %v3796_v59, %v3696_v29  ;;  %v9358_v36 = vand.u32 2147483647, %v8356_v10 }
 0x45a   : > { %v3801_v49 = vpop.f32.mrf.mxu1 }
 0x45b   : > { %9446 = vst [vmem:[#allocation9_spill] sm:$0xff] %v8359_v34  ;;  %v3824_v18 = vshrl.u32 %v3823_v41, 23  ;;  %v3927_v40 = vand.u32 2139095040, %v8359_v34  ;;  %v8362_v8 = vadd.f32 %v3801_v49, %v3701_v30 }
 0x45d   : > { %v5463_v50 = vadd.s32 4294967169, %v3824_v18  ;;  %v3928_v4 = vshrl.u32 %v3927_v40, 23  ;;  %v4031_v52 = vand.u32 2139095040, %v8362_v8  ;;  %v3827_v40 = vand.u32 8388607, %v9358_v36 }
 0x45f   : > { %v3830_v20 = vadd.s32 1, %v5463_v50  ;;  %v5467_v63 = vadd.s32 4294967169, %v3928_v4  ;;  %v4032_v42 = vshrl.u32 %v4031_v52, 23  ;;  %v3828_v9 = vor.u32 8388608, %v3827_v40 }
 0x461   : > { %vm3831_vm3 = vcmp.gt.s32.totalorder %v3830_v20, 0  ;;  %v3934_v38 = vadd.s32 1, %v5467_v63 }
 0x462   : > { %v3832_v55 = vsel %vm3831_vm3, %v3830_v20, 0 }
 0x463   : > { %v3834_v48 = vand.u32 31, %v3832_v55  ;;  %v8367_v56 = vshrl.u32 %v3832_v55, 5  ;;  %vm3935_vm7 = vcmp.gt.s32.totalorder %v3934_v38, 0  ;;  %v3223_v55 = vadd.f32 %v8312_v16, %v3106_v1 }
 0x464   : > { %v3936_v4 = vsel %vm3935_vm7, %v3934_v38, 0  ;;  %v5471_v1 = vadd.s32 4294967169, %v4032_v42 }
 0x465   : > { %v3835_v26 = vsub.s32 32, %v3834_v48  ;;  %v3846_v54 = vshll.u32 %v9399_v12, %v3834_v48  ;;  %v3849_v2 = vshll.u32 %v9400_v7, %v3834_v48  ;;  %v3837_v29 = vshll.u32 %v9398_v11, %v3834_v48 }
 0x466   : > { %v3840_v59 = vshll.u32 %v9403_v44, %v3834_v48  ;;  %v3843_v41 = vshll.u32 %v9447_v57, %v3834_v48  ;;  %vm3855_vm9 = vcmp.lt.s32.totalorder %v8367_v56, 4  ;;  %vm3852_vm11 = vcmp.lt.s32.totalorder %v8367_v56, 1 }
 0x467   : > { %v3847_v61 = vshrl.u32 %v9400_v7, %v3835_v26  ;;  %v3850_v39 = vshrl.u32 %v9397_v24, %v3835_v26  ;;  %v3838_v37 = vshrl.u32 %v9403_v44, %v3835_v26  ;;  %v3841_v28 = vshrl.u32 %v9447_v57, %v3835_v26 }
 0x468   : > { %v3844_v17 = vshrl.u32 %v9399_v12, %v3835_v26  ;;  %vm3854_vm10 = vcmp.lt.s32.totalorder %v8367_v56, 3  ;;  %v3938_v49 = vand.u32 31, %v3936_v4  ;;  %v3364_v30 = vadd.f32 %v8322_v47, %v3223_v55  ;;  %v3803_v55 = vpop.f32.mrf.mxu1 }
 0x469   : > { %v3848_v31 = vor.u32 %v3847_v61, %v3846_v54  ;;  %v3851_v18 = vor.u32 %v3850_v39, %v3849_v2  ;;  %v3839_v62 = vor.u32 %v3838_v37, %v3837_v29  ;;  %v3842_v50 = vor.u32 %v3841_v28, %v3840_v59  ;;  %v3702_v54 = vpop.f32.mrf.mxu0 }
 0x46a   : > { %v3845_v13 = vor.u32 %v3844_v17, %v3843_v41  ;;  %vm3853_vm14 = vcmp.lt.s32.totalorder %v8367_v56, 2  ;;  %v3475_v61 = vadd.f32 %v8332_v15, %v3364_v30  ;;  %v8403_v28 = vshll.u32 %v3828_v9, 8 }
 0x46b   : > { %v3861_v20 = vsel %vm3855_vm9, %v3848_v31, 920167782  ;;  %v3865_v53 = vsel %vm3855_vm9, %v3851_v18, 1326507024  ;;  %v3860_v48 = vsel %vm3852_vm11, %v3839_v62, %v3842_v50  ;;  %v8405_v47 = vsub.s32 32, %v3938_v49 }
 0x46c   : > { %v3862_v63 = vsel %vm3854_vm10, %v3845_v13, %v3861_v20  ;;  %v3864_v38 = vsel %vm3852_vm11, %v3842_v50, %v3845_v13  ;;  %v3866_v16 = vsel %vm3854_vm10, %v3848_v31, %v3865_v53  ;;  %v3582_v17 = vadd.f32 %v8344_v19, %v3475_v61 }
 0x46d   : > { %v3863_v39 = vsel %vm3853_vm14, %v3860_v48, %v3862_v63  ;;  %v3867_v37 = vsel %vm3853_vm14, %v3864_v38, %v3866_v16  ;;  %v4038_v2 = vadd.s32 1, %v5471_v1  ;;  %v3836_v41 = vshrl.u32 %v9398_v11, %v3835_v26 }
 0x46e   : > { %v8409_v31 = vmul.u32.u64.low %v8403_v28, %v3863_v39  ;;  %v8410_v52 = vmul.u32.u64.high %v8403_v28, %v3863_v39, %v8409_v31  ;;  %v3703_v15 = vadd.f32 %v3702_v54, %v3582_v17  ;;  %v3857_v18 = vsel %vm3855_vm9, %v3845_v13, 2102212464 }
 0x46f   : > { %v8414_v29 = vmul.u32.u64.low %v8403_v28, %v3867_v37  ;;  %v8415_v59 = vmul.u32.u64.high %v8403_v28, %v3867_v37, %v8414_v29  ;;  %v3951_v40 = vshrl.u32 %v9400_v7, %v8405_v47  ;;  %vm4039_vm2 = vcmp.gt.s32.totalorder %v4038_v2, 0 }
 0x470   : > { %v9357_v19 = vand.u32 2147483647, %v8359_v34  ;;  %v8423_v20 = vshrl.u32 %v3936_v4, 5  ;;  %v3954_v42 = vshrl.u32 %v9397_v24, %v8405_v47  ;;  %v4040_v53 = vsel %vm4039_vm2, %v4038_v2, 0 }
 0x471   : > { %v3856_v9 = vsel %vm3852_vm11, %v3836_v41, %v3839_v62  ;;  %v3942_v26 = vshrl.u32 %v9403_v44, %v8405_v47  ;;  %v3950_v13 = vshll.u32 %v9399_v12, %v3938_v49  ;;  %v4042_v48 = vand.u32 31, %v4040_v53 }
 0x472   : > { %v3858_v63 = vsel %vm3854_vm10, %v3842_v50, %v3857_v18  ;;  %v3945_v4 = vshrl.u32 %v9447_v57, %v8405_v47  ;;  %v3948_v30 = vshrl.u32 %v9399_v12, %v8405_v47  ;;  %v3953_v38 = vshll.u32 %v9400_v7, %v3938_v49 }
 0x473   : > { %v3941_v16 = vshll.u32 %v9398_v11, %v3938_v49  ;;  %v3952_v62 = vor.u32 %v3951_v40, %v3950_v13  ;;  %v8440_v1 = vadd.f32 %v3803_v55, %v3703_v15  ;;  %v3931_v61 = vand.u32 8388607, %v9357_v19 }
 0x474   : > { %v3944_v39 = vshll.u32 %v9403_v44, %v3938_v49  ;;  %v3947_v50 = vshll.u32 %v9447_v57, %v3938_v49  ;;  %v3955_v54 = vor.u32 %v3954_v42, %v3953_v38  ;;  %v3859_v37 = vsel %vm3853_vm14, %v3856_v9, %v3858_v63 }
 0x475   : > { %v3878_v17 = vadd.s32 1, %v8410_v52  ;;  %v8449_v2 = vor.u32 %v3942_v26, %v3941_v16  ;;  %v8451_v29 = vsub.s32 32, %v4042_v48  ;;  %vm3877_vm0 = vc.u32 %v8415_v59, %v8409_v31 }
 0x476   : > { %v8455_v15 = vor.u32 %v3945_v4, %v3944_v39  ;;  %v8457_v41 = vor.u32 %v3948_v30, %v3947_v50  ;;  %vm3959_vm1 = vcmp.lt.s32.totalorder %v8423_v20, 4  ;;  %v4135_v56 = vand.u32 2139095040, %v8440_v1 }
 0x477   : > { %v3965_v49 = vsel %vm3959_vm1, %v3952_v62, 920167782  ;;  %v3875_v18 = vmul.u32 %v8403_v28, %v3859_v37  ;;  %v3932_v40 = vor.u32 8388608, %v3931_v61  ;;  %v3969_v42 = vsel %vm3959_vm1, %v3955_v54, 1326507024 }
 0x478   : > { %v9362_v55 = vand.u32 2147483647, %v8362_v8  ;;  %v3879_v9 = vsel %vm3877_vm0, %v3878_v17, %v8410_v52  ;;  %vm3956_vm4 = vcmp.lt.s32.totalorder %v8423_v20, 1  ;;  %vm3958_vm8 = vcmp.lt.s32.totalorder %v8423_v20, 3 }
 0x479   : > { %v4055_v26 = vshrl.u32 %v9400_v7, %v8451_v29  ;;  %v3964_v28 = vsel %vm3956_vm4, %v8449_v2, %v8455_v15  ;;  %v3966_v13 = vsel %vm3958_vm8, %v8457_v41, %v3965_v49  ;;  %v3968_v52 = vsel %vm3956_vm4, %v8455_v15, %v8457_v41 }
 0x47a   : > { %v4058_v63 = vshrl.u32 %v9397_v24, %v8451_v29  ;;  %v3970_v4 = vsel %vm3958_vm8, %v3952_v62, %v3969_v42  ;;  %v8487_v30 = vshrl.u32 %v4040_v53, 5  ;;  %v4054_v38 = vshll.u32 %v9399_v12, %v4042_v48 }
 0x47b   : > { %v4136_v16 = vshrl.u32 %v4135_v56, 23  ;;  %v4046_v61 = vshrl.u32 %v9403_v44, %v8451_v29  ;;  %v4049_v39 = vshrl.u32 %v9447_v57, %v8451_v29  ;;  %v4052_v50 = vshrl.u32 %v9399_v12, %v8451_v29 }
 0x47c   : > { %v4057_v54 = vshll.u32 %v9400_v7, %v4042_v48  ;;  %v8497_v37 = vadd.s32 %v3879_v9, %v3875_v18  ;;  %vm3957_vm12 = vcmp.lt.s32.totalorder %v8423_v20, 2  ;;  %v4035_v53 = vand.u32 8388607, %v9362_v55 }
 0x47d   : > { %v4056_v62 = vor.u32 %v4055_v26, %v4054_v38  ;;  %v4045_v17 = vshll.u32 %v9398_v11, %v4042_v48  ;;  %v4048_v49 = vshll.u32 %v9403_v44, %v4042_v48  ;;  %v4051_v56 = vshll.u32 %v9447_v57, %v4042_v48 }
 0x47e   : > { %v4059_v42 = vor.u32 %v4058_v63, %v4057_v54  ;;  %v3967_v19 = vsel %vm3957_vm12, %v3964_v28, %v3966_v13  ;;  %v3971_v18 = vsel %vm3957_vm12, %v3968_v52, %v3970_v4  ;;  %v8509_v9 = vshll.u32 %v3932_v40, 8 }
 0x47f   : > { %v5475_v36 = vadd.s32 4294967169, %v4136_v16  ;;  %v4047_v43 = vor.u32 %v4046_v61, %v4045_v17  ;;  %v4050_v34 = vor.u32 %v4049_v39, %v4048_v49  ;;  %v4053_v55 = vor.u32 %v4052_v50, %v4051_v56 }
 0x480   : > { %vm4063_vm13 = vcmp.lt.s32.totalorder %v8487_v30, 4  ;;  %v3232_v26 = vadd.f32 %v8314_v32, %v8334_v21  ;;  %v3881_v63 = vadd.s32 536870912, %v8497_v37  ;;  %vm4060_vm15 = vcmp.lt.s32.totalorder %v8487_v30, 1 }
 0x481   : > { %v4069_v48 = vsel %vm4063_vm13, %v4056_v62, 920167782  ;;  %v8518_v28 = vmul.u32.u64.low %v8509_v9, %v3967_v19  ;;  %v8519_v13 = vmul.u32.u64.high %v8509_v9, %v3967_v19, %v8518_v28  ;;  %v4073_v40 = vsel %vm4063_vm13, %v4059_v42, 1326507024 }
 0x482   : > { %v8525_v52 = vmul.u32.u64.low %v8509_v9, %v3971_v18  ;;  %v8526_v4 = vmul.u32.u64.high %v8509_v9, %v3971_v18, %v8525_v52  ;;  %vm4062_vm5 = vcmp.lt.s32.totalorder %v8487_v30, 3  ;;  %v4036_v32 = vor.u32 8388608, %v4035_v53 }
 0x483   : > { %v4068_v38 = vsel %vm4060_vm15, %v4047_v43, %v4050_v34  ;;  %v4070_v19 = vsel %vm4062_vm5, %v4053_v55, %v4069_v48  ;;  %v4142_v16 = vadd.s32 1, %v5475_v36  ;;  %v3369_v61 = vadd.f32 %v8324_v35, %v3232_v26 }
 0x484   : > { %v4072_v39 = vsel %vm4060_vm15, %v4050_v34, %v4053_v55  ;;  %v4074_v50 = vsel %vm4062_vm5, %v4056_v62, %v4073_v40  ;;  %vm4061_vm6 = vcmp.lt.s32.totalorder %v8487_v30, 2  ;;  %v8541_v53 = vshrl.u32 %v3881_v63, 30  ;;  %v3707_v62 = vpop.f32.mrf.mxu0 }
 0x485   : > { %vm4143_vm3 = vcmp.gt.s32.totalorder %v4142_v16, 0  ;;  %v3481_v54 = vadd.f32 %v8336_v46, %v3369_v61  ;;  %v4071_v17 = vsel %vm4061_vm6, %v4068_v38, %v4070_v19  ;;  %v4075_v35 = vsel %vm4061_vm6, %v4072_v39, %v4074_v50 }
 0x486   : > { %v4144_v49 = vsel %vm4143_vm3, %v4142_v16, 0  ;;  %v8547_v36 = vshll.u32 %v4036_v32, 8  ;;  %v3961_v18 = vsel %vm3959_vm1, %v8457_v41, 2102212464  ;;  %v9363_v46 = vand.u32 2147483647, %v8440_v1  ;;  %v3808_v41 = vpop.f32.mrf.mxu1 }
 0x487   : > { %v4146_v56 = vand.u32 31, %v4144_v49  ;;  %v3589_v42 = vadd.f32 %v8346_v58, %v3481_v54  ;;  %v3940_v26 = vshrl.u32 %v9398_v11, %v8405_v47  ;;  %v3883_v52 = vshll.u32 %v8541_v53, 30 }
 0x488   : > { %v8557_v48 = vmul.u32.u64.low %v8547_v36, %v4071_v17  ;;  %v8558_v63 = vmul.u32.u64.high %v8547_v36, %v4071_v17, %v8557_v48  ;;  %v3982_v58 = vadd.s32 1, %v8519_v13  ;;  %v3962_v16 = vsel %vm3958_vm8, %v8455_v15, %v3961_v18 }
 0x489   : > { %v8561_v40 = vsub.s32 32, %v4146_v56  ;;  %v8566_v32 = vmul.u32.u64.low %v8547_v36, %v4075_v35  ;;  %v8567_v38 = vmul.u32.u64.high %v8547_v36, %v4075_v35, %v8566_v32  ;;  %v3708_v19 = vadd.f32 %v3707_v62, %v3589_v42 }
 0x48a   : > { %v3960_v47 = vsel %vm3956_vm4, %v3940_v26, %v8449_v2  ;;  %vm3981_vm7 = vc.u32 %v8526_v4, %v8518_v28  ;;  %v4044_v61 = vshrl.u32 %v9398_v11, %v8451_v29  ;;  %v4065_v39 = vsel %vm4063_vm13, %v4053_v55, 2102212464 }
 0x48b   : > { %v4139_v50 = vand.u32 8388607, %v9363_v46  ;;  %v4150_v54 = vshrl.u32 %v9403_v44, %v8561_v40  ;;  %v4153_v2 = vshrl.u32 %v9447_v57, %v8561_v40  ;;  %v8587_v17 = vadd.f32 %v3808_v41, %v3708_v19 }
 0x48c   : > { %v8590_v15 = vsub.s32 %v8497_v37, %v3883_v52  ;;  %v3963_v29 = vsel %vm3957_vm12, %v3960_v47, %v3962_v16  ;;  %v3983_v35 = vsel %vm3981_vm7, %v3982_v58, %v8519_v13  ;;  %v4064_v55 = vsel %vm4060_vm15, %v4044_v61, %v4047_v43 }
 0x48d   : > { %v4066_v42 = vsel %vm4062_vm5, %v4050_v34, %v4065_v39  ;;  %v4149_v62 = vshll.u32 %v9398_v11, %v4146_v56  ;;  %v4152_v18 = vshll.u32 %v9403_v44, %v4146_v56  ;;  %v4156_v26 = vshrl.u32 %v9399_v12, %v8561_v40 }
 0x48e   : > { %v4145_v37 = vshrl.u32 %v4144_v49, 5  ;;  %v4158_v52 = vshll.u32 %v9399_v12, %v4146_v56  ;;  %v4159_v20 = vshrl.u32 %v9400_v7, %v8561_v40  ;;  %v4162_v13 = vshrl.u32 %v9397_v24, %v8561_v40 }
 0x48f   : > { %v4086_v43 = vadd.s32 1, %v8558_v63  ;;  %v4151_v58 = vor.u32 %v4150_v54, %v4149_v62  ;;  %v4154_v34 = vor.u32 %v4153_v2, %v4152_v18  ;;  %v4155_v32 = vshll.u32 %v9447_v57, %v4146_v56 }
 0x490   : > { %v3979_v41 = vmul.u32 %v8509_v9, %v3963_v29  ;;  %vm4085_vm9 = vc.u32 %v8567_v38, %v8557_v48  ;;  %v4160_v49 = vor.u32 %v4159_v20, %v4158_v52  ;;  %v4161_v19 = vshll.u32 %v9400_v7, %v4146_v56 }
 0x491   : > { %v4067_v47 = vsel %vm4061_vm6, %v4064_v55, %v4066_v42  ;;  %v4140_v16 = vor.u32 8388608, %v4139_v50  ;;  %v4157_v61 = vor.u32 %v4156_v26, %v4155_v32  ;;  %v3886_v39 = vsub.s32 0, %v8590_v15 }
 0x492   : > { %v3984_v46 = vadd.s32 %v3983_v35, %v3979_v41  ;;  %v4163_v54 = vor.u32 %v4162_v13, %v4161_v19  ;;  %vm4164_vm11 = vcmp.lt.s32.totalorder %v4145_v37, 1  ;;  %v4087_v2 = vsel %vm4085_vm9, %v4086_v43, %v8558_v63 }
 0x493   : > { %vm4167_vm10 = vcmp.lt.s32.totalorder %v4145_v37, 4  ;;  %v4172_v9 = vsel %vm4164_vm11, %v4151_v58, %v4154_v34  ;;  %v4239_v29 = vand.u32 2139095040, %v8587_v17  ;;  %v4083_v62 = vmul.u32 %v8547_v36, %v4067_v47 }
 0x494   : > { %vm4166_vm14 = vcmp.lt.s32.totalorder %v4145_v37, 3  ;;  %v4173_v56 = vsel %vm4167_vm10, %v4160_v49, 920167782  ;;  %vm4165_vm2 = vcmp.lt.s32.totalorder %v4145_v37, 2  ;;  %v4176_v50 = vsel %vm4164_vm11, %v4154_v34, %v4157_v61 }
 0x495   : > { %v4174_v30 = vsel %vm4166_vm14, %v4157_v61, %v4173_v56  ;;  %v4180_v55 = vshll.u32 %v4140_v16, 8  ;;  %v5464_v35 = vmin.u32 %v3886_v39, %v8590_v15  ;;  %v4088_v42 = vadd.s32 %v4087_v2, %v4083_v62 }
 0x496   : > { %v4175_v63 = vsel %vm4165_vm2, %v4172_v9, %v4174_v30  ;;  %v4177_v18 = vsel %vm4167_vm10, %v4163_v54, 1326507024  ;;  %v3985_v26 = vadd.s32 536870912, %v3984_v46  ;;  %v4169_v52 = vsel %vm4167_vm10, %v4157_v61, 2102212464 }
 0x497   : > { %v4178_v20 = vsel %vm4166_vm14, %v4160_v49, %v4177_v18  ;;  %v4240_v13 = vshrl.u32 %v4239_v29, 23  ;;  %v4148_v36 = vshrl.u32 %v9398_v11, %v8561_v40  ;;  %v3234_v19 = vadd.f32 %v8316_v33, %v8334_v21 }
 0x498   : > { %v4179_v43 = vsel %vm4165_vm2, %v4176_v50, %v4178_v20  ;;  %v8629_v32 = vmul.u32.u64.low %v4180_v55, %v4175_v63  ;;  %v8630_v41 = vmul.u32.u64.high %v4180_v55, %v4175_v63, %v8629_v32  ;;  %v3243_v49 = vadd.f32 %v8318_v51, %v8354_v3 }
 0x499   : > { %v8635_v47 = vmul.u32.u64.low %v4180_v55, %v4179_v43  ;;  %v8636_v16 = vmul.u32.u64.high %v4180_v55, %v4179_v43, %v8635_v47  ;;  %v5479_v39 = vadd.s32 4294967169, %v4240_v13  ;;  %v4089_v61 = vadd.s32 536870912, %v4088_v42 }
 0x49a   : > { %v4168_v54 = vsel %vm4164_vm11, %v4148_v36, %v4151_v58  ;;  %v4170_v40 = vsel %vm4166_vm14, %v4154_v34, %v4169_v52  ;;  %v3371_v2 = vadd.f32 %v8326_v25, %v3234_v19  ;;  %v3888_v9 = vclz %v5464_v35  ;;  %v3709_v34 = vpop.f32.mrf.mxu0 }
 0x49b   : > { %v8643_v29 = vshrl.u32 %v3985_v26, 30  ;;  %v4246_v62 = vadd.s32 1, %v5479_v39  ;;  %v4190_v33 = vadd.s32 1, %v8630_v41  ;;  %v3376_v21 = vadd.f32 %v8328_v5, %v3243_v49  ;;  %v3810_v26 = vpop.f32.mrf.mxu1 }
 0x49c   : > { %v3483_v56 = vadd.f32 %v8338_v60, %v3371_v2  ;;  %v4171_v30 = vsel %vm4165_vm2, %v4168_v54, %v4170_v40  ;;  %v8649_v51 = vshrl.u32 %v4089_v61, 30  ;;  %vm4189_vm0 = vc.u32 %v8636_v16, %v8629_v32  ;;  %v3714_v61 = vpop.f32.mrf.mxu0 }
 0x49d   : > { %v9365_v58 = vand.u32 2147483647, %v8587_v17  ;;  %vm4247_vm1 = vcmp.gt.s32.totalorder %v4246_v62, 0  ;;  %v5465_v25 = vadd.s32 4294967294, %v3888_v9  ;;  %v3987_v50 = vshll.u32 %v8643_v29, 30 }
 0x49e   : > { %9448 = vst [vmem:[#allocation11_spill] sm:$0xff] %v8649_v51  ;;  %v4191_v35 = vsel %vm4189_vm0, %v4190_v33, %v8630_v41  ;;  %v4248_v63 = vsel %vm4247_vm1, %v4246_v62, 0  ;;  %v3591_v5 = vadd.f32 %v8348_v6, %v3483_v56  ;;  %v4187_v60 = vmul.u32 %v4180_v55, %v4171_v30 }
 0x49f   : > { %v4250_v37 = vand.u32 31, %v4248_v63  ;;  %v3489_v18 = vadd.f32 %v8340_v14, %v3376_v21  ;;  %v4091_v20 = vshll.u32 %v8649_v51, 30  ;;  %vm5466_vm4 = vcmp.lt.s32.totalorder %v5465_v25, 0 }
 0x4a0   : > { %v3710_v52 = vadd.f32 %v3709_v34, %v3591_v5  ;;  %v4192_v13 = vadd.s32 %v4191_v35, %v4187_v60  ;;  %v8660_v19 = vsub.s32 %v3984_v46, %v3987_v50  ;;  %v4243_v41 = vand.u32 8388607, %v9365_v58 }
 0x4a1   : > { %v4251_v36 = vsub.s32 32, %v4250_v37  ;;  %v3598_v43 = vadd.f32 %v8350_v45, %v3489_v18  ;;  %v4253_v6 = vshll.u32 %v9398_v11, %v4250_v37  ;;  %v4256_v39 = vshll.u32 %v9403_v44, %v4250_v37 }
 0x4a2   : > { %v8667_v47 = vadd.f32 %v3810_v26, %v3710_v52  ;;  %v4262_v45 = vshll.u32 %v9399_v12, %v4250_v37  ;;  %v8673_v54 = vsub.s32 %v4088_v42, %v4091_v20  ;;  %v4193_v40 = vadd.s32 536870912, %v4192_v13 }
 0x4a3   : > { %v4254_v55 = vshrl.u32 %v9403_v44, %v4251_v36  ;;  %v4257_v14 = vshrl.u32 %v9447_v57, %v4251_v36  ;;  %v4260_v49 = vshrl.u32 %v9399_v12, %v4251_v36  ;;  %v4263_v46 = vshrl.u32 %v9400_v7, %v4251_v36 }
 0x4a4   : > { %v4249_v2 = vshrl.u32 %v4248_v63, 5  ;;  %v4259_v9 = vshll.u32 %v9447_v57, %v4250_v37  ;;  %v4266_v56 = vshrl.u32 %v9397_v24, %v4251_v36  ;;  %v4265_v34 = vshll.u32 %v9400_v7, %v4250_v37 }
 0x4a5   : > { %v4255_v62 = vor.u32 %v4254_v55, %v4253_v6  ;;  %v4258_v33 = vor.u32 %v4257_v14, %v4256_v39  ;;  %v4264_v21 = vor.u32 %v4263_v46, %v4262_v45  ;;  %v4343_v50 = vand.u32 2139095040, %v8667_v47 }
 0x4a6   : > { %v4261_v30 = vor.u32 %v4260_v49, %v4259_v9  ;;  %v8680_v35 = vsel %vm5466_vm4, 0, %v5465_v25  ;;  %v3715_v5 = vadd.f32 %v3714_v61, %v3598_v43  ;;  %v4244_v42 = vor.u32 8388608, %v4243_v41 }
 0x4a7   : > { %v8682_v60 = vshrl.u32 %v4193_v40, 30  ;;  %v4267_v63 = vor.u32 %v4266_v56, %v4265_v34  ;;  %vm4268_vm8 = vcmp.lt.s32.totalorder %v4249_v2, 1  ;;  %vm4271_vm12 = vcmp.lt.s32.totalorder %v4249_v2, 4 }
 0x4a8   : > { %v3990_v18 = vsub.s32 0, %v8660_v19  ;;  %v4094_v26 = vsub.s32 0, %v8673_v54  ;;  %v4276_v52 = vsel %vm4268_vm8, %v4255_v62, %v4258_v33  ;;  %v4277_v20 = vsel %vm4271_vm12, %v4264_v21, 920167782 }
 0x4a9   : > { %v4252_v37 = vshrl.u32 %v9398_v11, %v4251_v36  ;;  %vm4270_vm13 = vcmp.lt.s32.totalorder %v4249_v2, 3  ;;  %v4273_v25 = vsel %vm4271_vm12, %v4261_v30, 2102212464  ;;  %v4344_v6 = vshrl.u32 %v4343_v50, 23  ;;  %v3815_v36 = vpop.f32.mrf.mxu1 }
 0x4aa   : > { %vm4269_vm15 = vcmp.lt.s32.totalorder %v4249_v2, 2  ;;  %v4278_v43 = vsel %vm4270_vm13, %v4261_v30, %v4277_v20  ;;  %v4280_v41 = vsel %vm4268_vm8, %v4258_v33, %v4261_v30  ;;  %v4284_v55 = vshll.u32 %v4244_v42, 8 }
 0x4ab   : > { %v4195_v14 = vshll.u32 %v8682_v60, 30  ;;  %v4272_v39 = vsel %vm4268_vm8, %v4252_v37, %v4255_v62  ;;  %v4279_v49 = vsel %vm4269_vm15, %v4276_v52, %v4278_v43  ;;  %v4281_v45 = vsel %vm4271_vm12, %v4267_v63, 1326507024 }
 0x4ac   : > { %v4274_v46 = vsel %vm4270_vm13, %v4258_v33, %v4273_v25  ;;  %v4282_v61 = vsel %vm4270_vm13, %v4264_v21, %v4281_v45  ;;  %v8692_v40 = vmul.u32.u64.low %v4284_v55, %v4279_v49  ;;  %v8693_v9 = vmul.u32.u64.high %v4284_v55, %v4279_v49, %v8692_v40 }
 0x4ad   : > { %v3896_v56 = vsub.s32 4294967266, %v8680_v35  ;;  %v5468_v34 = vmin.u32 %v3990_v18, %v8660_v19  ;;  %v4283_v30 = vsel %vm4269_vm15, %v4280_v41, %v4282_v61  ;;  %v5483_v50 = vadd.s32 4294967169, %v4344_v6 }
 0x4ae   : > { %v3245_v62 = vadd.f32 %v8320_v22, %v8354_v3  ;;  %v5472_v42 = vmin.u32 %v4094_v26, %v8673_v54  ;;  %v8702_v63 = vmul.u32.u64.low %v4284_v55, %v4283_v30  ;;  %v8703_v33 = vmul.u32.u64.high %v4284_v55, %v4283_v30, %v8702_v63 }
 0x4af   : > { %v8705_v21 = vsub.s32 %v4192_v13, %v4195_v14  ;;  %v4275_v52 = vsel %vm4269_vm15, %v4272_v39, %v4274_v46  ;;  %v4350_v20 = vadd.s32 1, %v5483_v50  ;;  %v8708_v37 = vadd.f32 %v3815_v36, %v3715_v5 }
 0x4b0   : > { %v3378_v18 = vadd.f32 %v8330_v27, %v3245_v62  ;;  %v3876_v25 = vadd.s32 %v8409_v31, %v8415_v59  ;;  %v4294_v6 = vadd.s32 1, %v8693_v9  ;;  %v3892_v22 = vsub.s32 32, %v8680_v35 }
 0x4b1   : > { %v3897_v3 = vadd.s32 127, %v3896_v56  ;;  %v3992_v26 = vclz %v5468_v34  ;;  %vm4351_vm5 = vcmp.gt.s32.totalorder %v4350_v20, 0  ;;  %v4096_v43 = vclz %v5472_v42 }
 0x4b2   : > { %v4291_v13 = vmul.u32 %v4284_v55, %v4275_v52  ;;  %vm4293_vm6 = vc.u32 %v8703_v33, %v8692_v40  ;;  %v4352_v2 = vsel %vm4351_vm5, %v4350_v20, 0  ;;  %v4198_v5 = vsub.s32 0, %v8705_v21 }
 0x4b3   : > { %v4295_v27 = vsel %vm4293_vm6, %v4294_v6, %v8693_v9  ;;  %v9364_v41 = vand.u32 2147483647, %v8667_v47  ;;  %v4447_v31 = vand.u32 2139095040, %v8708_v37  ;;  %v4354_v14 = vand.u32 31, %v4352_v2 }
 0x4b4   : > { %v4296_v59 = vadd.s32 %v4295_v27, %v4291_v13  ;;  %v3491_v39 = vadd.f32 %v8342_v0, %v3378_v18  ;;  %v3893_v49 = vshll.u32 %v8590_v15, %v8680_v35  ;;  %v3894_v55 = vshrl.u32 %v3876_v25, %v3892_v22 }
 0x4b5   : > { %v3898_v45 = vshll.u32 %v3897_v3, 23  ;;  %v5469_v46 = vadd.s32 4294967294, %v3992_v26  ;;  %v5473_v61 = vadd.s32 4294967294, %v4096_v43  ;;  %v4355_v56 = vsub.s32 32, %v4354_v14 }
 0x4b6   : > { %v4297_v36 = vadd.s32 536870912, %v4296_v59  ;;  %v5476_v34 = vmin.u32 %v4198_v5, %v8705_v21  ;;  %v4347_v9 = vand.u32 8388607, %v9364_v41  ;;  %v4357_v30 = vshll.u32 %v9398_v11, %v4354_v14 }
 0x4b7   : > { %v4448_v50 = vshrl.u32 %v4447_v31, 23  ;;  %v4358_v0 = vshrl.u32 %v9403_v44, %v4355_v56  ;;  %v4360_v15 = vshll.u32 %v9403_v44, %v4354_v14  ;;  %v4361_v35 = vshrl.u32 %v9447_v57, %v4355_v56 }
 0x4b8   : > { %v8728_v62 = vshrl.u32 %v4297_v36, 30  ;;  %v4363_v42 = vshll.u32 %v9447_v57, %v4354_v14  ;;  %v4364_v63 = vshrl.u32 %v9399_v12, %v4355_v56  ;;  %v4366_v52 = vshll.u32 %v9399_v12, %v4354_v14 }
 0x4b9   : > { %v4367_v20 = vshrl.u32 %v9400_v7, %v4355_v56  ;;  %v4353_v25 = vshrl.u32 %v4352_v2, 5  ;;  %v4359_v6 = vor.u32 %v4358_v0, %v4357_v30  ;;  %v4369_v22 = vshll.u32 %v9400_v7, %v4354_v14 }
 0x4ba   : > { %v4299_v18 = vshll.u32 %v8728_v62, 30  ;;  %v4362_v3 = vor.u32 %v4361_v35, %v4360_v15  ;;  %v4365_v26 = vor.u32 %v4364_v63, %v4363_v42  ;;  %v4370_v13 = vshrl.u32 %v9397_v24, %v4355_v56 }
 0x4bb   : > { %v4368_v43 = vor.u32 %v4367_v20, %v4366_v52  ;;  %v3600_v5 = vadd.f32 %v8352_v23, %v3491_v39  ;;  %v3895_v27 = vor.u32 %v3894_v55, %v3893_v49  ;;  %v4200_v31 = vclz %v5476_v34  ;;  %v3716_v34 = vpop.f32.mrf.mxu0 }
 0x4bc   : > { %v4348_v36 = vor.u32 8388608, %v4347_v9  ;;  %v3899_v41 = vor.u32 4788187, %v3898_v45  ;;  %vm5470_vm3 = vcmp.lt.s32.totalorder %v5469_v46, 0  ;;  %vm5474_vm7 = vcmp.lt.s32.totalorder %v5473_v61, 0 }
 0x4bd   : > { %v4371_v58 = vor.u32 %v4370_v13, %v4369_v22  ;;  %v8741_v51 = vsub.s32 %v4296_v59, %v4299_v18  ;;  %vm4372_vm9 = vcmp.lt.s32.totalorder %v4353_v25, 1  ;;  %vm4375_vm11 = vcmp.lt.s32.totalorder %v4353_v25, 4 }
 0x4be   : > { %v5487_v2 = vadd.s32 4294967169, %v4448_v50  ;;  %v4356_v14 = vshrl.u32 %v9398_v11, %v4355_v56  ;;  %v4377_v30 = vsel %vm4375_vm11, %v4365_v26, 2102212464  ;;  %v4380_v0 = vsel %vm4372_vm9, %v4359_v6, %v4362_v3 }
 0x4bf   : > { %v4381_v15 = vsel %vm4375_vm11, %v4368_v43, 920167782  ;;  %v5477_v35 = vadd.s32 4294967294, %v4200_v31  ;;  %vm4374_vm10 = vcmp.lt.s32.totalorder %v4353_v25, 3  ;;  %v4384_v23 = vsel %vm4372_vm9, %v4362_v3, %v4365_v26 }
 0x4c0   : > { %v4388_v39 = vshll.u32 %v4348_v36, 8  ;;  %vm4373_vm14 = vcmp.lt.s32.totalorder %v4353_v25, 2  ;;  %v4376_v49 = vsel %vm4372_vm9, %v4356_v14, %v4359_v6  ;;  %v4382_v55 = vsel %vm4374_vm10, %v4365_v26, %v4381_v15  ;;  %v3817_v14 = vpop.f32.mrf.mxu1 }
 0x4c1   : > { %v4385_v45 = vsel %vm4375_vm11, %v4371_v58, 1326507024  ;;  %v4302_v59 = vsub.s32 0, %v8741_v51  ;;  %v4378_v9 = vsel %vm4374_vm10, %v4362_v3, %v4377_v30  ;;  %v4383_v42 = vsel %vm4373_vm14, %v4380_v0, %v4382_v55 }
 0x4c2   : > { %v4386_v50 = vsel %vm4374_vm10, %v4368_v43, %v4385_v45  ;;  %v8747_v63 = vmul.u32.u64.low %v4388_v39, %v4383_v42  ;;  %v8748_v52 = vmul.u32.u64.high %v4388_v39, %v4383_v42, %v8747_v63  ;;  %v4454_v20 = vadd.s32 1, %v5487_v2 }
 0x4c3   : > { %v4387_v56 = vsel %vm4373_vm14, %v4384_v23, %v4386_v50  ;;  %v3900_v18 = vand.u32 2147483647, %v3899_v41  ;;  %v3902_v6 = vcvt.s32.f32 %v3895_v27  ;;  %v8755_v58 = vsel %vm5470_vm3, 0, %v5469_v46 }
 0x4c4   : > { %v8751_v22 = vmul.u32.u64.low %v4388_v39, %v4387_v56  ;;  %v8752_v13 = vmul.u32.u64.high %v4388_v39, %v4387_v56, %v8751_v22  ;;  %v3717_v26 = vadd.f32 %v3716_v34, %v3600_v5  ;;  %vm4455_vm2 = vcmp.gt.s32.totalorder %v4454_v20, 0 }
 0x4c5   : > { %v8758_v3 = vsel %vm5474_vm7, 0, %v5473_v61  ;;  %v4379_v43 = vsel %vm4373_vm14, %v4376_v49, %v4378_v9  ;;  %v9368_v31 = vand.u32 2147483647, %v8708_v37  ;;  %v4456_v36 = vsel %vm4455_vm2, %v4454_v20, 0 }
 0x4c6   : > { %vm5478_vm0 = vcmp.lt.s32.totalorder %v5477_v35, 0  ;;  %v5480_v41 = vmin.u32 %v4302_v59, %v8741_v51  ;;  %v4398_v2 = vadd.s32 1, %v8748_v52  ;;  %v4458_v27 = vand.u32 31, %v4456_v36 }
 0x4c7   : > { %v8764_v30 = vmul.f32 %v3902_v6, %v3900_v18  ;;  %v8768_v46 = vadd.s32 %v8518_v28, %v8526_v4  ;;  %v4395_v5 = vmul.u32 %v4388_v39, %v4379_v43  ;;  %vm4397_vm1 = vc.u32 %v8752_v13, %v8747_v63 }
 0x4c8   : > { %v4459_v0 = vsub.s32 32, %v4458_v27  ;;  %v8774_v15 = vadd.f32 %v3817_v14, %v3717_v26  ;;  %v4104_v23 = vsub.s32 4294967266, %v8758_v3  ;;  %v8777_v49 = vsel %vm5478_vm0, 0, %v5477_v35 }
 0x4c9   : > { %v4399_v55 = vsel %vm4397_vm1, %v4398_v2, %v8748_v52  ;;  %v4451_v28 = vand.u32 8388607, %v9368_v31  ;;  %v4304_v4 = vclz %v5480_v41  ;;  %v4461_v59 = vshll.u32 %v9398_v11, %v4458_v27 }
 0x4ca   : > { %v4400_v45 = vadd.s32 %v4399_v55, %v4395_v5  ;;  %v4462_v34 = vshrl.u32 %v9403_v44, %v4459_v0  ;;  %v4465_v39 = vshrl.u32 %v9447_v57, %v4459_v0  ;;  %v4464_v9 = vshll.u32 %v9403_v44, %v4458_v27 }
 0x4cb   : > { %v4467_v42 = vshll.u32 %v9447_v57, %v4458_v27  ;;  %v4468_v35 = vshrl.u32 %v9399_v12, %v4459_v0  ;;  %v4457_v56 = vshrl.u32 %v4456_v36, 5  ;;  %v4470_v52 = vshll.u32 %v9399_v12, %v4458_v27 }
 0x4cc   : > { %v4401_v50 = vadd.s32 536870912, %v4400_v45  ;;  %v4471_v20 = vshrl.u32 %v9400_v7, %v4459_v0  ;;  %v4100_v18 = vsub.s32 32, %v8758_v3  ;;  %v4463_v22 = vor.u32 %v4462_v34, %v4461_v59 }
 0x4cd   : > { %v4466_v6 = vor.u32 %v4465_v39, %v4464_v9  ;;  %v4469_v26 = vor.u32 %v4468_v35, %v4467_v42  ;;  %v4473_v41 = vshll.u32 %v9400_v7, %v4458_v27  ;;  %v4474_v2 = vshrl.u32 %v9397_v24, %v4459_v0 }
 0x4ce   : > { %v8791_v43 = vshrl.u32 %v4401_v50, 30  ;;  %v4472_v14 = vor.u32 %v4471_v20, %v4470_v52  ;;  %v4105_v5 = vadd.s32 127, %v4104_v23  ;;  %v4208_v55 = vsub.s32 4294967266, %v8777_v49 }
 0x4cf   : > { %v5481_v36 = vadd.s32 4294967294, %v4304_v4  ;;  %v4452_v31 = vor.u32 8388608, %v4451_v28  ;;  %v4475_v25 = vor.u32 %v4474_v2, %v4473_v41  ;;  %vm4476_vm4 = vcmp.lt.s32.totalorder %v4457_v56, 1 }
 0x4d0   : > { %v4403_v61 = vshll.u32 %v8791_v43, 30  ;;  %vm4479_vm8 = vcmp.lt.s32.totalorder %v4457_v56, 4  ;;  %v4460_v34 = vshrl.u32 %v9398_v11, %v4459_v0  ;;  %vm4478_vm12 = vcmp.lt.s32.totalorder %v4457_v56, 3 }
 0x4d1   : > { %v4484_v39 = vsel %vm4476_vm4, %v4463_v22, %v4466_v6  ;;  %v4485_v59 = vsel %vm4479_vm8, %v4472_v14, 920167782  ;;  %vm4477_vm13 = vcmp.lt.s32.totalorder %v4457_v56, 2  ;;  %v4481_v23 = vsel %vm4479_vm8, %v4469_v26, 2102212464 }
 0x4d2   : > { %v8800_v27 = vsub.s32 %v4400_v45, %v4403_v61  ;;  %v4486_v4 = vsel %vm4478_vm12, %v4469_v26, %v4485_v59  ;;  %v4204_v28 = vsub.s32 32, %v8777_v49  ;;  %v4492_v42 = vshll.u32 %v4452_v31, 8 }
 0x4d3   : > { %v4487_v9 = vsel %vm4477_vm13, %v4484_v39, %v4486_v4  ;;  %v4551_v35 = vand.u32 2139095040, %v8774_v15  ;;  %v4480_v50 = vsel %vm4476_vm4, %v4460_v34, %v4463_v22  ;;  %v4488_v52 = vsel %vm4476_vm4, %v4466_v6, %v4469_v26 }
 0x4d4   : > { %v4406_v0 = vsub.s32 0, %v8800_v27  ;;  %v4489_v61 = vsel %vm4479_vm8, %v4475_v25, 1326507024  ;;  %v4482_v45 = vsel %vm4478_vm12, %v4466_v6, %v4481_v23  ;;  %v4209_v39 = vadd.s32 127, %v4208_v55 }
 0x4d5   : > { %v4490_v20 = vsel %vm4478_vm12, %v4472_v14, %v4489_v61  ;;  %v8813_v41 = vmul.u32.u64.low %v4492_v42, %v4487_v9  ;;  %v8814_v2 = vmul.u32.u64.high %v4492_v42, %v4487_v9, %v8813_v41  ;;  %vm5482_vm15 = vcmp.lt.s32.totalorder %v5481_v36, 0 }
 0x4d6   : > { %v5484_v31 = vmin.u32 %v4406_v0, %v8800_v27  ;;  %v4491_v59 = vsel %vm4477_vm13, %v4488_v52, %v4490_v20  ;;  %v4084_v22 = vadd.s32 %v8557_v48, %v8567_v38  ;;  %v4101_v25 = vshll.u32 %v8673_v54, %v8758_v3 }
 0x4d7   : > { %v8823_v26 = vmul.u32.u64.low %v4492_v42, %v4491_v59  ;;  %v8824_v6 = vmul.u32.u64.high %v4492_v42, %v4491_v59, %v8823_v26  ;;  %v4188_v14 = vadd.s32 %v8629_v32, %v8636_v16  ;;  %v4483_v55 = vsel %vm4477_vm13, %v4480_v50, %v4482_v45 }
 0x4d8   : > { %v4408_v34 = vclz %v5484_v31  ;;  %v4552_v23 = vshrl.u32 %v4551_v35, 23  ;;  %v4102_v4 = vshrl.u32 %v4084_v22, %v4100_v18  ;;  %v4106_v9 = vshll.u32 %v4105_v5, 23 }
 0x4d9   : > { %v8829_v0 = vsel %vm5482_vm15, 0, %v5481_v36  ;;  %v4502_v52 = vadd.s32 1, %v8814_v2  ;;  %v4206_v48 = vshrl.u32 %v4188_v14, %v4204_v28  ;;  %v4210_v38 = vshll.u32 %v4209_v39, 23 }
 0x4da   : > { %v5485_v61 = vadd.s32 4294967294, %v4408_v34  ;;  %v5491_v54 = vadd.s32 4294967169, %v4552_v23  ;;  %v4205_v3 = vshll.u32 %v8705_v21, %v8777_v49  ;;  %v4499_v20 = vmul.u32 %v4492_v42, %v4483_v55 }
 0x4db   : > { %vm4501_vm5 = vc.u32 %v8824_v6, %v8813_v41  ;;  %v9369_v32 = vand.u32 2147483647, %v8774_v15  ;;  %v4312_v16 = vsub.s32 4294967266, %v8829_v0  ;;  %v9449_v36 = vsub.s32 4294967266, %v8755_v58 }
 0x4dc   : > { %vm5486_vm6 = vcmp.lt.s32.totalorder %v5485_v61, 0  ;;  %v4503_v56 = vsel %vm4501_vm5, %v4502_v52, %v8814_v2  ;;  %v4558_v18 = vadd.s32 1, %v5491_v54  ;;  %v8845_v21 = vor.u32 %v4102_v4, %v4101_v25 }
 0x4dd   : > { %v8843_v28 = vadd.s32 127, %v9449_v36  ;;  %v4504_v49 = vadd.s32 %v4503_v56, %v4499_v20  ;;  %v8847_v42 = vor.u32 4788187, %v4106_v9  ;;  %v8849_v35 = vor.u32 %v4206_v48, %v4205_v3 }
 0x4de   : > { %v8851_v50 = vor.u32 4788187, %v4210_v38  ;;  %vm4559_vm3 = vcmp.gt.s32.totalorder %v4558_v18, 0  ;;  %v4308_v45 = vsub.s32 32, %v8829_v0  ;;  %v8854_v2 = vsel %vm5486_vm6, 0, %v5485_v61 }
 0x4df   : > { %v4505_v39 = vadd.s32 536870912, %v4504_v49  ;;  %v4560_v31 = vsel %vm4559_vm3, %v4558_v18, 0  ;;  %v9450_v59 = vsub.s32 32, %v8755_v58  ;;  %v4313_v25 = vadd.s32 127, %v4312_v16 }
 0x4e0   : > { %v4555_v26 = vand.u32 8388607, %v9369_v32  ;;  %v4562_v14 = vand.u32 31, %v4560_v31  ;;  %v4002_v34 = vshll.u32 %v8843_v28, 23  ;;  %v4110_v55 = vcvt.s32.f32 %v8845_v21 }
 0x4e1   : > { %v8859_v22 = vshrl.u32 %v8768_v46, %v9450_v59  ;;  %v4292_v23 = vadd.s32 %v8692_v40, %v8703_v33  ;;  %v8867_v4 = vshrl.u32 %v4505_v39, 30  ;;  %v4108_v9 = vand.u32 2147483647, %v8847_v42 }
 0x4e2   : > { %v4416_v46 = vsub.s32 4294967266, %v8854_v2  ;;  %v4563_v48 = vsub.s32 32, %v4562_v14  ;;  %v4309_v61 = vshll.u32 %v8741_v51, %v8829_v0  ;;  %v4314_v20 = vshll.u32 %v4313_v25, 23 }
 0x4e3   : > { %v4310_v54 = vshrl.u32 %v4292_v23, %v4308_v45  ;;  %v4507_v3 = vshll.u32 %v8867_v4, 30  ;;  %v4556_v16 = vor.u32 8388608, %v4555_v26  ;;  %v4565_v40 = vshll.u32 %v9398_v11, %v4562_v14 }
 0x4e4   : > { %v4566_v33 = vshrl.u32 %v9403_v44, %v4563_v48  ;;  %v4568_v18 = vshll.u32 %v9403_v44, %v4562_v14  ;;  %v4569_v36 = vshrl.u32 %v9447_v57, %v4563_v48  ;;  %v4572_v39 = vshrl.u32 %v9399_v12, %v4563_v48 }
 0x4e5   : > { %v8878_v56 = vsub.s32 %v4504_v49, %v4507_v3  ;;  %v4396_v51 = vadd.s32 %v8747_v63, %v8752_v13  ;;  %v4417_v0 = vadd.s32 127, %v4416_v46  ;;  %v4561_v45 = vshrl.u32 %v4560_v31, 5 }
 0x4e6   : > { %v4571_v59 = vshll.u32 %v9447_v57, %v4562_v14  ;;  %v4567_v26 = vor.u32 %v4566_v33, %v4565_v40  ;;  %v4570_v23 = vor.u32 %v4569_v36, %v4568_v18  ;;  %v4574_v49 = vshll.u32 %v9399_v12, %v4562_v14 }
 0x4e7   : > { %v4510_v25 = vsub.s32 0, %v8878_v56  ;;  %v4575_v44 = vshrl.u32 %v9400_v7, %v4563_v48  ;;  %v4577_v32 = vshll.u32 %v9400_v7, %v4562_v14  ;;  %v4578_v5 = vshrl.u32 %v9397_v24, %v4563_v48 }
 0x4e8   : > { %v4573_v3 = vor.u32 %v4572_v39, %v4571_v59  ;;  %v4311_v52 = vor.u32 %v4310_v54, %v4309_v61  ;;  %v4315_v38 = vor.u32 4788187, %v4314_v20  ;;  %v4596_v13 = vshll.u32 %v4556_v16, 8 }
 0x4e9   : > { %v5488_v63 = vmin.u32 %v4510_v25, %v8878_v56  ;;  %v4412_v57 = vsub.s32 32, %v8854_v2  ;;  %v4576_v31 = vor.u32 %v4575_v44, %v4574_v49  ;;  %v4579_v46 = vor.u32 %v4578_v5, %v4577_v32 }
 0x4ea   : > { %vm4580_vm7 = vcmp.lt.s32.totalorder %v4561_v45, 1  ;;  %v4418_v40 = vshll.u32 %v4417_v0, 23  ;;  %vm4583_vm9 = vcmp.lt.s32.totalorder %v4561_v45, 4  ;;  %v4564_v18 = vshrl.u32 %v9398_v11, %v4563_v48 }
 0x4eb   : > { %v4512_v33 = vclz %v5488_v63  ;;  %v4588_v12 = vsel %vm4580_vm7, %v4567_v26, %v4570_v23  ;;  %vm4582_vm11 = vcmp.lt.s32.totalorder %v4561_v45, 3  ;;  %v4585_v7 = vsel %vm4583_vm9, %v4573_v3, 2102212464 }
 0x4ec   : > { %v4589_v24 = vsel %vm4583_vm9, %v4576_v31, 920167782  ;;  %vm4581_vm10 = vcmp.lt.s32.totalorder %v4561_v45, 2  ;;  %v4592_v54 = vsel %vm4580_vm7, %v4570_v23, %v4573_v3  ;;  %v4413_v20 = vshll.u32 %v8800_v27, %v8854_v2 }
 0x4ed   : > { %v5489_v14 = vadd.s32 4294967294, %v4512_v33  ;;  %v4590_v61 = vsel %vm4582_vm11, %v4573_v3, %v4589_v24  ;;  %v4414_v32 = vshrl.u32 %v4396_v51, %v4412_v57  ;;  %v4593_v16 = vsel %vm4583_vm9, %v4579_v46, 1326507024 }
 0x4ee   : > { %v4591_v5 = vsel %vm4581_vm10, %v4588_v12, %v4590_v61  ;;  %v4584_v36 = vsel %vm4580_vm7, %v4564_v18, %v4567_v26  ;;  %v4586_v39 = vsel %vm4582_vm11, %v4570_v23, %v4585_v7  ;;  %v4594_v11 = vsel %vm4582_vm11, %v4576_v31, %v4593_v16 }
 0x4ef   : > { %vm5490_vm14 = vcmp.lt.s32.totalorder %v5489_v14, 0  ;;  %v4595_v0 = vsel %vm4581_vm10, %v4592_v54, %v4594_v11  ;;  %v8901_v59 = vmul.u32.u64.low %v4596_v13, %v4591_v5  ;;  %v8902_v25 = vmul.u32.u64.high %v4596_v13, %v4591_v5, %v8901_v59 }
 0x4f0   : > { %v4515_v48 = vsel %vm5490_vm14, 0, %v5489_v14  ;;  %v4419_v49 = vor.u32 4788187, %v4418_v40  ;;  %v4500_v27 = vadd.s32 %v8813_v41, %v8824_v6  ;;  %v4316_v3 = vand.u32 2147483647, %v4315_v38 }
 0x4f1   : > { %v4516_v2 = vsub.s32 32, %v4515_v48  ;;  %v4520_v51 = vsub.s32 4294967266, %v4515_v48  ;;  %v4415_v44 = vor.u32 %v4414_v32, %v4413_v20  ;;  %v4517_v26 = vshll.u32 %v8878_v56, %v4515_v48 }
 0x4f2   : > { %v8907_v63 = vmul.u32.u64.low %v4596_v13, %v4595_v0  ;;  %v8908_v57 = vmul.u32.u64.high %v4596_v13, %v4595_v0, %v8907_v63  ;;  %v4587_v46 = vsel %vm4581_vm10, %v4584_v36, %v4586_v39  ;;  %v4003_v33 = vor.u32 4788187, %v4002_v34  ;;  %v9457_v0 = vld [vmem:[#allocation9_spill] sm:$0xff] }
 0x4f3   : > { %v4518_v23 = vshrl.u32 %v4500_v27, %v4516_v2  ;;  %v4521_v31 = vadd.s32 127, %v4520_v51  ;;  %v4111_v41 = vmul.f32 %v4110_v55, %v4108_v9  ;;  %v9451_v6 = vand.u32 2147483647, %v8851_v50 }
 0x4f4   : > { %v9452_v38 = vcvt.s32.f32 %v8849_v35  ;;  %v4606_v12 = vadd.s32 1, %v8902_v25  ;;  %v4318_v56 = vcvt.s32.f32 %v4311_v52  ;;  %v4420_v18 = vand.u32 2147483647, %v4419_v49 }
 0x4f5   : > { %v4519_v7 = vor.u32 %v4518_v23, %v4517_v26  ;;  %v4522_v45 = vshll.u32 %v4521_v31, 23  ;;  %v3904_v24 = vxor.u32 2147483648, %v8764_v30  ;;  %v9453_v28 = vshll.u32 %v8660_v19, %v8755_v58 }
 0x4f6   : > { %v4215_v40 = vmul.f32 %v9452_v38, %v9451_v6  ;;  %v4603_v21 = vmul.u32 %v4596_v13, %v4587_v46  ;;  %vm4605_vm2 = vc.u32 %v8908_v57, %v8901_v59  ;;  %v4319_v50 = vmul.f32 %v4318_v56, %v4316_v3 }
 0x4f7   : > { %v3999_v42 = vor.u32 %v8859_v22, %v9453_v28  ;;  %v4422_v35 = vcvt.s32.f32 %v4415_v44  ;;  %v4523_v34 = vor.u32 4788187, %v4522_v45  ;;  %v4607_v55 = vsel %vm4605_vm2, %v4606_v12, %v8902_v25 }
 0x4f8   : > { %v4004_v9 = vand.u32 2147483647, %v4003_v33  ;;  %v4112_v52 = vxor.u32 2147483648, %v4111_v41  ;;  %v4608_v14 = vadd.s32 %v4607_v55, %v4603_v21  ;;  %v4216_v61 = vxor.u32 2147483648, %v4215_v40  ;;  %v9473_v55 = vld [vmem:[#allocation11_spill] sm:$0xff] }
 0x4f9   : > { %v4423_v54 = vmul.f32 %v4422_v35, %v4420_v18  ;;  %v4524_v20 = vand.u32 2147483647, %v4523_v34  ;;  %v4526_v32 = vcvt.s32.f32 %v4519_v7  ;;  %vm3822_vm0 = vcmp.lt.s32.totalorder %v8356_v10, 0 }
 0x4fa   : > { %v3906_v19 = vsub.s32 4, %v8541_v53  ;;  %vm4030_vm1 = vcmp.lt.s32.totalorder %v8362_v8, 0  ;;  %v4609_v58 = vadd.s32 536870912, %v4608_v14  ;;  %v3905_v22 = vsel %vm3822_vm0, %v3904_v24, %v8764_v30 }
 0x4fb   : > { %v4006_v13 = vcvt.s32.f32 %v3999_v42  ;;  %v4320_v5 = vxor.u32 2147483648, %v4319_v50  ;;  %v4527_v16 = vmul.f32 %v4526_v32, %v4524_v20  ;;  %v9454_v36 = vand.u32 2147483647, %v8356_v10 }
 0x4fc   : > { %v4113_v11 = vsel %vm4030_vm1, %v4112_v52, %v4111_v41  ;;  %vm4134_vm8 = vcmp.lt.s32.totalorder %v8440_v1, 0  ;;  %v8946_v48 = vshrl.u32 %v4609_v58, 30  ;;  %vm3926_vm12 = vcmp.lt.s32.totalorder %v9457_v0, 0 }
 0x4fd   : > { %vm8939_vm4 = vcmp.le.f32.partialorder %v9454_v36, 0.7853982  ;;  %v4007_v25 = vmul.f32 %v4006_v13, %v4004_v9  ;;  %v9458_v30 = vand.u32 2147483647, %v8362_v8  ;;  %v4217_v27 = vsel %vm4134_vm8, %v4216_v61, %v4215_v40 }
 0x4fe   : > { %v4424_v2 = vxor.u32 2147483648, %v4423_v54  ;;  %v8960_v51 = vsel %vm8939_vm4, %v8356_v10, %v3905_v22  ;;  %v9461_v3 = vand.u32 2147483647, %v8440_v1  ;;  %vm4238_vm5 = vcmp.lt.s32.totalorder %v8587_v17, 0 }
 0x4ff   : > { %vm8951_vm13 = vcmp.le.f32.partialorder %v9458_v30, 0.7853982  ;;  %v4611_v63 = vshll.u32 %v8946_v48, 30  ;;  %v8973_v26 = vsel %vm3822_vm0, %v3906_v19, %v8541_v53  ;;  %v4321_v31 = vsel %vm4238_vm5, %v4320_v5, %v4319_v50 }
 0x500   : > { %vm8964_vm15 = vcmp.le.f32.partialorder %v9461_v3, 0.7853982  ;;  %v4116_v23 = vsel %vm8951_vm13, %v8362_v8, %v4113_v11  ;;  %v4528_v46 = vxor.u32 2147483648, %v4527_v16  ;;  %v9464_v33 = vand.u32 2147483647, %v9457_v0 }
 0x501   : > { %v4220_v6 = vsel %vm8964_vm15, %v8440_v1, %v4217_v27  ;;  %v9467_v53 = vand.u32 2147483647, %v8587_v17  ;;  %vm4342_vm7 = vcmp.lt.s32.totalorder %v8667_v47, 0  ;;  %v8996_v40 = vsub.s32 %v4608_v14, %v4611_v63 }
 0x502   : > { %vm8982_vm6 = vcmp.le.f32.partialorder %v9464_v33, 0.7853982  ;;  %5736 = vcosq.f32 %v8960_v51  ;;  %v4008_v12 = vxor.u32 2147483648, %v4007_v25  ;;  %v9470_v56 = vand.u32 2147483647, %v8667_v47 }
 0x503   : > { %vm8991_vm3 = vcmp.le.f32.partialorder %v9467_v53, 0.7853982  ;;  %v4425_v7 = vsel %vm4342_vm7, %v4424_v2, %v4423_v54  ;;  %5738 = vsinq.f32 %v4116_v23  ;;  %vm4446_vm11 = vcmp.lt.s32.totalorder %v8708_v37, 0 }
 0x504   : > { %vm9001_vm9 = vcmp.le.f32.partialorder %v9470_v56, 0.7853982  ;;  %v4324_v45 = vsel %vm8991_vm3, %v8587_v17, %v4321_v31  ;;  %v4614_v24 = vsub.s32 0, %v8996_v40  ;;  %v4218_v28 = vsub.s32 4, %v8682_v60 }
 0x505   : > { %5740 = vsinq.f32 %v4220_v6  ;;  %v4426_v42 = vsub.s32 4, %v8791_v43  ;;  %v4529_v21 = vsel %vm4446_vm11, %v4528_v46, %v4527_v16  ;;  %v4010_v50 = vsub.s32 4, %v8643_v29 }
 0x506   : > { %5742 = vcosq.f32 %v4220_v6  ;;  %v4428_v35 = vsel %vm9001_vm9, %v8667_v47, %v4425_v7  ;;  %v5492_v34 = vmin.u32 %v4614_v24, %v8996_v40  ;;  %v4114_v9 = vsub.s32 4, %v9473_v55 }
 0x507   : > { %v4322_v52 = vsub.s32 4, %v8728_v62  ;;  %5744 = vcosq.f32 %v4324_v45  ;;  %v9474_v14 = vand.u32 2147483647, %v8708_v37  ;;  %v4009_v54 = vsel %vm3926_vm12, %v4008_v12, %v4007_v25 }
 0x508   : > { %5746 = vsinq.f32 %v4324_v45  ;;  %v4616_v32 = vclz %v5492_v34  ;;  %v4219_v19 = vsel %vm4134_vm8, %v4218_v28, %v8682_v60  ;;  %v4427_v58 = vsel %vm4342_vm7, %v4426_v42, %v8791_v43 }
 0x509   : > { %vm9025_vm10 = vcmp.le.f32.partialorder %v9474_v14, 0.7853982  ;;  %5748 = vcosq.f32 %v4428_v35  ;;  %v4530_v22 = vsub.s32 4, %v8867_v4  ;;  %v3909_v13 = vsel %vm8939_vm4, 0, %v8973_v26 }
 0x50a   : > { %v4532_v20 = vsel %vm9025_vm10, %v8708_v37, %v4529_v21  ;;  %v4011_v5 = vsel %vm3926_vm12, %v4010_v50, %v8643_v29  ;;  %5750 = vsinq.f32 %v4428_v35  ;;  %v5493_v16 = vadd.s32 4294967294, %v4616_v32 }
 0x50b   : > { %v4012_v60 = vsel %vm8982_vm6, %v9457_v0, %v4009_v54  ;;  %v4115_v43 = vsel %vm4030_vm1, %v4114_v9, %v9473_v55  ;;  %v4323_v36 = vsel %vm4238_vm5, %v4322_v52, %v8728_v62  ;;  %5752 = vcosq.f32 %v4532_v20 }
 0x50c   : > { %v4221_v39 = vsel %vm8964_vm15, 0, %v4219_v19  ;;  %v4429_v29 = vsel %vm9001_vm9, 0, %v4427_v58  ;;  %5754 = vsinq.f32 %v4532_v20  ;;  %vm5494_vm14 = vcmp.lt.s32.totalorder %v5493_v16, 0 }
 0x50d   : > { %v4013_v11 = vsel %vm8982_vm6, 0, %v4011_v5  ;;  %5756 = vcosq.f32 %v4116_v23  ;;  %v4531_v25 = vsel %vm4446_vm11, %v4530_v22, %v8867_v4  ;;  %v4619_v30 = vsel %vm5494_vm14, 0, %v5493_v16 }
 0x50e   : > { %v4325_v62 = vsel %vm8991_vm3, 0, %v4323_v36  ;;  %v4604_v27 = vadd.s32 %v8901_v59, %v8908_v57  ;;  %v4620_v2 = vsub.s32 32, %v4619_v30  ;;  %v4624_v3 = vsub.s32 4294967266, %v4619_v30 }
 0x50f   : > { %5758 = vcosq.f32 %v4012_v60  ;;  %v4117_v44 = vsel %vm8951_vm13, 0, %v4115_v43  ;;  %v4225_v63 = vadd.s32 3, %v4221_v39  ;;  %v4433_v26 = vadd.s32 3, %v4429_v29  ;;  %v9071_v23 = vpop.eup %5736 }
 0x510   : > { %v4533_v4 = vsel %vm9025_vm10, 0, %v4531_v25  ;;  %v4621_v31 = vshll.u32 %v8996_v40, %v4619_v30  ;;  %v4622_v46 = vshrl.u32 %v4604_v27, %v4620_v2  ;;  %v4625_v33 = vadd.s32 127, %v4624_v3  ;;  %v9076_v41 = vpop.eup %5738 }
 0x511   : > { %v3913_v59 = vadd.s32 3, %v3909_v13  ;;  %5760 = vsinq.f32 %v4012_v60  ;;  %v4329_v57 = vadd.s32 3, %v4325_v62  ;;  %v4017_v49 = vadd.s32 3, %v4013_v11 }
 0x512   : > { %v5741_v6 = vpop.eup %5740  ;;  %5762 = vsinq.f32 %v8960_v51  ;;  %v4623_v53 = vor.u32 %v4622_v46, %v4621_v31  ;;  %v4626_v38 = vshll.u32 %v4625_v33, 23  ;;  %v4121_v56 = vadd.s32 3, %v4117_v44 }
 0x513   : > { %v5743_v12 = vpop.eup %5742  ;;  %v4537_v18 = vadd.s32 3, %v4533_v4  ;;  %v9079_v45 = vand.u32 3, %v4225_v63  ;;  %v9081_v40 = vand.u32 3, %v4433_v26  ;;  %v9083_v42 = vand.u32 3, %v4329_v57 }
 0x514   : > { %v5745_v7 = vpop.eup %5744  ;;  %v4627_v24 = vor.u32 4788187, %v4626_v38  ;;  %v4229_v21 = vxor.u32 2147483648, %v5741_v6  ;;  %v9085_v35 = vand.u32 3, %v3913_v59  ;;  %v9087_v51 = vand.u32 3, %v4017_v49 }
 0x515   : > { %v5747_v28 = vpop.eup %5746  ;;  %v4630_v55 = vcvt.s32.f32 %v4623_v53  ;;  %v9089_v52 = vand.u32 3, %v4121_v56  ;;  %v4538_v14 = vand.u32 3, %v4537_v18  ;;  %v9477_v61 = vand.u32 2147483647, %v8774_v15 }
 0x516   : > { %v5749_v50 = vpop.eup %5748  ;;  %v4628_v34 = vand.u32 2147483647, %v4627_v24  ;;  %vm4550_vm0 = vcmp.lt.s32.totalorder %v8774_v15, 0  ;;  %vm4436_vm1 = vcmp.eq.s32.totalorder %v9081_v40, 0  ;;  %vm4439_vm4 = vcmp.eq.s32.totalorder %v9081_v40, 2 }
 0x517   : > { %v5751_v9 = vpop.eup %5750  ;;  %vm9093_vm2 = vcmp.le.f32.partialorder %v9477_v61, 0.7853982  ;;  %vm4228_vm8 = vcmp.eq.s32.totalorder %v9079_v45, 0  ;;  %vm4332_vm12 = vcmp.eq.s32.totalorder %v9083_v42, 0  ;;  %vm4335_vm13 = vcmp.eq.s32.totalorder %v9083_v42, 2 }
 0x518   : > { %v5753_v20 = vpop.eup %5752  ;;  %v4631_v32 = vmul.f32 %v4630_v55, %v4628_v34  ;;  %v4230_v58 = vsel %vm4228_vm8, %v5743_v12, %v4229_v21  ;;  %v4232_v22 = vxor.u32 2147483648, %v5743_v12  ;;  %v4634_v16 = vsub.s32 4, %v8946_v48  ;;  %v4674_v34 = vpop.permute.xlu0 %4673 }
 0x519   : > { %v5755_v19 = vpop.eup %5754  ;;  %vm4435_vm15 = vcmp.lt.s32.totalorder %v9081_v40, 2  ;;  %vm4331_vm5 = vcmp.lt.s32.totalorder %v9083_v42, 2  ;;  %v4333_v60 = vxor.u32 2147483648, %v5747_v28  ;;  %vm4227_vm6 = vcmp.lt.s32.totalorder %v9079_v45, 2 }
 0x51a   : > { %v5757_v13 = vpop.eup %5756  ;;  %v4632_v5 = vxor.u32 2147483648, %v4631_v32  ;;  %vm4231_vm3 = vcmp.eq.s32.totalorder %v9079_v45, 2  ;;  %vm4540_vm7 = vcmp.eq.s32.totalorder %v4538_v14, 0  ;;  %v4440_v43 = vxor.u32 2147483648, %v5749_v50 }
 0x51b   : > { %v4336_v36 = vxor.u32 2147483648, %v5745_v7  ;;  %v4125_v39 = vxor.u32 2147483648, %v9076_v41  ;;  %v4541_v25 = vxor.u32 2147483648, %v5755_v19  ;;  %v4544_v30 = vxor.u32 2147483648, %v5753_v20 }
 0x51c   : > { %v5759_v29 = vpop.eup %5758  ;;  %v4633_v11 = vsel %vm4550_vm0, %v4632_v5, %v4631_v32  ;;  %v4437_v62 = vxor.u32 2147483648, %v5751_v9  ;;  %vm4536_vm9 = vweird.f32 %v8708_v37  ;;  %vm4543_vm11 = vcmp.eq.s32.totalorder %v4538_v14, 2 }
 0x51d   : > { %v4636_v27 = vsel %vm9093_vm2, %v8774_v15, %v4633_v11  ;;  %v4233_v2 = vsel %vm4231_vm3, %v4232_v22, %v5741_v6  ;;  %v4128_v3 = vxor.u32 2147483648, %v5757_v13  ;;  %v4635_v63 = vsel %vm4550_vm0, %v4634_v16, %v8946_v48  ;;  %v4664_v22 = vpop.permute.xlu0 %4663 }
 0x51e   : > { %v5761_v44 = vpop.eup %5760  ;;  %5764 = vcosq.f32 %v4636_v27  ;;  %vm4328_vm14 = vweird.f32 %v8587_v17  ;;  %v4334_v26 = vsel %vm4332_vm12, %v5745_v7, %v4333_v60  ;;  %vm4124_vm8 = vcmp.eq.s32.totalorder %v9089_v52, 0 }
 0x51f   : > { %v5763_v4 = vpop.eup %5762  ;;  %5766 = vsinq.f32 %v4636_v27  ;;  %v4337_v31 = vsel %vm4335_vm13, %v4336_v36, %v5747_v28  ;;  %vm4224_vm3 = vweird.f32 %v8440_v1  ;;  %v4126_v46 = vsel %vm4124_vm8, %v5757_v13, %v4125_v39 }
 0x520   : > { %vm4127_vm10 = vcmp.eq.s32.totalorder %v9089_v52, 2  ;;  %v4542_v48 = vsel %vm4540_vm7, %v5753_v20, %v4541_v25  ;;  %v4545_v33 = vsel %vm4543_vm11, %v4544_v30, %v5755_v19  ;;  %v4438_v59 = vsel %vm4436_vm1, %v5749_v50, %v4437_v62  ;;  %v4684_v50 = vld [vmem:[%s9317_s7] sm:$0xff] }
 0x521   : > { %v4441_v57 = vsel %vm4439_vm4, %v4440_v43, %v5751_v9  ;;  %v4637_v6 = vsel %vm9093_vm2, 0, %v4635_v63  ;;  %v4129_v49 = vsel %vm4127_vm10, %v4128_v3, %v9076_v41  ;;  %v4021_v53 = vxor.u32 2147483648, %v5761_v44 }
 0x522   : > { %v4024_v38 = vxor.u32 2147483648, %v5759_v29  ;;  %vm4539_vm0 = vcmp.lt.s32.totalorder %v4538_v14, 2  ;;  %vm4123_vm12 = vcmp.lt.s32.totalorder %v9089_v52, 2  ;;  %v3917_v12 = vxor.u32 2147483648, %v5763_v4  ;;  %v4669_v14 = vpop.permute.xlu1 %4668 }
 0x523   : > { %v3920_v56 = vxor.u32 2147483648, %v9071_v23  ;;  %v4546_v18 = vsel %vm4539_vm0, %v4542_v48, %v4545_v33  ;;  %v4442_v7 = vsel %vm4435_vm15, %v4438_v59, %v4441_v57  ;;  %v4338_v24 = vsel %vm4331_vm5, %v4334_v26, %v4337_v31 }
 0x524   : > { %v4234_v28 = vsel %vm4227_vm6, %v4230_v58, %v4233_v2  ;;  %v4641_v21 = vadd.s32 3, %v4637_v6  ;;  %v4130_v41 = vsel %vm4123_vm12, %v4126_v46, %v4129_v49  ;;  %vm4020_vm2 = vcmp.eq.s32.totalorder %v9087_v51, 0 }
 0x525   : > { %vm4023_vm1 = vcmp.eq.s32.totalorder %v9087_v51, 2  ;;  %v4022_v55 = vsel %vm4020_vm2, %v5759_v29, %v4021_v53  ;;  %vm3916_vm4 = vcmp.eq.s32.totalorder %v9085_v35, 0  ;;  %vm3919_vm13 = vcmp.eq.s32.totalorder %v9085_v35, 2 }
 0x526   : > { %v4025_v40 = vsel %vm4023_vm1, %v4024_v38, %v5761_v44  ;;  %v4547_v45 = vsel %vm4536_vm9, nan, %v4546_v18  ;;  %vm9480_vm15 = vweird.f32 %v8667_v47  ;;  %v3918_v9 = vsel %vm3916_vm4, %v9071_v23, %v3917_v12 }
 0x527   : > { %v4443_v42 = vsel %vm9480_vm15, nan, %v4442_v7  ;;  %v3921_v52 = vsel %vm3919_vm13, %v3920_v56, %v5763_v4  ;;  %v4339_v61 = vsel %vm4328_vm14, nan, %v4338_v24  ;;  %vm4120_vm5 = vweird.f32 %v8362_v8 }
 0x528   : > { %vm4019_vm6 = vcmp.lt.s32.totalorder %v9087_v51, 2  ;;  %vm9481_vm7 = vcmask 261120   ;;  %v4235_v37 = vsel %vm4224_vm3, nan, %v4234_v28  ;;  %v4131_v20 = vsel %vm4120_vm5, nan, %v4130_v41 }
 0x529   : > { %v4692_v54 = vsel %vm9481_vm7, %v4684_v50, 0  ;;  %v4026_v32 = vsel %vm4019_vm6, %v4022_v55, %v4025_v40  ;;  %vm3915_vm9 = vcmp.lt.s32.totalorder %v9085_v35, 2  ;;  %v4642_v47 = vand.u32 3, %v4641_v21  ;;  %v4659_v35 = vpop.permute.xlu1 %4658 }
 0x52a   : > { %v4682_v23 = vmul.f32 %v4674_v34, %v4547_v45  ;;  %v4681_v19 = vmul.f32 %v4669_v14, %v4443_v42  ;;  %v3922_v58 = vsel %vm3915_vm9, %v3918_v9, %v3921_v52  ;;  %vm4016_vm11 = vweird.f32 %v9457_v0 }
 0x52b   : > { %v9165_v17 = vand.u32 4294901760, %v4692_v54  ;;  %v5765_v8 = vpop.eup %5764  ;;  %v4680_v51 = vmul.f32 %v4669_v14, %v4339_v61  ;;  %v4027_v13 = vsel %vm4016_vm11, nan, %v4026_v32  ;;  %vm3912_vm10 = vweird.f32 %v8356_v10 }
 0x52c   : > { %v5767_v1 = vpop.eup %5766  ;;  %v4648_v5 = vxor.u32 2147483648, %v5765_v8  ;;  %v4679_v16 = vmul.f32 %v4664_v22, %v4235_v37  ;;  %v4678_v60 = vmul.f32 %v4664_v22, %v4131_v20  ;;  %v3923_v43 = vsel %vm3912_vm10, nan, %v3922_v58 }
 0x52d   : > { %v4645_v36 = vxor.u32 2147483648, %v5767_v1  ;;  %vm4647_vm14 = vcmp.eq.s32.totalorder %v4642_v47, 2  ;;  %v9168_v39 = vand.u32 4294901760, %v4682_v23  ;;  %v9170_v29 = vand.u32 4294901760, %v4681_v19 }
 0x52e   : > { %vm4644_vm8 = vcmp.eq.s32.totalorder %v4642_v47, 0  ;;  %v4649_v0 = vsel %vm4647_vm14, %v4648_v5, %v5767_v1  ;;  %v4677_v11 = vmul.f32 %v4659_v35, %v4027_v13  ;;  %v9173_v25 = vsub.f32 %v4692_v54, %v9165_v17  ;;  %v4689_v13 = vpop.permute.xlu0 %4688 }
 0x52f   : > { %vm4643_vm3 = vcmp.lt.s32.totalorder %v4642_v47, 2  ;;  %v4646_v10 = vsel %vm4644_vm8, %v5765_v8, %v4645_v36  ;;  %v9175_v30 = vand.u32 4294901760, %v4680_v51  ;;  %v4676_v62 = vmul.f32 %v4659_v35, %v3923_v43 }
 0x530   : > { %vm4640_vm0 = vweird.f32 %v8774_v15  ;;  %v4650_v27 = vsel %vm4643_vm3, %v4646_v10, %v4649_v0  ;;  %v9178_v2 = vand.u32 4294901760, %v4679_v16  ;;  %v9181_v44 = vsub.f32 %v4682_v23, %v9168_v39 }
 0x531   : > { %v4651_v3 = vsel %vm4640_vm0, nan, %v4650_v27  ;;  %v9183_v63 = vand.u32 4294901760, %v4678_v60  ;;  %v9185_v4 = vand.u32 4294901760, %v4677_v11  ;;  %v4769_v31 = vand.u32 4294901760, %v9173_v25 }
 0x532   : > { %v4683_v26 = vmul.f32 %v4674_v34, %v4651_v3  ;;  %v9189_v46 = vsub.f32 %v4681_v19, %v9170_v29  ;;  %v9192_v48 = vsub.f32 %v4680_v51, %v9175_v30  ;;  %v9194_v15 = vand.u32 4294901760, %v4676_v62 }
 0x533   : > { %v9199_v59 = vsub.f32 %v4679_v16, %v9178_v2  ;;  %v9202_v57 = vsub.f32 %v4678_v60, %v9183_v63  ;;  %v4810_v6 = vand.u32 4294901760, %v9181_v44  ;;  %v4770_v49 = vsub.f32 %v9173_v25, %v4769_v31 }
 0x534   : > { %v9196_v33 = vand.u32 4294901760, %v4683_v26  ;;  %v4816_v38 = vand.u32 4294901760, %v9189_v46  ;;  %v9212_v12 = vsub.f32 %v4677_v11, %v9185_v4  ;;  %v9216_v56 = vsub.f32 %v4676_v62, %v9194_v15 }
 0x535   : > { %v4822_v18 = vand.u32 4294901760, %v9192_v48  ;;  %v4828_v24 = vand.u32 4294901760, %v9199_v59  ;;  %v4811_v28 = vsub.f32 %v9181_v44, %v4810_v6  ;;  %v4834_v21 = vand.u32 4294901760, %v9202_v57 }
 0x536   : > { %4719 = vmatprep.subr.mxu0 %v9196_v33  ;;  %v4803_v53 = vsub.f32 %v4683_v26, %v9196_v33  ;;  %v4771_v41 = vand.u32 4294901760, %v4770_v49  ;;  %v4817_v34 = vsub.f32 %v9189_v46, %v4816_v38  ;;  %v4840_v55 = vand.u32 4294901760, %v9212_v12 }
 0x537   : > { %4721 = vmatpush1.msra.mxu0 %v9168_v39  ;;  %v4823_v40 = vsub.f32 %v9192_v48, %v4822_v18  ;;  %v4846_v45 = vand.u32 4294901760, %v9216_v56  ;;  %v4829_v9 = vsub.f32 %v9199_v59, %v4828_v24  ;;  %v4812_v52 = vand.u32 4294901760, %v4811_v28 }
 0x538   : > { %4723 = vmatprep.subr.mxu0 %v9170_v29  ;;  %v4804_v7 = vand.u32 4294901760, %v4803_v53  ;;  %v4835_v14 = vsub.f32 %v9202_v57, %v4834_v21  ;;  %v4818_v61 = vand.u32 4294901760, %v4817_v34  ;;  %v4841_v54 = vsub.f32 %v9212_v12, %v4840_v55 }
 0x539   : > { %4725 = vmatpush1.msra.mxu0 %v9175_v30  ;;  %v4824_v37 = vand.u32 4294901760, %v4823_v40  ;;  %v4847_v20 = vsub.f32 %v9216_v56, %v4846_v45  ;;  %v4830_v32 = vand.u32 4294901760, %v4829_v9  ;;  %v9482_v58 = vmov 0.0  }
 0x53a   : > { %4727 = vmatprep.subr.mxu0 %v9178_v2  ;;  %v4805_v50 = vsub.f32 %v4803_v53, %v4804_v7  ;;  %v4836_v47 = vand.u32 4294901760, %v4835_v14  ;;  %v4842_v23 = vand.u32 4294901760, %v4841_v54  ;;  %v5855_v10 = vmov 1966171168  }
 0x53b   : > { %4729 = vmatpush1.msra.mxu0 %v9183_v63  ;;  %v4848_v19 = vand.u32 4294901760, %v4847_v20 }
 0x53c   : > { %4731 = vmatprep.subr.mxu0 %v9185_v4  ;;  %v4806_v42 = vand.u32 4294901760, %v4805_v50 }
 0x53d   : > { %4733 = vmatpush1.msra.mxu0 %v9194_v15 }
 0x53e   : > { %4772 = vmatmul.mubr.f32.vlgmr.msra.gmra.mxu0 %v4771_v41  ;;  %4807 = vmatprep.subr.mxu1 %v4806_v42 }
 0x53f   : > { %4916 = vmatprep.subr.mxu0 %v4803_v53  ;;  %4813 = vmatpush1.msra.mxu1 %v4812_v52 }
 0x540   : > { %4919 = vmatpush1.msra.mxu0 %v9181_v44  ;;  %4819 = vmatprep.subr.mxu1 %v4818_v61 }
 0x541   : > { %4922 = vmatprep.subr.mxu0 %v9189_v46  ;;  %4825 = vmatpush1.msra.mxu1 %v4824_v37  ;;  %v9483_v46 = vld [vmem:[#allocation8_spill] sm:$0xff] }
 0x542   : > { %4925 = vmatpush1.msra.mxu0 %v9192_v48  ;;  %4831 = vmatprep.subr.mxu1 %v4830_v32 }
 0x543   : > { %4928 = vmatprep.subr.mxu0 %v9199_v59  ;;  %4837 = vmatpush1.msra.mxu1 %v4836_v47  ;;  %v9484_v59 = vlaneseq }
 0x544   : > { %4931 = vmatpush1.msra.mxu0 %v9202_v57  ;;  %4843 = vmatprep.subr.mxu1 %v4842_v23 }
 0x545   : > { %4934 = vmatprep.subr.mxu0 %v9212_v12  ;;  %4849 = vmatpush1.msra.mxu1 %v4848_v19  ;;  %vm5257_vm12 = vcmp.lt.s32.totalorder %v9484_v59, 256 }
 0x546   : > { %4937 = vmatpush1.msra.mxu0 %v9216_v56  ;;  %4884 = vmatmul.mubr.f32.vlgmr.msra.gmra.mxu1 %v9165_v17 }
 0x547   : > { %4970 = vmatprep.mubr.f32.mxu0 %v9482_v58  ;;  %5004 = vmatprep.subr.mxu1 %v9196_v33 }
 0x548   : > { %5088 = vmatprep.subr.mxu0 %v4804_v7  ;;  %4973 = vmatmul.mubr.f32.vlgmr.msra.gmra.mxu0 %v9173_v25 }
 0x549   : > { %5006 = vmatpush1.msra.mxu1 %v9168_v39  ;;  %5092 = vmatpush1.msra.mxu0 %v4810_v6 }
 0x54a   : > { %5008 = vmatprep.subr.mxu1 %v9170_v29  ;;  %5096 = vmatprep.subr.mxu0 %v4816_v38 }
 0x54b   : > { %5010 = vmatpush1.msra.mxu1 %v9175_v30  ;;  %5100 = vmatpush1.msra.mxu0 %v4822_v18 }
 0x54c   : > { %5012 = vmatprep.subr.mxu1 %v9178_v2  ;;  %5104 = vmatprep.subr.mxu0 %v4828_v24 }
 0x54d   : > { %5014 = vmatpush1.msra.mxu1 %v9183_v63  ;;  %5108 = vmatpush1.msra.mxu0 %v4834_v21 }
 0x54e   : > { %5016 = vmatprep.subr.mxu1 %v9185_v4  ;;  %5112 = vmatprep.subr.mxu0 %v4840_v55 }
 0x54f   : > { %5018 = vmatpush1.msra.mxu1 %v9194_v15  ;;  %5051 = vmatprep.mubr.f32.mxu1 %v9482_v58 }
 0x550   : > { %5116 = vmatpush1.msra.mxu0 %v4846_v45  ;;  %5055 = vmatmul.mubr.f32.vlgmr.msra.gmra.mxu1 %v4769_v31 }
 0x551   : > { %5182 = vmatprep.subr.mxu1 %v9196_v33  ;;  %5149 = vmatprep.mubr.f32.mxu0 %v9482_v58 }
 0x552   : > { %5184 = vmatpush1.msra.mxu1 %v9168_v39  ;;  %5151 = vmatmul.mubr.f32.vlgmr.msra.gmra.mxu0 %v9165_v17 }
 0x553   : > { %5186 = vmatprep.subr.mxu1 %v9170_v29  ;;  %5229 = vmatprep.mubr.f32.mxu1 %v9482_v58 }
 0x554   : > { %5188 = vmatpush1.msra.mxu1 %v9175_v30 }
 0x555   : > { %5190 = vmatprep.subr.mxu1 %v9178_v2 }
 0x556   : > { %5192 = vmatpush1.msra.mxu1 %v9183_v63 }
 0x557   : > { %5194 = vmatprep.subr.mxu1 %v9185_v4 }
 0x558   : > { %5196 = vmatpush1.msra.mxu1 %v9194_v15 }
 0x559   : > { %5231 = vmatmul.mubr.f32.vlgmr.msra.gmra.mxu1 %v9165_v17  ;;  %v5241_v17 = vunpack.c.l.s4 %v5855_v10 }
 0x55b   : > { %v5242_v2 = vunpack.c.0.s8 %v5241_v17 }
 0x55d   : > { %v5245_v48 = vsub.s32 %v5242_v2, %v9483_v46 }
 0x5fe   : > { %v4773_v8 = vpop.f32.mrf.mxu0 }
 0x5ff   : > { %v4774_v16 = vadd.f32 %v4773_v8, %v4689_v13 }
 0x600   : > { %v4775_v51 = vpop.f32.mrf.mxu0 }
 0x601   : > { %v4776_v60 = vadd.f32 %v4775_v51, %v4689_v13 }
 0x606   : > { %v4885_v22 = vpop.f32.mrf.mxu1 }
 0x607   : > { %v4886_v43 = vadd.f32 %v4885_v22, %v4774_v16 }
 0x608   : > { %v4887_v1 = vpop.f32.mrf.mxu1  ;;  %v4974_v5 = vpop.f32.mrf.mxu0 }
 0x609   : > { %v4888_v35 = vadd.f32 %v4887_v1, %v4776_v60  ;;  %v4975_v11 = vadd.f32 %v4974_v5, %v4886_v43 }
 0x60a   : > { %v4976_v39 = vpop.f32.mrf.mxu0 }
 0x60b   : > { %v4977_v25 = vadd.f32 %v4976_v39, %v4888_v35 }
 0x610   : > { %v5056_v36 = vpop.f32.mrf.mxu1 }
 0x611   : > { %v5057_v30 = vadd.f32 %v5056_v36, %v4975_v11 }
 0x612   : > { %v5058_v29 = vpop.f32.mrf.mxu1  ;;  %v5152_v0 = vpop.f32.mrf.mxu0 }
 0x613   : > { %v5059_v62 = vadd.f32 %v5058_v29, %v4977_v25  ;;  %v5153_v44 = vadd.f32 %v5152_v0, %v5057_v30 }
 0x614   : > { %v5154_v27 = vpop.f32.mrf.mxu0 }
 0x615   : > { %v5155_v63 = vadd.f32 %v5154_v27, %v5059_v62 }
 0x619   : > { %v5232_v3 = vpop.f32.mrf.mxu1 }
 0x61a   : > { %v5233_v4 = vadd.f32 %v5232_v3, %v5153_v44 }
 0x61b   : > { %v5234_v26 = vpop.f32.mrf.mxu1 }
 0x61c   : > { %v5235_v31 = vadd.f32 %v5234_v26, %v5155_v63 }
 0x61e   : > { %v5239_v15 = vcombine.low %v5233_v4, %v5235_v31 }
 0x620   : > { %v5246_v33 = vrot.slane %v5239_v15, %v5245_v48 }
 0x622   : > { %v5253_v57 = vrot.slane %v5246_v33, %v5245_v48 }
 0x624   : > { %5259 = vst.msk [vmem:[%s466_s30] sm:$0x3] %vm5257_vm12, %v5253_v57 }
 0x625   : > { %5781 = shalt.err (!%p5778_p5)
}
 0x626   : > { %s5782_s0 = scalar_lea.hbm %s5275_s25, 32  ;;  %s5786_s30 = scalar_lea.hbm %s9322_s12, 64 }
 0x627   : > { %p5783_p6 = scmp.ne.s32.totalorder %s5275_s25, %s5782_s0  ;;  %p5787_p10 = scmp.lt.s32.totalorder %s5275_s25, %s9322_s12 }
 0x628   : > { %p5788_p11 = scmp.lt.s32.totalorder %s5786_s30, %s5782_s0 }
 0x629   : > { %p5784_p7 = pnand %p5783_p6, %p5962_p4 }
 0x62a   : > { %p5789_p12 = por %p5788_p11, %p5787_p10 }
 0x62b   : > { %p5785_p9 = pneg %p5784_p7 }
 0x62d   : > { %p5790_p13 = pnand %p5789_p12, %p5785_p9 }
 0x62f   : > { %5793 = shalt.err (!%p5790_p13)
}
 0x630   : > { %5600 = dma.vmem_to_hbm [thread:$0]  (%p5962_p4), %s5278_s14, 32, %s5275_s25, %s5261_s29  }
 0x631 PF: > { %p5606_p0 = scmp.ge.s32.totalorder %s5844_s26, 2  ;;  %s5289_s19 = sand.u32 1, %s5824_s21  }
 0x632   : > { %s5290_s27 = scalar_lea.sflag [#allocation3], %s5289_s19 }
 0x633   : > { %p5603_p1 = pnand %p5606_p0, %p5969_p8 }
 0x635   : > { %p5604_p2 = pneg %p5603_p1 }
 0x637   : > { %5819 = dma.done.wait (%p5604_p2), %s5290_s27, 32  }
 0x638   : > { %5821 = vsyncadd (%p5604_p2), %s5290_s27, 4294967264  ;;  %s25_s26 = sadd.s32 1, %s5844_s26   ;;  %s9485_s0 = sld [smem:[#allocation7_spill]] }
 0x639   : > { %p22_p3 = scmp.ge.s32.totalorder %s25_s26, 4   ;;  %s9486_s24 = sld [smem:[#allocation5_spill]] }
 0x63a   : > { %s9487_s25 = sld [smem:[#allocation6_spill]]  ;;  %s9488_s21 = smov %s5828_s22 }
 0x63b   : > { %s9489_s22 = smov %s5832_s23  ;;  %24 = sbr.rel (!%p22_p3) target bundleno = 6 (0x6), region = 112 }
 0x63e   : > { %s9490_s23 = smov %s9485_s0 }
 0x640   :  { %5295 = vsyncpa [#allocation3], 1 }
 0x641   :  { %5297 = vsyncpa [#allocation3 + $0x1], 1 }

</bundles_post_ra>
